<compile_context>
chip_gen: v7x
topology: tpu7x:2x2x1
jax: 0.10.0
libtpu: 0.0.40
codegen_flags: <defaults>
</compile_context>

<pallas_src>
import jax
import jax.numpy as jnp
from jax import lax
from jax.experimental import pallas as pl
from jax.experimental.pallas import tpu as pltpu


B_PAD = 8     # sublane count: pad batch to 8
LANE = 128    # lane count: pad feature / hidden / class dims to 128

_VMEM_SPEC = pl.BlockSpec(memory_space=pltpu.MemorySpace.VMEM)


def fused_gru_fc_kernel(x_ref, wih_ref, whh_ref, b_ref, bhn_ref, fcw_ref, fcb_ref,
                        out_ref, seq_sc, gi_sc):
    """Fused L-layer GRU + Linear head, whole sequence resident in VMEM.

    x_ref   : (T*Bp, Hp)       f32  layer-0 input (Himg zero-padded to Hp lanes)
    wih_ref : (L, Hp, 3*Hp)    bf16 input->gate weights, gates [r|z|n] on 128-lane tiles
    whh_ref : (L, Hp, 3*Hp)    bf16 hidden->gate weights (concatenated)
    b_ref   : (L, 1, 3*Hp)     f32  biases: r,z slots hold b_i+b_h; n slot holds b_in
    bhn_ref : (L, 1, Hp)       f32  b_hn (must stay inside r * (...))
    fcw_ref : (Hp, Cp)         bf16 fc weight (pre-transposed, zero-padded)
    fcb_ref : (1, Cp)          f32  fc bias
    out_ref : (T*Bp, Cp)       f32  fc output (lane-dense; sliced to C outside)
    seq_sc  : (T*Bp, Hp)       f32  VMEM inter-layer activation buffer
    gi_sc   : (T*Bp, 3*Hp)     f32  VMEM hoisted input-projection buffer
    """
    TB, Hp = seq_sc.shape
    Bp = B_PAD
    T = TB // Bp
    L = wih_ref.shape[0]
    unroll = T if T <= 8 else 8          # T-aware unroll policy

    for layer in range(L):               # static: L known at trace time
        src = x_ref if layer == 0 else seq_sc          # Din padded == Hp, shapes match
        x_bf = src[...].astype(jnp.bfloat16)           # bf16 MXU operand, fp32 acc

        # Hoisted input projection: one big matmul instead of 3 tiny ones per step.
        gi_sc[...] = jnp.dot(x_bf, wih_ref[layer],
                             preferred_element_type=jnp.float32) + b_ref[layer]

        whh = whh_ref[layer]                                   # (Hp, 3Hp) bf16, hoisted
        b_hn = jnp.broadcast_to(bhn_ref[layer], (Bp, Hp))      # hoisted broadcast

        def step(t, h_prev, whh=whh, b_hn=b_hn):
            row = pl.multiple_of(t * Bp, Bp)
            gi_t = gi_sc[pl.ds(row, Bp), :]                    # (Bp, 3Hp) fp32
            gh = jnp.dot(h_prev.astype(jnp.bfloat16), whh,     # one dot / step (bf16)
                         preferred_element_type=jnp.float32)
            # fp32 elementwise gate math (v5e VPU/EUP has no bf16).
            r = jax.nn.sigmoid(gi_t[:, 0:Hp] + gh[:, 0:Hp])
            z = jax.nn.sigmoid(gi_t[:, Hp:2 * Hp] + gh[:, Hp:2 * Hp])
            n = jnp.tanh(gi_t[:, 2 * Hp:3 * Hp] + r * (gh[:, 2 * Hp:3 * Hp] + b_hn))
            h_new = (1.0 - z) * n + z * h_prev
            seq_sc[pl.ds(row, Bp), :] = h_new                  # lane-dense full-tile vst
            return h_new                                       # h stays in vregs

        h0 = jnp.zeros((Bp, Hp), jnp.float32)
        lax.fori_loop(0, T, step, h0, unroll=unroll)

    # fc epilogue inside the same kernel (no extra pallas_call / HBM round trip).
    h_bf = seq_sc[...].astype(jnp.bfloat16)
    out_ref[...] = jnp.dot(h_bf, fcw_ref[...],
                           preferred_element_type=jnp.float32) + fcb_ref[...]


def _cost_estimate(T, Bp, Hp, Cp, L):
    flops = L * (2 * T * Bp * Hp * 3 * Hp)        # hoisted input projections
    flops += L * T * (2 * Bp * Hp * 3 * Hp)       # recurrent matmuls
    flops += 2 * T * Bp * Hp * Cp                 # fc head
    transcendentals = L * T * 3 * Bp * Hp         # 2 sigmoid + 1 tanh per step
    bytes_accessed = (
        4 * T * Bp * Hp                           # x (f32)
        + 2 * (2 * L * Hp * 3 * Hp)               # wih + whh (bf16)
        + 4 * L * (3 * Hp + Hp)                   # biases (f32)
        + 2 * Hp * Cp + 4 * Cp                    # fc params
        + 4 * T * Bp * Cp                         # output (f32)
    )
    return pl.CostEstimate(flops=flops, transcendentals=transcendentals,
                           bytes_accessed=bytes_accessed)


def _vmem_limit_bytes(T, Bp, Hp, Cp, L):
    """Actual footprint (inputs + output + scratch) with headroom."""
    inputs = (4 * T * Bp * Hp                     # x
              + 2 * (2 * L * Hp * 3 * Hp)         # wih + whh (bf16)
              + 4 * L * (3 * Hp + Hp)             # biases
              + 2 * Hp * Cp + 4 * Cp)             # fc params
    output = 4 * T * Bp * Cp
    scratch = 4 * T * Bp * Hp + 4 * T * Bp * 3 * Hp
    total = inputs + output + scratch
    return max(4 * 1024 * 1024, 2 * total + (1 << 20))


def init_params(key, input_size, hidden_size, num_layers, num_classes):
    """nn.GRU / nn.Linear-shaped random params, packed into padded TPU layout."""
    assert input_size <= LANE and hidden_size <= LANE and num_classes <= LANE
    H, Hp, Cp = hidden_size, LANE, LANE
    k = float(hidden_size) ** -0.5

    wih_l, whh_l, b_l, bhn_l, raw = [], [], [], [], []
    for layer in range(num_layers):
        din = input_size if layer == 0 else hidden_size
        key, k1, k2, k3, k4 = jax.random.split(key, 5)
        w_ih = jax.random.uniform(k1, (3 * H, din), jnp.float32, -k, k)
        w_hh = jax.random.uniform(k2, (3 * H, H), jnp.float32, -k, k)
        b_ih = jax.random.uniform(k3, (3 * H,), jnp.float32, -k, k)
        b_hh = jax.random.uniform(k4, (3 * H,), jnp.float32, -k, k)
        raw.append((w_ih, w_hh, b_ih, b_hh))

        wih_p = jnp.zeros((Hp, 3 * Hp), jnp.float32)
        whh_p = jnp.zeros((Hp, 3 * Hp), jnp.float32)
        b_p = jnp.zeros((1, 3 * Hp), jnp.float32)
        bhn_p = jnp.zeros((1, Hp), jnp.float32)
        for g in range(3):  # gate order [r, z, n]; each gate on a 128-lane boundary
            wih_p = wih_p.at[:din, g * Hp:g * Hp + H].set(w_ih[g * H:(g + 1) * H, :].T)
            whh_p = whh_p.at[:H, g * Hp:g * Hp + H].set(w_hh[g * H:(g + 1) * H, :].T)
        b_p = b_p.at[0, 0 * Hp:0 * Hp + H].set(b_ih[0:H] + b_hh[0:H])          # r: fold
        b_p = b_p.at[0, 1 * Hp:1 * Hp + H].set(b_ih[H:2 * H] + b_hh[H:2 * H])  # z: fold
        b_p = b_p.at[0, 2 * Hp:2 * Hp + H].set(b_ih[2 * H:3 * H])              # n: b_in
        bhn_p = bhn_p.at[0, :H].set(b_hh[2 * H:3 * H])                         # b_hn
        wih_l.append(wih_p.astype(jnp.bfloat16))      # bf16 MXU operands
        whh_l.append(whh_p.astype(jnp.bfloat16))
        b_l.append(b_p)
        bhn_l.append(bhn_p)

    key, kf1, kf2 = jax.random.split(key, 3)
    fc_w = jax.random.uniform(kf1, (num_classes, H), jnp.float32, -k, k)
    fc_b = jax.random.uniform(kf2, (num_classes,), jnp.float32, -k, k)
    fcw_p = jnp.zeros((Hp, Cp), jnp.float32).at[:H, :num_classes].set(fc_w.T)
    fcb_p = jnp.zeros((1, Cp), jnp.float32).at[0, :num_classes].set(fc_b)

    return {
        "wih": jnp.stack(wih_l),                # (L, 128, 384) bf16
        "whh": jnp.stack(whh_l),                # (L, 128, 384) bf16
        "b": jnp.stack(b_l),                    # (L, 1, 384)   f32
        "bhn": jnp.stack(bhn_l),                # (L, 1, 128)   f32
        "fcw": fcw_p.astype(jnp.bfloat16),      # (128, 128)    bf16
        "fcb": fcb_p,                           # (1, 128)      f32
        "num_classes": num_classes,
        "hidden_size": H,
        "raw_gru": raw,
        "raw_fc": (fc_w, fc_b),
    }


def sequence_predictor_forward(x, params):
    """x: (B, 1, Himg, W) float32 -> (W, B, num_classes) float32."""
    num_classes = params["num_classes"]
    x = jnp.squeeze(x, axis=1)                                # (B, Himg, W)
    seq = jnp.transpose(x, (2, 0, 1)).astype(jnp.float32)     # (T=W, B, Himg)
    T, B, Din = seq.shape
    L, Hp, _ = params["wih"].shape
    Bp, Cp = B_PAD, LANE
    assert B <= Bp and Din <= Hp

    # sublane/lane padding + 2-D layout (cheap one-time JAX op outside the kernel)
    seq_pad = jnp.zeros((T, Bp, Hp), jnp.float32).at[:, :B, :Din].set(seq)
    seq_pad = seq_pad.reshape(T * Bp, Hp)

    out_pad = pl.pallas_call(
        fused_gru_fc_kernel,
        out_shape=jax.ShapeDtypeStruct((T * Bp, Cp), jnp.float32),
        in_specs=[_VMEM_SPEC] * 7,
        out_specs=_VMEM_SPEC,
        scratch_shapes=[
            pltpu.VMEM((T * Bp, Hp), jnp.float32),        # inter-layer activations
            pltpu.VMEM((T * Bp, 3 * Hp), jnp.float32),    # hoisted input projection
        ],
        compiler_params=pltpu.CompilerParams(
            vmem_limit_bytes=_vmem_limit_bytes(T, Bp, Hp, Cp, L)),
        cost_estimate=_cost_estimate(T, Bp, Hp, Cp, L),
    )(seq_pad, params["wih"], params["whh"], params["b"], params["bhn"],
      params["fcw"], params["fcb"])

    return out_pad.reshape(T, Bp, Cp)[:, :B, :num_classes]


def reference_forward(x, params):
    """Pure-JAX fp32 reference matching PyTorch nn.GRU + nn.Linear (inference)."""
    x = jnp.squeeze(x, axis=1)
    h_seq = jnp.transpose(x, (2, 0, 1)).astype(jnp.float32)   # (T, B, Himg)
    Bsz = h_seq.shape[1]
    for (w_ih, w_hh, b_ih, b_hh) in params["raw_gru"]:
        H = w_hh.shape[1]

        def cell(h, x_t, w_ih=w_ih, w_hh=w_hh, b_ih=b_ih, b_hh=b_hh):
            gi = x_t @ w_ih.T + b_ih
            gh = h @ w_hh.T + b_hh
            i_r, i_z, i_n = jnp.split(gi, 3, axis=-1)
            h_r, h_z, h_n = jnp.split(gh, 3, axis=-1)
            r = jax.nn.sigmoid(i_r + h_r)
            z = jax.nn.sigmoid(i_z + h_z)
            n = jnp.tanh(i_n + r * h_n)
            h_new = (1.0 - z) * n + z * h
            return h_new, h_new

        h0 = jnp.zeros((Bsz, H), jnp.float32)
        _, h_seq = lax.scan(cell, h0, h_seq)
    fc_w, fc_b = params["raw_fc"]
    return h_seq @ fc_w.T + fc_b


if __name__ == "__main__":
    # B=2 batch, C=1 channel, Himg=16 (GRU input_size), W=8 (sequence length)
    # hidden_size=32, num_layers=2, num_classes=5
    B, Himg, W = 2, 16, 8
    hidden_size, num_layers, num_classes = 32, 2, 5

    key = jax.random.PRNGKey(0)
    key, kx, kp = jax.random.split(key, 3)
    x = jax.random.normal(kx, (B, 1, Himg, W), dtype=jnp.float32)
    params = init_params(kp, Himg, hidden_size, num_layers, num_classes)

    out = sequence_predictor_forward(x, params)
    out = jax.block_until_ready(out)

    assert out.shape == (W, B, num_classes), out.shape
    assert bool(jnp.all(jnp.isfinite(out)))

    ref = jax.block_until_ready(reference_forward(x, params))
    max_diff = float(jnp.max(jnp.abs(out - ref)))
    # bf16 MXU operands with fp32 accumulation: tolerance relaxed vs pure fp32.
    assert jnp.allclose(out, ref, rtol=2e-2, atol=2e-2), max_diff

    print("KERNEL_OK")
</pallas_src>

<mosaic_0001>
module attributes {stable_mosaic.version = 11 : i64} {
  func.func @fused_gru_fc_kernel(%arg0: memref<64x128xf32, #tpu.memory_space<vmem>>, %arg1: memref<2x128x384xbf16, #tpu.memory_space<vmem>>, %arg2: memref<2x128x384xbf16, #tpu.memory_space<vmem>>, %arg3: memref<2x1x384xf32, #tpu.memory_space<vmem>>, %arg4: memref<2x1x128xf32, #tpu.memory_space<vmem>>, %arg5: memref<128x128xbf16, #tpu.memory_space<vmem>>, %arg6: memref<1x128xf32, #tpu.memory_space<vmem>>, %arg7: memref<64x128xf32, #tpu.memory_space<vmem>>, %arg8: memref<64x128xf32, #tpu.memory_space<vmem>>, %arg9: memref<64x384xf32, #tpu.memory_space<vmem>>) attributes {dimension_semantics = [], scalar_prefetch = 0 : i64, scratch_operands = 2 : i64, tpu.core_type = #tpu.core_type<tc>} {
    %c0 = arith.constant 0 : index
    %c0_0 = arith.constant 0 : index
    %0 = vector.load %arg0[%c0, %c0_0] : memref<64x128xf32, #tpu.memory_space<vmem>>, vector<64x128xf32>
    %1 = arith.truncf %0 : vector<64x128xf32> to vector<64x128xbf16>
    %c0_1 = arith.constant 0 : index
    %c0_2 = arith.constant 0 : index
    %c0_3 = arith.constant 0 : index
    %2 = vector.load %arg1[%c0_1, %c0_2, %c0_3] : memref<2x128x384xbf16, #tpu.memory_space<vmem>>, vector<1x128x384xbf16>
    %3 = vector.shape_cast %2 : vector<1x128x384xbf16> to vector<128x384xbf16>
    %cst = arith.constant dense<0.000000e+00> : vector<64x384xf32>
    %4 = tpu.matmul %1, %3, %cst {dimension_numbers = #tpu.dot_dimension_numbers<[1], [0], [0], [1], [0, 0, 1, 1], [], []>} : vector<64x128xbf16>, vector<128x384xbf16>, vector<64x384xf32> -> vector<64x384xf32>
    %c0_4 = arith.constant 0 : index
    %c0_5 = arith.constant 0 : index
    %c0_6 = arith.constant 0 : index
    %5 = vector.load %arg3[%c0_4, %c0_5, %c0_6] : memref<2x1x384xf32, #tpu.memory_space<vmem>>, vector<1x1x384xf32>
    %6 = vector.shape_cast %5 : vector<1x1x384xf32> to vector<1x384xf32>
    %7 = vector.broadcast %6 : vector<1x384xf32> to vector<64x384xf32>
    %8 = arith.addf %4, %7 : vector<64x384xf32>
    %c0_7 = arith.constant 0 : index
    %c0_8 = arith.constant 0 : index
    %9 = vector.load %arg9[%c0_7, %c0_8] : memref<64x384xf32, #tpu.memory_space<vmem>>, vector<64x384xf32>
    tpu.vector_store %arg9[%c0_7, %c0_8], %8 {strides = array<i32>} : memref<64x384xf32, #tpu.memory_space<vmem>>, vector<64x384xf32>,
    %c0_9 = arith.constant 0 : index
    %c0_10 = arith.constant 0 : index
    %c0_11 = arith.constant 0 : index
    %10 = vector.load %arg2[%c0_9, %c0_10, %c0_11] : memref<2x128x384xbf16, #tpu.memory_space<vmem>>, vector<1x128x384xbf16>
    %11 = vector.shape_cast %10 : vector<1x128x384xbf16> to vector<128x384xbf16>
    %c0_12 = arith.constant 0 : index
    %c0_13 = arith.constant 0 : index
    %c0_14 = arith.constant 0 : index
    %12 = vector.load %arg4[%c0_12, %c0_13, %c0_14] : memref<2x1x128xf32, #tpu.memory_space<vmem>>, vector<1x1x128xf32>
    %13 = vector.shape_cast %12 : vector<1x1x128xf32> to vector<1x128xf32>
    %14 = vector.shape_cast %13 : vector<1x128xf32> to vector<1x128xf32>
    %15 = vector.broadcast %14 : vector<1x128xf32> to vector<8x128xf32>
    %cst_15 = arith.constant 0.000000e+00 : f32
    %16 = vector.broadcast %cst_15 : f32 to vector<8x128xf32>
    %c0_i32 = arith.constant 0 : i32
    %c8_i32 = arith.constant 8 : i32
    %17 = arith.muli %c0_i32, %c8_i32 : i32
    %18 = tpu.assume_multiple %17, 8 : i32
    %19 = arith.index_cast %18 : i32 to index
    %c0_16 = arith.constant 0 : index
    %20 = vector.load %arg9[%19, %c0_16] : memref<64x384xf32, #tpu.memory_space<vmem>>, vector<8x384xf32>
    %21 = arith.truncf %16 : vector<8x128xf32> to vector<8x128xbf16>
    %cst_17 = arith.constant dense<0.000000e+00> : vector<8x384xf32>
    %22 = tpu.matmul %21, %11, %cst_17 {dimension_numbers = #tpu.dot_dimension_numbers<[1], [0], [0], [1], [0, 0, 1, 1], [], []>} : vector<8x128xbf16>, vector<128x384xbf16>, vector<8x384xf32> -> vector<8x384xf32>
    %23 = vector.extract_strided_slice %20 {offsets = [0, 0], sizes = [8, 128], strides = [1, 1]} : vector<8x384xf32> to vector<8x128xf32>
    %24 = vector.extract_strided_slice %22 {offsets = [0, 0], sizes = [8, 128], strides = [1, 1]} : vector<8x384xf32> to vector<8x128xf32>
    %25 = arith.addf %23, %24 : vector<8x128xf32>
    %26 = arith.negf %25 : vector<8x128xf32>
    %27 = math.exp %26 : vector<8x128xf32>
    %cst_18 = arith.constant 1.000000e+00 : f32
    %28 = vector.broadcast %cst_18 : f32 to vector<8x128xf32>
    %29 = arith.addf %28, %27 : vector<8x128xf32>
    %30 = arith.divf %28, %29 : vector<8x128xf32>
    %31 = vector.extract_strided_slice %20 {offsets = [0, 128], sizes = [8, 128], strides = [1, 1]} : vector<8x384xf32> to vector<8x128xf32>
    %32 = vector.extract_strided_slice %22 {offsets = [0, 128], sizes = [8, 128], strides = [1, 1]} : vector<8x384xf32> to vector<8x128xf32>
    %33 = arith.addf %31, %32 : vector<8x128xf32>
    %34 = arith.negf %33 : vector<8x128xf32>
    %35 = math.exp %34 : vector<8x128xf32>
    %cst_19 = arith.constant 1.000000e+00 : f32
    %36 = vector.broadcast %cst_19 : f32 to vector<8x128xf32>
    %37 = arith.addf %36, %35 : vector<8x128xf32>
    %38 = arith.divf %36, %37 : vector<8x128xf32>
    %39 = vector.extract_strided_slice %20 {offsets = [0, 256], sizes = [8, 128], strides = [1, 1]} : vector<8x384xf32> to vector<8x128xf32>
    %40 = vector.extract_strided_slice %22 {offsets = [0, 256], sizes = [8, 128], strides = [1, 1]} : vector<8x384xf32> to vector<8x128xf32>
    %41 = arith.addf %40, %15 : vector<8x128xf32>
    %42 = arith.mulf %30, %41 : vector<8x128xf32>
    %43 = arith.addf %39, %42 : vector<8x128xf32>
    %44 = math.tanh %43 : vector<8x128xf32>
    %cst_20 = arith.constant 1.000000e+00 : f32
    %45 = vector.broadcast %cst_20 : f32 to vector<8x128xf32>
    %46 = arith.subf %45, %38 : vector<8x128xf32>
    %47 = arith.mulf %46, %44 : vector<8x128xf32>
    %48 = arith.mulf %38, %16 : vector<8x128xf32>
    %49 = arith.addf %47, %48 : vector<8x128xf32>
    %50 = arith.index_cast %18 : i32 to index
    %c0_21 = arith.constant 0 : index
    %51 = vector.load %arg8[%50, %c0_21] : memref<64x128xf32, #tpu.memory_space<vmem>>, vector<8x128xf32>
    tpu.vector_store %arg8[%50, %c0_21], %49 {strides = array<i32>} : memref<64x128xf32, #tpu.memory_space<vmem>>, vector<8x128xf32>,
    %c1_i32 = arith.constant 1 : i32
    %c8_i32_22 = arith.constant 8 : i32
    %52 = arith.muli %c1_i32, %c8_i32_22 : i32
    %53 = tpu.assume_multiple %52, 8 : i32
    %54 = arith.index_cast %53 : i32 to index
    %c0_23 = arith.constant 0 : index
    %55 = vector.load %arg9[%54, %c0_23] : memref<64x384xf32, #tpu.memory_space<vmem>>, vector<8x384xf32>
    %56 = arith.truncf %49 : vector<8x128xf32> to vector<8x128xbf16>
    %cst_24 = arith.constant dense<0.000000e+00> : vector<8x384xf32>
    %57 = tpu.matmul %56, %11, %cst_24 {dimension_numbers = #tpu.dot_dimension_numbers<[1], [0], [0], [1], [0, 0, 1, 1], [], []>} : vector<8x128xbf16>, vector<128x384xbf16>, vector<8x384xf32> -> vector<8x384xf32>
    %58 = vector.extract_strided_slice %55 {offsets = [0, 0], sizes = [8, 128], strides = [1, 1]} : vector<8x384xf32> to vector<8x128xf32>
    %59 = vector.extract_strided_slice %57 {offsets = [0, 0], sizes = [8, 128], strides = [1, 1]} : vector<8x384xf32> to vector<8x128xf32>
    %60 = arith.addf %58, %59 : vector<8x128xf32>
    %61 = arith.negf %60 : vector<8x128xf32>
    %62 = math.exp %61 : vector<8x128xf32>
    %cst_25 = arith.constant 1.000000e+00 : f32
    %63 = vector.broadcast %cst_25 : f32 to vector<8x128xf32>
    %64 = arith.addf %63, %62 : vector<8x128xf32>
    %65 = arith.divf %63, %64 : vector<8x128xf32>
    %66 = vector.extract_strided_slice %55 {offsets = [0, 128], sizes = [8, 128], strides = [1, 1]} : vector<8x384xf32> to vector<8x128xf32>
    %67 = vector.extract_strided_slice %57 {offsets = [0, 128], sizes = [8, 128], strides = [1, 1]} : vector<8x384xf32> to vector<8x128xf32>
    %68 = arith.addf %66, %67 : vector<8x128xf32>
    %69 = arith.negf %68 : vector<8x128xf32>
    %70 = math.exp %69 : vector<8x128xf32>
    %cst_26 = arith.constant 1.000000e+00 : f32
    %71 = vector.broadcast %cst_26 : f32 to vector<8x128xf32>
    %72 = arith.addf %71, %70 : vector<8x128xf32>
    %73 = arith.divf %71, %72 : vector<8x128xf32>
    %74 = vector.extract_strided_slice %55 {offsets = [0, 256], sizes = [8, 128], strides = [1, 1]} : vector<8x384xf32> to vector<8x128xf32>
    %75 = vector.extract_strided_slice %57 {offsets = [0, 256], sizes = [8, 128], strides = [1, 1]} : vector<8x384xf32> to vector<8x128xf32>
    %76 = arith.addf %75, %15 : vector<8x128xf32>
    %77 = arith.mulf %65, %76 : vector<8x128xf32>
    %78 = arith.addf %74, %77 : vector<8x128xf32>
    %79 = math.tanh %78 : vector<8x128xf32>
    %cst_27 = arith.constant 1.000000e+00 : f32
    %80 = vector.broadcast %cst_27 : f32 to vector<8x128xf32>
    %81 = arith.subf %80, %73 : vector<8x128xf32>
    %82 = arith.mulf %81, %79 : vector<8x128xf32>
    %83 = arith.mulf %73, %49 : vector<8x128xf32>
    %84 = arith.addf %82, %83 : vector<8x128xf32>
    %85 = arith.index_cast %53 : i32 to index
    %c0_28 = arith.constant 0 : index
    %86 = vector.load %arg8[%85, %c0_28] : memref<64x128xf32, #tpu.memory_space<vmem>>, vector<8x128xf32>
    tpu.vector_store %arg8[%85, %c0_28], %84 {strides = array<i32>} : memref<64x128xf32, #tpu.memory_space<vmem>>, vector<8x128xf32>,
    %c2_i32 = arith.constant 2 : i32
    %c8_i32_29 = arith.constant 8 : i32
    %87 = arith.muli %c2_i32, %c8_i32_29 : i32
    %88 = tpu.assume_multiple %87, 8 : i32
    %89 = arith.index_cast %88 : i32 to index
    %c0_30 = arith.constant 0 : index
    %90 = vector.load %arg9[%89, %c0_30] : memref<64x384xf32, #tpu.memory_space<vmem>>, vector<8x384xf32>
    %91 = arith.truncf %84 : vector<8x128xf32> to vector<8x128xbf16>
    %cst_31 = arith.constant dense<0.000000e+00> : vector<8x384xf32>
    %92 = tpu.matmul %91, %11, %cst_31 {dimension_numbers = #tpu.dot_dimension_numbers<[1], [0], [0], [1], [0, 0, 1, 1], [], []>} : vector<8x128xbf16>, vector<128x384xbf16>, vector<8x384xf32> -> vector<8x384xf32>
    %93 = vector.extract_strided_slice %90 {offsets = [0, 0], sizes = [8, 128], strides = [1, 1]} : vector<8x384xf32> to vector<8x128xf32>
    %94 = vector.extract_strided_slice %92 {offsets = [0, 0], sizes = [8, 128], strides = [1, 1]} : vector<8x384xf32> to vector<8x128xf32>
    %95 = arith.addf %93, %94 : vector<8x128xf32>
    %96 = arith.negf %95 : vector<8x128xf32>
    %97 = math.exp %96 : vector<8x128xf32>
    %cst_32 = arith.constant 1.000000e+00 : f32
    %98 = vector.broadcast %cst_32 : f32 to vector<8x128xf32>
    %99 = arith.addf %98, %97 : vector<8x128xf32>
    %100 = arith.divf %98, %99 : vector<8x128xf32>
    %101 = vector.extract_strided_slice %90 {offsets = [0, 128], sizes = [8, 128], strides = [1, 1]} : vector<8x384xf32> to vector<8x128xf32>
    %102 = vector.extract_strided_slice %92 {offsets = [0, 128], sizes = [8, 128], strides = [1, 1]} : vector<8x384xf32> to vector<8x128xf32>
    %103 = arith.addf %101, %102 : vector<8x128xf32>
    %104 = arith.negf %103 : vector<8x128xf32>
    %105 = math.exp %104 : vector<8x128xf32>
    %cst_33 = arith.constant 1.000000e+00 : f32
    %106 = vector.broadcast %cst_33 : f32 to vector<8x128xf32>
    %107 = arith.addf %106, %105 : vector<8x128xf32>
    %108 = arith.divf %106, %107 : vector<8x128xf32>
    %109 = vector.extract_strided_slice %90 {offsets = [0, 256], sizes = [8, 128], strides = [1, 1]} : vector<8x384xf32> to vector<8x128xf32>
    %110 = vector.extract_strided_slice %92 {offsets = [0, 256], sizes = [8, 128], strides = [1, 1]} : vector<8x384xf32> to vector<8x128xf32>
    %111 = arith.addf %110, %15 : vector<8x128xf32>
    %112 = arith.mulf %100, %111 : vector<8x128xf32>
    %113 = arith.addf %109, %112 : vector<8x128xf32>
    %114 = math.tanh %113 : vector<8x128xf32>
    %cst_34 = arith.constant 1.000000e+00 : f32
    %115 = vector.broadcast %cst_34 : f32 to vector<8x128xf32>
    %116 = arith.subf %115, %108 : vector<8x128xf32>
    %117 = arith.mulf %116, %114 : vector<8x128xf32>
    %118 = arith.mulf %108, %84 : vector<8x128xf32>
    %119 = arith.addf %117, %118 : vector<8x128xf32>
    %120 = arith.index_cast %88 : i32 to index
    %c0_35 = arith.constant 0 : index
    %121 = vector.load %arg8[%120, %c0_35] : memref<64x128xf32, #tpu.memory_space<vmem>>, vector<8x128xf32>
    tpu.vector_store %arg8[%120, %c0_35], %119 {strides = array<i32>} : memref<64x128xf32, #tpu.memory_space<vmem>>, vector<8x128xf32>,
    %c3_i32 = arith.constant 3 : i32
    %c8_i32_36 = arith.constant 8 : i32
    %122 = arith.muli %c3_i32, %c8_i32_36 : i32
    %123 = tpu.assume_multiple %122, 8 : i32
    %124 = arith.index_cast %123 : i32 to index
    %c0_37 = arith.constant 0 : index
    %125 = vector.load %arg9[%124, %c0_37] : memref<64x384xf32, #tpu.memory_space<vmem>>, vector<8x384xf32>
    %126 = arith.truncf %119 : vector<8x128xf32> to vector<8x128xbf16>
    %cst_38 = arith.constant dense<0.000000e+00> : vector<8x384xf32>
    %127 = tpu.matmul %126, %11, %cst_38 {dimension_numbers = #tpu.dot_dimension_numbers<[1], [0], [0], [1], [0, 0, 1, 1], [], []>} : vector<8x128xbf16>, vector<128x384xbf16>, vector<8x384xf32> -> vector<8x384xf32>
    %128 = vector.extract_strided_slice %125 {offsets = [0, 0], sizes = [8, 128], strides = [1, 1]} : vector<8x384xf32> to vector<8x128xf32>
    %129 = vector.extract_strided_slice %127 {offsets = [0, 0], sizes = [8, 128], strides = [1, 1]} : vector<8x384xf32> to vector<8x128xf32>
    %130 = arith.addf %128, %129 : vector<8x128xf32>
    %131 = arith.negf %130 : vector<8x128xf32>
    %132 = math.exp %131 : vector<8x128xf32>
    %cst_39 = arith.constant 1.000000e+00 : f32
    %133 = vector.broadcast %cst_39 : f32 to vector<8x128xf32>
    %134 = arith.addf %133, %132 : vector<8x128xf32>
    %135 = arith.divf %133, %134 : vector<8x128xf32>
    %136 = vector.extract_strided_slice %125 {offsets = [0, 128], sizes = [8, 128], strides = [1, 1]} : vector<8x384xf32> to vector<8x128xf32>
    %137 = vector.extract_strided_slice %127 {offsets = [0, 128], sizes = [8, 128], strides = [1, 1]} : vector<8x384xf32> to vector<8x128xf32>
    %138 = arith.addf %136, %137 : vector<8x128xf32>
    %139 = arith.negf %138 : vector<8x128xf32>
    %140 = math.exp %139 : vector<8x128xf32>
    %cst_40 = arith.constant 1.000000e+00 : f32
    %141 = vector.broadcast %cst_40 : f32 to vector<8x128xf32>
    %142 = arith.addf %141, %140 : vector<8x128xf32>
    %143 = arith.divf %141, %142 : vector<8x128xf32>
    %144 = vector.extract_strided_slice %125 {offsets = [0, 256], sizes = [8, 128], strides = [1, 1]} : vector<8x384xf32> to vector<8x128xf32>
    %145 = vector.extract_strided_slice %127 {offsets = [0, 256], sizes = [8, 128], strides = [1, 1]} : vector<8x384xf32> to vector<8x128xf32>
    %146 = arith.addf %145, %15 : vector<8x128xf32>
    %147 = arith.mulf %135, %146 : vector<8x128xf32>
    %148 = arith.addf %144, %147 : vector<8x128xf32>
    %149 = math.tanh %148 : vector<8x128xf32>
    %cst_41 = arith.constant 1.000000e+00 : f32
    %150 = vector.broadcast %cst_41 : f32 to vector<8x128xf32>
    %151 = arith.subf %150, %143 : vector<8x128xf32>
    %152 = arith.mulf %151, %149 : vector<8x128xf32>
    %153 = arith.mulf %143, %119 : vector<8x128xf32>
    %154 = arith.addf %152, %153 : vector<8x128xf32>
    %155 = arith.index_cast %123 : i32 to index
    %c0_42 = arith.constant 0 : index
    %156 = vector.load %arg8[%155, %c0_42] : memref<64x128xf32, #tpu.memory_space<vmem>>, vector<8x128xf32>
    tpu.vector_store %arg8[%155, %c0_42], %154 {strides = array<i32>} : memref<64x128xf32, #tpu.memory_space<vmem>>, vector<8x128xf32>,
    %c4_i32 = arith.constant 4 : i32
    %c8_i32_43 = arith.constant 8 : i32
    %157 = arith.muli %c4_i32, %c8_i32_43 : i32
    %158 = tpu.assume_multiple %157, 8 : i32
    %159 = arith.index_cast %158 : i32 to index
    %c0_44 = arith.constant 0 : index
    %160 = vector.load %arg9[%159, %c0_44] : memref<64x384xf32, #tpu.memory_space<vmem>>, vector<8x384xf32>
    %161 = arith.truncf %154 : vector<8x128xf32> to vector<8x128xbf16>
    %cst_45 = arith.constant dense<0.000000e+00> : vector<8x384xf32>
    %162 = tpu.matmul %161, %11, %cst_45 {dimension_numbers = #tpu.dot_dimension_numbers<[1], [0], [0], [1], [0, 0, 1, 1], [], []>} : vector<8x128xbf16>, vector<128x384xbf16>, vector<8x384xf32> -> vector<8x384xf32>
    %163 = vector.extract_strided_slice %160 {offsets = [0, 0], sizes = [8, 128], strides = [1, 1]} : vector<8x384xf32> to vector<8x128xf32>
    %164 = vector.extract_strided_slice %162 {offsets = [0, 0], sizes = [8, 128], strides = [1, 1]} : vector<8x384xf32> to vector<8x128xf32>
    %165 = arith.addf %163, %164 : vector<8x128xf32>
    %166 = arith.negf %165 : vector<8x128xf32>
    %167 = math.exp %166 : vector<8x128xf32>
    %cst_46 = arith.constant 1.000000e+00 : f32
    %168 = vector.broadcast %cst_46 : f32 to vector<8x128xf32>
    %169 = arith.addf %168, %167 : vector<8x128xf32>
    %170 = arith.divf %168, %169 : vector<8x128xf32>
    %171 = vector.extract_strided_slice %160 {offsets = [0, 128], sizes = [8, 128], strides = [1, 1]} : vector<8x384xf32> to vector<8x128xf32>
    %172 = vector.extract_strided_slice %162 {offsets = [0, 128], sizes = [8, 128], strides = [1, 1]} : vector<8x384xf32> to vector<8x128xf32>
    %173 = arith.addf %171, %172 : vector<8x128xf32>
    %174 = arith.negf %173 : vector<8x128xf32>
    %175 = math.exp %174 : vector<8x128xf32>
    %cst_47 = arith.constant 1.000000e+00 : f32
    %176 = vector.broadcast %cst_47 : f32 to vector<8x128xf32>
    %177 = arith.addf %176, %175 : vector<8x128xf32>
    %178 = arith.divf %176, %177 : vector<8x128xf32>
    %179 = vector.extract_strided_slice %160 {offsets = [0, 256], sizes = [8, 128], strides = [1, 1]} : vector<8x384xf32> to vector<8x128xf32>
    %180 = vector.extract_strided_slice %162 {offsets = [0, 256], sizes = [8, 128], strides = [1, 1]} : vector<8x384xf32> to vector<8x128xf32>
    %181 = arith.addf %180, %15 : vector<8x128xf32>
    %182 = arith.mulf %170, %181 : vector<8x128xf32>
    %183 = arith.addf %179, %182 : vector<8x128xf32>
    %184 = math.tanh %183 : vector<8x128xf32>
    %cst_48 = arith.constant 1.000000e+00 : f32
    %185 = vector.broadcast %cst_48 : f32 to vector<8x128xf32>
    %186 = arith.subf %185, %178 : vector<8x128xf32>
    %187 = arith.mulf %186, %184 : vector<8x128xf32>
    %188 = arith.mulf %178, %154 : vector<8x128xf32>
    %189 = arith.addf %187, %188 : vector<8x128xf32>
    %190 = arith.index_cast %158 : i32 to index
    %c0_49 = arith.constant 0 : index
    %191 = vector.load %arg8[%190, %c0_49] : memref<64x128xf32, #tpu.memory_space<vmem>>, vector<8x128xf32>
    tpu.vector_store %arg8[%190, %c0_49], %189 {strides = array<i32>} : memref<64x128xf32, #tpu.memory_space<vmem>>, vector<8x128xf32>,
    %c5_i32 = arith.constant 5 : i32
    %c8_i32_50 = arith.constant 8 : i32
    %192 = arith.muli %c5_i32, %c8_i32_50 : i32
    %193 = tpu.assume_multiple %192, 8 : i32
    %194 = arith.index_cast %193 : i32 to index
    %c0_51 = arith.constant 0 : index
    %195 = vector.load %arg9[%194, %c0_51] : memref<64x384xf32, #tpu.memory_space<vmem>>, vector<8x384xf32>
    %196 = arith.truncf %189 : vector<8x128xf32> to vector<8x128xbf16>
    %cst_52 = arith.constant dense<0.000000e+00> : vector<8x384xf32>
    %197 = tpu.matmul %196, %11, %cst_52 {dimension_numbers = #tpu.dot_dimension_numbers<[1], [0], [0], [1], [0, 0, 1, 1], [], []>} : vector<8x128xbf16>, vector<128x384xbf16>, vector<8x384xf32> -> vector<8x384xf32>
    %198 = vector.extract_strided_slice %195 {offsets = [0, 0], sizes = [8, 128], strides = [1, 1]} : vector<8x384xf32> to vector<8x128xf32>
    %199 = vector.extract_strided_slice %197 {offsets = [0, 0], sizes = [8, 128], strides = [1, 1]} : vector<8x384xf32> to vector<8x128xf32>
    %200 = arith.addf %198, %199 : vector<8x128xf32>
    %201 = arith.negf %200 : vector<8x128xf32>
    %202 = math.exp %201 : vector<8x128xf32>
    %cst_53 = arith.constant 1.000000e+00 : f32
    %203 = vector.broadcast %cst_53 : f32 to vector<8x128xf32>
    %204 = arith.addf %203, %202 : vector<8x128xf32>
    %205 = arith.divf %203, %204 : vector<8x128xf32>
    %206 = vector.extract_strided_slice %195 {offsets = [0, 128], sizes = [8, 128], strides = [1, 1]} : vector<8x384xf32> to vector<8x128xf32>
    %207 = vector.extract_strided_slice %197 {offsets = [0, 128], sizes = [8, 128], strides = [1, 1]} : vector<8x384xf32> to vector<8x128xf32>
    %208 = arith.addf %206, %207 : vector<8x128xf32>
    %209 = arith.negf %208 : vector<8x128xf32>
    %210 = math.exp %209 : vector<8x128xf32>
    %cst_54 = arith.constant 1.000000e+00 : f32
    %211 = vector.broadcast %cst_54 : f32 to vector<8x128xf32>
    %212 = arith.addf %211, %210 : vector<8x128xf32>
    %213 = arith.divf %211, %212 : vector<8x128xf32>
    %214 = vector.extract_strided_slice %195 {offsets = [0, 256], sizes = [8, 128], strides = [1, 1]} : vector<8x384xf32> to vector<8x128xf32>
    %215 = vector.extract_strided_slice %197 {offsets = [0, 256], sizes = [8, 128], strides = [1, 1]} : vector<8x384xf32> to vector<8x128xf32>
    %216 = arith.addf %215, %15 : vector<8x128xf32>
    %217 = arith.mulf %205, %216 : vector<8x128xf32>
    %218 = arith.addf %214, %217 : vector<8x128xf32>
    %219 = math.tanh %218 : vector<8x128xf32>
    %cst_55 = arith.constant 1.000000e+00 : f32
    %220 = vector.broadcast %cst_55 : f32 to vector<8x128xf32>
    %221 = arith.subf %220, %213 : vector<8x128xf32>
    %222 = arith.mulf %221, %219 : vector<8x128xf32>
    %223 = arith.mulf %213, %189 : vector<8x128xf32>
    %224 = arith.addf %222, %223 : vector<8x128xf32>
    %225 = arith.index_cast %193 : i32 to index
    %c0_56 = arith.constant 0 : index
    %226 = vector.load %arg8[%225, %c0_56] : memref<64x128xf32, #tpu.memory_space<vmem>>, vector<8x128xf32>
    tpu.vector_store %arg8[%225, %c0_56], %224 {strides = array<i32>} : memref<64x128xf32, #tpu.memory_space<vmem>>, vector<8x128xf32>,
    %c6_i32 = arith.constant 6 : i32
    %c8_i32_57 = arith.constant 8 : i32
    %227 = arith.muli %c6_i32, %c8_i32_57 : i32
    %228 = tpu.assume_multiple %227, 8 : i32
    %229 = arith.index_cast %228 : i32 to index
    %c0_58 = arith.constant 0 : index
    %230 = vector.load %arg9[%229, %c0_58] : memref<64x384xf32, #tpu.memory_space<vmem>>, vector<8x384xf32>
    %231 = arith.truncf %224 : vector<8x128xf32> to vector<8x128xbf16>
    %cst_59 = arith.constant dense<0.000000e+00> : vector<8x384xf32>
    %232 = tpu.matmul %231, %11, %cst_59 {dimension_numbers = #tpu.dot_dimension_numbers<[1], [0], [0], [1], [0, 0, 1, 1], [], []>} : vector<8x128xbf16>, vector<128x384xbf16>, vector<8x384xf32> -> vector<8x384xf32>
    %233 = vector.extract_strided_slice %230 {offsets = [0, 0], sizes = [8, 128], strides = [1, 1]} : vector<8x384xf32> to vector<8x128xf32>
    %234 = vector.extract_strided_slice %232 {offsets = [0, 0], sizes = [8, 128], strides = [1, 1]} : vector<8x384xf32> to vector<8x128xf32>
    %235 = arith.addf %233, %234 : vector<8x128xf32>
    %236 = arith.negf %235 : vector<8x128xf32>
    %237 = math.exp %236 : vector<8x128xf32>
    %cst_60 = arith.constant 1.000000e+00 : f32
    %238 = vector.broadcast %cst_60 : f32 to vector<8x128xf32>
    %239 = arith.addf %238, %237 : vector<8x128xf32>
    %240 = arith.divf %238, %239 : vector<8x128xf32>
    %241 = vector.extract_strided_slice %230 {offsets = [0, 128], sizes = [8, 128], strides = [1, 1]} : vector<8x384xf32> to vector<8x128xf32>
    %242 = vector.extract_strided_slice %232 {offsets = [0, 128], sizes = [8, 128], strides = [1, 1]} : vector<8x384xf32> to vector<8x128xf32>
    %243 = arith.addf %241, %242 : vector<8x128xf32>
    %244 = arith.negf %243 : vector<8x128xf32>
    %245 = math.exp %244 : vector<8x128xf32>
    %cst_61 = arith.constant 1.000000e+00 : f32
    %246 = vector.broadcast %cst_61 : f32 to vector<8x128xf32>
    %247 = arith.addf %246, %245 : vector<8x128xf32>
    %248 = arith.divf %246, %247 : vector<8x128xf32>
    %249 = vector.extract_strided_slice %230 {offsets = [0, 256], sizes = [8, 128], strides = [1, 1]} : vector<8x384xf32> to vector<8x128xf32>
    %250 = vector.extract_strided_slice %232 {offsets = [0, 256], sizes = [8, 128], strides = [1, 1]} : vector<8x384xf32> to vector<8x128xf32>
    %251 = arith.addf %250, %15 : vector<8x128xf32>
    %252 = arith.mulf %240, %251 : vector<8x128xf32>
    %253 = arith.addf %249, %252 : vector<8x128xf32>
    %254 = math.tanh %253 : vector<8x128xf32>
    %cst_62 = arith.constant 1.000000e+00 : f32
    %255 = vector.broadcast %cst_62 : f32 to vector<8x128xf32>
    %256 = arith.subf %255, %248 : vector<8x128xf32>
    %257 = arith.mulf %256, %254 : vector<8x128xf32>
    %258 = arith.mulf %248, %224 : vector<8x128xf32>
    %259 = arith.addf %257, %258 : vector<8x128xf32>
    %260 = arith.index_cast %228 : i32 to index
    %c0_63 = arith.constant 0 : index
    %261 = vector.load %arg8[%260, %c0_63] : memref<64x128xf32, #tpu.memory_space<vmem>>, vector<8x128xf32>
    tpu.vector_store %arg8[%260, %c0_63], %259 {strides = array<i32>} : memref<64x128xf32, #tpu.memory_space<vmem>>, vector<8x128xf32>,
    %c7_i32 = arith.constant 7 : i32
    %c8_i32_64 = arith.constant 8 : i32
    %262 = arith.muli %c7_i32, %c8_i32_64 : i32
    %263 = tpu.assume_multiple %262, 8 : i32
    %264 = arith.index_cast %263 : i32 to index
    %c0_65 = arith.constant 0 : index
    %265 = vector.load %arg9[%264, %c0_65] : memref<64x384xf32, #tpu.memory_space<vmem>>, vector<8x384xf32>
    %266 = arith.truncf %259 : vector<8x128xf32> to vector<8x128xbf16>
    %cst_66 = arith.constant dense<0.000000e+00> : vector<8x384xf32>
    %267 = tpu.matmul %266, %11, %cst_66 {dimension_numbers = #tpu.dot_dimension_numbers<[1], [0], [0], [1], [0, 0, 1, 1], [], []>} : vector<8x128xbf16>, vector<128x384xbf16>, vector<8x384xf32> -> vector<8x384xf32>
    %268 = vector.extract_strided_slice %265 {offsets = [0, 0], sizes = [8, 128], strides = [1, 1]} : vector<8x384xf32> to vector<8x128xf32>
    %269 = vector.extract_strided_slice %267 {offsets = [0, 0], sizes = [8, 128], strides = [1, 1]} : vector<8x384xf32> to vector<8x128xf32>
    %270 = arith.addf %268, %269 : vector<8x128xf32>
    %271 = arith.negf %270 : vector<8x128xf32>
    %272 = math.exp %271 : vector<8x128xf32>
    %cst_67 = arith.constant 1.000000e+00 : f32
    %273 = vector.broadcast %cst_67 : f32 to vector<8x128xf32>
    %274 = arith.addf %273, %272 : vector<8x128xf32>
    %275 = arith.divf %273, %274 : vector<8x128xf32>
    %276 = vector.extract_strided_slice %265 {offsets = [0, 128], sizes = [8, 128], strides = [1, 1]} : vector<8x384xf32> to vector<8x128xf32>
    %277 = vector.extract_strided_slice %267 {offsets = [0, 128], sizes = [8, 128], strides = [1, 1]} : vector<8x384xf32> to vector<8x128xf32>
    %278 = arith.addf %276, %277 : vector<8x128xf32>
    %279 = arith.negf %278 : vector<8x128xf32>
    %280 = math.exp %279 : vector<8x128xf32>
    %cst_68 = arith.constant 1.000000e+00 : f32
    %281 = vector.broadcast %cst_68 : f32 to vector<8x128xf32>
    %282 = arith.addf %281, %280 : vector<8x128xf32>
    %283 = arith.divf %281, %282 : vector<8x128xf32>
    %284 = vector.extract_strided_slice %265 {offsets = [0, 256], sizes = [8, 128], strides = [1, 1]} : vector<8x384xf32> to vector<8x128xf32>
    %285 = vector.extract_strided_slice %267 {offsets = [0, 256], sizes = [8, 128], strides = [1, 1]} : vector<8x384xf32> to vector<8x128xf32>
    %286 = arith.addf %285, %15 : vector<8x128xf32>
    %287 = arith.mulf %275, %286 : vector<8x128xf32>
    %288 = arith.addf %284, %287 : vector<8x128xf32>
    %289 = math.tanh %288 : vector<8x128xf32>
    %cst_69 = arith.constant 1.000000e+00 : f32
    %290 = vector.broadcast %cst_69 : f32 to vector<8x128xf32>
    %291 = arith.subf %290, %283 : vector<8x128xf32>
    %292 = arith.mulf %291, %289 : vector<8x128xf32>
    %293 = arith.mulf %283, %259 : vector<8x128xf32>
    %294 = arith.addf %292, %293 : vector<8x128xf32>
    %295 = arith.index_cast %263 : i32 to index
    %c0_70 = arith.constant 0 : index
    %296 = vector.load %arg8[%295, %c0_70] : memref<64x128xf32, #tpu.memory_space<vmem>>, vector<8x128xf32>
    tpu.vector_store %arg8[%295, %c0_70], %294 {strides = array<i32>} : memref<64x128xf32, #tpu.memory_space<vmem>>, vector<8x128xf32>,
    %c8_i32_71 = arith.constant 8 : i32
    %c0_72 = arith.constant 0 : index
    %c0_73 = arith.constant 0 : index
    %297 = vector.load %arg8[%c0_72, %c0_73] : memref<64x128xf32, #tpu.memory_space<vmem>>, vector<64x128xf32>
    %298 = arith.truncf %297 : vector<64x128xf32> to vector<64x128xbf16>
    %c1 = arith.constant 1 : index
    %c0_74 = arith.constant 0 : index
    %c0_75 = arith.constant 0 : index
    %299 = vector.load %arg1[%c1, %c0_74, %c0_75] : memref<2x128x384xbf16, #tpu.memory_space<vmem>>, vector<1x128x384xbf16>
    %300 = vector.shape_cast %299 : vector<1x128x384xbf16> to vector<128x384xbf16>
    %cst_76 = arith.constant dense<0.000000e+00> : vector<64x384xf32>
    %301 = tpu.matmul %298, %300, %cst_76 {dimension_numbers = #tpu.dot_dimension_numbers<[1], [0], [0], [1], [0, 0, 1, 1], [], []>} : vector<64x128xbf16>, vector<128x384xbf16>, vector<64x384xf32> -> vector<64x384xf32>
    %c1_77 = arith.constant 1 : index
    %c0_78 = arith.constant 0 : index
    %c0_79 = arith.constant 0 : index
    %302 = vector.load %arg3[%c1_77, %c0_78, %c0_79] : memref<2x1x384xf32, #tpu.memory_space<vmem>>, vector<1x1x384xf32>
    %303 = vector.shape_cast %302 : vector<1x1x384xf32> to vector<1x384xf32>
    %304 = vector.broadcast %303 : vector<1x384xf32> to vector<64x384xf32>
    %305 = arith.addf %301, %304 : vector<64x384xf32>
    %c0_80 = arith.constant 0 : index
    %c0_81 = arith.constant 0 : index
    %306 = vector.load %arg9[%c0_80, %c0_81] : memref<64x384xf32, #tpu.memory_space<vmem>>, vector<64x384xf32>
    tpu.vector_store %arg9[%c0_80, %c0_81], %305 {strides = array<i32>} : memref<64x384xf32, #tpu.memory_space<vmem>>, vector<64x384xf32>,
    %c1_82 = arith.constant 1 : index
    %c0_83 = arith.constant 0 : index
    %c0_84 = arith.constant 0 : index
    %307 = vector.load %arg2[%c1_82, %c0_83, %c0_84] : memref<2x128x384xbf16, #tpu.memory_space<vmem>>, vector<1x128x384xbf16>
    %308 = vector.shape_cast %307 : vector<1x128x384xbf16> to vector<128x384xbf16>
    %c1_85 = arith.constant 1 : index
    %c0_86 = arith.constant 0 : index
    %c0_87 = arith.constant 0 : index
    %309 = vector.load %arg4[%c1_85, %c0_86, %c0_87] : memref<2x1x128xf32, #tpu.memory_space<vmem>>, vector<1x1x128xf32>
    %310 = vector.shape_cast %309 : vector<1x1x128xf32> to vector<1x128xf32>
    %311 = vector.shape_cast %310 : vector<1x128xf32> to vector<1x128xf32>
    %312 = vector.broadcast %311 : vector<1x128xf32> to vector<8x128xf32>
    %cst_88 = arith.constant 0.000000e+00 : f32
    %313 = vector.broadcast %cst_88 : f32 to vector<8x128xf32>
    %c0_i32_89 = arith.constant 0 : i32
    %c8_i32_90 = arith.constant 8 : i32
    %314 = arith.muli %c0_i32_89, %c8_i32_90 : i32
    %315 = tpu.assume_multiple %314, 8 : i32
    %316 = arith.index_cast %315 : i32 to index
    %c0_91 = arith.constant 0 : index
    %317 = vector.load %arg9[%316, %c0_91] : memref<64x384xf32, #tpu.memory_space<vmem>>, vector<8x384xf32>
    %318 = arith.truncf %313 : vector<8x128xf32> to vector<8x128xbf16>
    %cst_92 = arith.constant dense<0.000000e+00> : vector<8x384xf32>
    %319 = tpu.matmul %318, %308, %cst_92 {dimension_numbers = #tpu.dot_dimension_numbers<[1], [0], [0], [1], [0, 0, 1, 1], [], []>} : vector<8x128xbf16>, vector<128x384xbf16>, vector<8x384xf32> -> vector<8x384xf32>
    %320 = vector.extract_strided_slice %317 {offsets = [0, 0], sizes = [8, 128], strides = [1, 1]} : vector<8x384xf32> to vector<8x128xf32>
    %321 = vector.extract_strided_slice %319 {offsets = [0, 0], sizes = [8, 128], strides = [1, 1]} : vector<8x384xf32> to vector<8x128xf32>
    %322 = arith.addf %320, %321 : vector<8x128xf32>
    %323 = arith.negf %322 : vector<8x128xf32>
    %324 = math.exp %323 : vector<8x128xf32>
    %cst_93 = arith.constant 1.000000e+00 : f32
    %325 = vector.broadcast %cst_93 : f32 to vector<8x128xf32>
    %326 = arith.addf %325, %324 : vector<8x128xf32>
    %327 = arith.divf %325, %326 : vector<8x128xf32>
    %328 = vector.extract_strided_slice %317 {offsets = [0, 128], sizes = [8, 128], strides = [1, 1]} : vector<8x384xf32> to vector<8x128xf32>
    %329 = vector.extract_strided_slice %319 {offsets = [0, 128], sizes = [8, 128], strides = [1, 1]} : vector<8x384xf32> to vector<8x128xf32>
    %330 = arith.addf %328, %329 : vector<8x128xf32>
    %331 = arith.negf %330 : vector<8x128xf32>
    %332 = math.exp %331 : vector<8x128xf32>
    %cst_94 = arith.constant 1.000000e+00 : f32
    %333 = vector.broadcast %cst_94 : f32 to vector<8x128xf32>
    %334 = arith.addf %333, %332 : vector<8x128xf32>
    %335 = arith.divf %333, %334 : vector<8x128xf32>
    %336 = vector.extract_strided_slice %317 {offsets = [0, 256], sizes = [8, 128], strides = [1, 1]} : vector<8x384xf32> to vector<8x128xf32>
    %337 = vector.extract_strided_slice %319 {offsets = [0, 256], sizes = [8, 128], strides = [1, 1]} : vector<8x384xf32> to vector<8x128xf32>
    %338 = arith.addf %337, %312 : vector<8x128xf32>
    %339 = arith.mulf %327, %338 : vector<8x128xf32>
    %340 = arith.addf %336, %339 : vector<8x128xf32>
    %341 = math.tanh %340 : vector<8x128xf32>
    %cst_95 = arith.constant 1.000000e+00 : f32
    %342 = vector.broadcast %cst_95 : f32 to vector<8x128xf32>
    %343 = arith.subf %342, %335 : vector<8x128xf32>
    %344 = arith.mulf %343, %341 : vector<8x128xf32>
    %345 = arith.mulf %335, %313 : vector<8x128xf32>
    %346 = arith.addf %344, %345 : vector<8x128xf32>
    %347 = arith.index_cast %315 : i32 to index
    %c0_96 = arith.constant 0 : index
    %348 = vector.load %arg8[%347, %c0_96] : memref<64x128xf32, #tpu.memory_space<vmem>>, vector<8x128xf32>
    tpu.vector_store %arg8[%347, %c0_96], %346 {strides = array<i32>} : memref<64x128xf32, #tpu.memory_space<vmem>>, vector<8x128xf32>,
    %c1_i32_97 = arith.constant 1 : i32
    %c8_i32_98 = arith.constant 8 : i32
    %349 = arith.muli %c1_i32_97, %c8_i32_98 : i32
    %350 = tpu.assume_multiple %349, 8 : i32
    %351 = arith.index_cast %350 : i32 to index
    %c0_99 = arith.constant 0 : index
    %352 = vector.load %arg9[%351, %c0_99] : memref<64x384xf32, #tpu.memory_space<vmem>>, vector<8x384xf32>
    %353 = arith.truncf %346 : vector<8x128xf32> to vector<8x128xbf16>
    %cst_100 = arith.constant dense<0.000000e+00> : vector<8x384xf32>
    %354 = tpu.matmul %353, %308, %cst_100 {dimension_numbers = #tpu.dot_dimension_numbers<[1], [0], [0], [1], [0, 0, 1, 1], [], []>} : vector<8x128xbf16>, vector<128x384xbf16>, vector<8x384xf32> -> vector<8x384xf32>
    %355 = vector.extract_strided_slice %352 {offsets = [0, 0], sizes = [8, 128], strides = [1, 1]} : vector<8x384xf32> to vector<8x128xf32>
    %356 = vector.extract_strided_slice %354 {offsets = [0, 0], sizes = [8, 128], strides = [1, 1]} : vector<8x384xf32> to vector<8x128xf32>
    %357 = arith.addf %355, %356 : vector<8x128xf32>
    %358 = arith.negf %357 : vector<8x128xf32>
    %359 = math.exp %358 : vector<8x128xf32>
    %cst_101 = arith.constant 1.000000e+00 : f32
    %360 = vector.broadcast %cst_101 : f32 to vector<8x128xf32>
    %361 = arith.addf %360, %359 : vector<8x128xf32>
    %362 = arith.divf %360, %361 : vector<8x128xf32>
    %363 = vector.extract_strided_slice %352 {offsets = [0, 128], sizes = [8, 128], strides = [1, 1]} : vector<8x384xf32> to vector<8x128xf32>
    %364 = vector.extract_strided_slice %354 {offsets = [0, 128], sizes = [8, 128], strides = [1, 1]} : vector<8x384xf32> to vector<8x128xf32>
    %365 = arith.addf %363, %364 : vector<8x128xf32>
    %366 = arith.negf %365 : vector<8x128xf32>
    %367 = math.exp %366 : vector<8x128xf32>
    %cst_102 = arith.constant 1.000000e+00 : f32
    %368 = vector.broadcast %cst_102 : f32 to vector<8x128xf32>
    %369 = arith.addf %368, %367 : vector<8x128xf32>
    %370 = arith.divf %368, %369 : vector<8x128xf32>
    %371 = vector.extract_strided_slice %352 {offsets = [0, 256], sizes = [8, 128], strides = [1, 1]} : vector<8x384xf32> to vector<8x128xf32>
    %372 = vector.extract_strided_slice %354 {offsets = [0, 256], sizes = [8, 128], strides = [1, 1]} : vector<8x384xf32> to vector<8x128xf32>
    %373 = arith.addf %372, %312 : vector<8x128xf32>
    %374 = arith.mulf %362, %373 : vector<8x128xf32>
    %375 = arith.addf %371, %374 : vector<8x128xf32>
    %376 = math.tanh %375 : vector<8x128xf32>
    %cst_103 = arith.constant 1.000000e+00 : f32
    %377 = vector.broadcast %cst_103 : f32 to vector<8x128xf32>
    %378 = arith.subf %377, %370 : vector<8x128xf32>
    %379 = arith.mulf %378, %376 : vector<8x128xf32>
    %380 = arith.mulf %370, %346 : vector<8x128xf32>
    %381 = arith.addf %379, %380 : vector<8x128xf32>
    %382 = arith.index_cast %350 : i32 to index
    %c0_104 = arith.constant 0 : index
    %383 = vector.load %arg8[%382, %c0_104] : memref<64x128xf32, #tpu.memory_space<vmem>>, vector<8x128xf32>
    tpu.vector_store %arg8[%382, %c0_104], %381 {strides = array<i32>} : memref<64x128xf32, #tpu.memory_space<vmem>>, vector<8x128xf32>,
    %c2_i32_105 = arith.constant 2 : i32
    %c8_i32_106 = arith.constant 8 : i32
    %384 = arith.muli %c2_i32_105, %c8_i32_106 : i32
    %385 = tpu.assume_multiple %384, 8 : i32
    %386 = arith.index_cast %385 : i32 to index
    %c0_107 = arith.constant 0 : index
    %387 = vector.load %arg9[%386, %c0_107] : memref<64x384xf32, #tpu.memory_space<vmem>>, vector<8x384xf32>
    %388 = arith.truncf %381 : vector<8x128xf32> to vector<8x128xbf16>
    %cst_108 = arith.constant dense<0.000000e+00> : vector<8x384xf32>
    %389 = tpu.matmul %388, %308, %cst_108 {dimension_numbers = #tpu.dot_dimension_numbers<[1], [0], [0], [1], [0, 0, 1, 1], [], []>} : vector<8x128xbf16>, vector<128x384xbf16>, vector<8x384xf32> -> vector<8x384xf32>
    %390 = vector.extract_strided_slice %387 {offsets = [0, 0], sizes = [8, 128], strides = [1, 1]} : vector<8x384xf32> to vector<8x128xf32>
    %391 = vector.extract_strided_slice %389 {offsets = [0, 0], sizes = [8, 128], strides = [1, 1]} : vector<8x384xf32> to vector<8x128xf32>
    %392 = arith.addf %390, %391 : vector<8x128xf32>
    %393 = arith.negf %392 : vector<8x128xf32>
    %394 = math.exp %393 : vector<8x128xf32>
    %cst_109 = arith.constant 1.000000e+00 : f32
    %395 = vector.broadcast %cst_109 : f32 to vector<8x128xf32>
    %396 = arith.addf %395, %394 : vector<8x128xf32>
    %397 = arith.divf %395, %396 : vector<8x128xf32>
    %398 = vector.extract_strided_slice %387 {offsets = [0, 128], sizes = [8, 128], strides = [1, 1]} : vector<8x384xf32> to vector<8x128xf32>
    %399 = vector.extract_strided_slice %389 {offsets = [0, 128], sizes = [8, 128], strides = [1, 1]} : vector<8x384xf32> to vector<8x128xf32>
    %400 = arith.addf %398, %399 : vector<8x128xf32>
    %401 = arith.negf %400 : vector<8x128xf32>
    %402 = math.exp %401 : vector<8x128xf32>
    %cst_110 = arith.constant 1.000000e+00 : f32
    %403 = vector.broadcast %cst_110 : f32 to vector<8x128xf32>
    %404 = arith.addf %403, %402 : vector<8x128xf32>
    %405 = arith.divf %403, %404 : vector<8x128xf32>
    %406 = vector.extract_strided_slice %387 {offsets = [0, 256], sizes = [8, 128], strides = [1, 1]} : vector<8x384xf32> to vector<8x128xf32>
    %407 = vector.extract_strided_slice %389 {offsets = [0, 256], sizes = [8, 128], strides = [1, 1]} : vector<8x384xf32> to vector<8x128xf32>
    %408 = arith.addf %407, %312 : vector<8x128xf32>
    %409 = arith.mulf %397, %408 : vector<8x128xf32>
    %410 = arith.addf %406, %409 : vector<8x128xf32>
    %411 = math.tanh %410 : vector<8x128xf32>
    %cst_111 = arith.constant 1.000000e+00 : f32
    %412 = vector.broadcast %cst_111 : f32 to vector<8x128xf32>
    %413 = arith.subf %412, %405 : vector<8x128xf32>
    %414 = arith.mulf %413, %411 : vector<8x128xf32>
    %415 = arith.mulf %405, %381 : vector<8x128xf32>
    %416 = arith.addf %414, %415 : vector<8x128xf32>
    %417 = arith.index_cast %385 : i32 to index
    %c0_112 = arith.constant 0 : index
    %418 = vector.load %arg8[%417, %c0_112] : memref<64x128xf32, #tpu.memory_space<vmem>>, vector<8x128xf32>
    tpu.vector_store %arg8[%417, %c0_112], %416 {strides = array<i32>} : memref<64x128xf32, #tpu.memory_space<vmem>>, vector<8x128xf32>,
    %c3_i32_113 = arith.constant 3 : i32
    %c8_i32_114 = arith.constant 8 : i32
    %419 = arith.muli %c3_i32_113, %c8_i32_114 : i32
    %420 = tpu.assume_multiple %419, 8 : i32
    %421 = arith.index_cast %420 : i32 to index
    %c0_115 = arith.constant 0 : index
    %422 = vector.load %arg9[%421, %c0_115] : memref<64x384xf32, #tpu.memory_space<vmem>>, vector<8x384xf32>
    %423 = arith.truncf %416 : vector<8x128xf32> to vector<8x128xbf16>
    %cst_116 = arith.constant dense<0.000000e+00> : vector<8x384xf32>
    %424 = tpu.matmul %423, %308, %cst_116 {dimension_numbers = #tpu.dot_dimension_numbers<[1], [0], [0], [1], [0, 0, 1, 1], [], []>} : vector<8x128xbf16>, vector<128x384xbf16>, vector<8x384xf32> -> vector<8x384xf32>
    %425 = vector.extract_strided_slice %422 {offsets = [0, 0], sizes = [8, 128], strides = [1, 1]} : vector<8x384xf32> to vector<8x128xf32>
    %426 = vector.extract_strided_slice %424 {offsets = [0, 0], sizes = [8, 128], strides = [1, 1]} : vector<8x384xf32> to vector<8x128xf32>
    %427 = arith.addf %425, %426 : vector<8x128xf32>
    %428 = arith.negf %427 : vector<8x128xf32>
    %429 = math.exp %428 : vector<8x128xf32>
    %cst_117 = arith.constant 1.000000e+00 : f32
    %430 = vector.broadcast %cst_117 : f32 to vector<8x128xf32>
    %431 = arith.addf %430, %429 : vector<8x128xf32>
    %432 = arith.divf %430, %431 : vector<8x128xf32>
    %433 = vector.extract_strided_slice %422 {offsets = [0, 128], sizes = [8, 128], strides = [1, 1]} : vector<8x384xf32> to vector<8x128xf32>
    %434 = vector.extract_strided_slice %424 {offsets = [0, 128], sizes = [8, 128], strides = [1, 1]} : vector<8x384xf32> to vector<8x128xf32>
    %435 = arith.addf %433, %434 : vector<8x128xf32>
    %436 = arith.negf %435 : vector<8x128xf32>
    %437 = math.exp %436 : vector<8x128xf32>
    %cst_118 = arith.constant 1.000000e+00 : f32
    %438 = vector.broadcast %cst_118 : f32 to vector<8x128xf32>
    %439 = arith.addf %438, %437 : vector<8x128xf32>
    %440 = arith.divf %438, %439 : vector<8x128xf32>
    %441 = vector.extract_strided_slice %422 {offsets = [0, 256], sizes = [8, 128], strides = [1, 1]} : vector<8x384xf32> to vector<8x128xf32>
    %442 = vector.extract_strided_slice %424 {offsets = [0, 256], sizes = [8, 128], strides = [1, 1]} : vector<8x384xf32> to vector<8x128xf32>
    %443 = arith.addf %442, %312 : vector<8x128xf32>
    %444 = arith.mulf %432, %443 : vector<8x128xf32>
    %445 = arith.addf %441, %444 : vector<8x128xf32>
    %446 = math.tanh %445 : vector<8x128xf32>
    %cst_119 = arith.constant 1.000000e+00 : f32
    %447 = vector.broadcast %cst_119 : f32 to vector<8x128xf32>
    %448 = arith.subf %447, %440 : vector<8x128xf32>
    %449 = arith.mulf %448, %446 : vector<8x128xf32>
    %450 = arith.mulf %440, %416 : vector<8x128xf32>
    %451 = arith.addf %449, %450 : vector<8x128xf32>
    %452 = arith.index_cast %420 : i32 to index
    %c0_120 = arith.constant 0 : index
    %453 = vector.load %arg8[%452, %c0_120] : memref<64x128xf32, #tpu.memory_space<vmem>>, vector<8x128xf32>
    tpu.vector_store %arg8[%452, %c0_120], %451 {strides = array<i32>} : memref<64x128xf32, #tpu.memory_space<vmem>>, vector<8x128xf32>,
    %c4_i32_121 = arith.constant 4 : i32
    %c8_i32_122 = arith.constant 8 : i32
    %454 = arith.muli %c4_i32_121, %c8_i32_122 : i32
    %455 = tpu.assume_multiple %454, 8 : i32
    %456 = arith.index_cast %455 : i32 to index
    %c0_123 = arith.constant 0 : index
    %457 = vector.load %arg9[%456, %c0_123] : memref<64x384xf32, #tpu.memory_space<vmem>>, vector<8x384xf32>
    %458 = arith.truncf %451 : vector<8x128xf32> to vector<8x128xbf16>
    %cst_124 = arith.constant dense<0.000000e+00> : vector<8x384xf32>
    %459 = tpu.matmul %458, %308, %cst_124 {dimension_numbers = #tpu.dot_dimension_numbers<[1], [0], [0], [1], [0, 0, 1, 1], [], []>} : vector<8x128xbf16>, vector<128x384xbf16>, vector<8x384xf32> -> vector<8x384xf32>
    %460 = vector.extract_strided_slice %457 {offsets = [0, 0], sizes = [8, 128], strides = [1, 1]} : vector<8x384xf32> to vector<8x128xf32>
    %461 = vector.extract_strided_slice %459 {offsets = [0, 0], sizes = [8, 128], strides = [1, 1]} : vector<8x384xf32> to vector<8x128xf32>
    %462 = arith.addf %460, %461 : vector<8x128xf32>
    %463 = arith.negf %462 : vector<8x128xf32>
    %464 = math.exp %463 : vector<8x128xf32>
    %cst_125 = arith.constant 1.000000e+00 : f32
    %465 = vector.broadcast %cst_125 : f32 to vector<8x128xf32>
    %466 = arith.addf %465, %464 : vector<8x128xf32>
    %467 = arith.divf %465, %466 : vector<8x128xf32>
    %468 = vector.extract_strided_slice %457 {offsets = [0, 128], sizes = [8, 128], strides = [1, 1]} : vector<8x384xf32> to vector<8x128xf32>
    %469 = vector.extract_strided_slice %459 {offsets = [0, 128], sizes = [8, 128], strides = [1, 1]} : vector<8x384xf32> to vector<8x128xf32>
    %470 = arith.addf %468, %469 : vector<8x128xf32>
    %471 = arith.negf %470 : vector<8x128xf32>
    %472 = math.exp %471 : vector<8x128xf32>
    %cst_126 = arith.constant 1.000000e+00 : f32
    %473 = vector.broadcast %cst_126 : f32 to vector<8x128xf32>
    %474 = arith.addf %473, %472 : vector<8x128xf32>
    %475 = arith.divf %473, %474 : vector<8x128xf32>
    %476 = vector.extract_strided_slice %457 {offsets = [0, 256], sizes = [8, 128], strides = [1, 1]} : vector<8x384xf32> to vector<8x128xf32>
    %477 = vector.extract_strided_slice %459 {offsets = [0, 256], sizes = [8, 128], strides = [1, 1]} : vector<8x384xf32> to vector<8x128xf32>
    %478 = arith.addf %477, %312 : vector<8x128xf32>
    %479 = arith.mulf %467, %478 : vector<8x128xf32>
    %480 = arith.addf %476, %479 : vector<8x128xf32>
    %481 = math.tanh %480 : vector<8x128xf32>
    %cst_127 = arith.constant 1.000000e+00 : f32
    %482 = vector.broadcast %cst_127 : f32 to vector<8x128xf32>
    %483 = arith.subf %482, %475 : vector<8x128xf32>
    %484 = arith.mulf %483, %481 : vector<8x128xf32>
    %485 = arith.mulf %475, %451 : vector<8x128xf32>
    %486 = arith.addf %484, %485 : vector<8x128xf32>
    %487 = arith.index_cast %455 : i32 to index
    %c0_128 = arith.constant 0 : index
    %488 = vector.load %arg8[%487, %c0_128] : memref<64x128xf32, #tpu.memory_space<vmem>>, vector<8x128xf32>
    tpu.vector_store %arg8[%487, %c0_128], %486 {strides = array<i32>} : memref<64x128xf32, #tpu.memory_space<vmem>>, vector<8x128xf32>,
    %c5_i32_129 = arith.constant 5 : i32
    %c8_i32_130 = arith.constant 8 : i32
    %489 = arith.muli %c5_i32_129, %c8_i32_130 : i32
    %490 = tpu.assume_multiple %489, 8 : i32
    %491 = arith.index_cast %490 : i32 to index
    %c0_131 = arith.constant 0 : index
    %492 = vector.load %arg9[%491, %c0_131] : memref<64x384xf32, #tpu.memory_space<vmem>>, vector<8x384xf32>
    %493 = arith.truncf %486 : vector<8x128xf32> to vector<8x128xbf16>
    %cst_132 = arith.constant dense<0.000000e+00> : vector<8x384xf32>
    %494 = tpu.matmul %493, %308, %cst_132 {dimension_numbers = #tpu.dot_dimension_numbers<[1], [0], [0], [1], [0, 0, 1, 1], [], []>} : vector<8x128xbf16>, vector<128x384xbf16>, vector<8x384xf32> -> vector<8x384xf32>
    %495 = vector.extract_strided_slice %492 {offsets = [0, 0], sizes = [8, 128], strides = [1, 1]} : vector<8x384xf32> to vector<8x128xf32>
    %496 = vector.extract_strided_slice %494 {offsets = [0, 0], sizes = [8, 128], strides = [1, 1]} : vector<8x384xf32> to vector<8x128xf32>
    %497 = arith.addf %495, %496 : vector<8x128xf32>
    %498 = arith.negf %497 : vector<8x128xf32>
    %499 = math.exp %498 : vector<8x128xf32>
    %cst_133 = arith.constant 1.000000e+00 : f32
    %500 = vector.broadcast %cst_133 : f32 to vector<8x128xf32>
    %501 = arith.addf %500, %499 : vector<8x128xf32>
    %502 = arith.divf %500, %501 : vector<8x128xf32>
    %503 = vector.extract_strided_slice %492 {offsets = [0, 128], sizes = [8, 128], strides = [1, 1]} : vector<8x384xf32> to vector<8x128xf32>
    %504 = vector.extract_strided_slice %494 {offsets = [0, 128], sizes = [8, 128], strides = [1, 1]} : vector<8x384xf32> to vector<8x128xf32>
    %505 = arith.addf %503, %504 : vector<8x128xf32>
    %506 = arith.negf %505 : vector<8x128xf32>
    %507 = math.exp %506 : vector<8x128xf32>
    %cst_134 = arith.constant 1.000000e+00 : f32
    %508 = vector.broadcast %cst_134 : f32 to vector<8x128xf32>
    %509 = arith.addf %508, %507 : vector<8x128xf32>
    %510 = arith.divf %508, %509 : vector<8x128xf32>
    %511 = vector.extract_strided_slice %492 {offsets = [0, 256], sizes = [8, 128], strides = [1, 1]} : vector<8x384xf32> to vector<8x128xf32>
    %512 = vector.extract_strided_slice %494 {offsets = [0, 256], sizes = [8, 128], strides = [1, 1]} : vector<8x384xf32> to vector<8x128xf32>
    %513 = arith.addf %512, %312 : vector<8x128xf32>
    %514 = arith.mulf %502, %513 : vector<8x128xf32>
    %515 = arith.addf %511, %514 : vector<8x128xf32>
    %516 = math.tanh %515 : vector<8x128xf32>
    %cst_135 = arith.constant 1.000000e+00 : f32
    %517 = vector.broadcast %cst_135 : f32 to vector<8x128xf32>
    %518 = arith.subf %517, %510 : vector<8x128xf32>
    %519 = arith.mulf %518, %516 : vector<8x128xf32>
    %520 = arith.mulf %510, %486 : vector<8x128xf32>
    %521 = arith.addf %519, %520 : vector<8x128xf32>
    %522 = arith.index_cast %490 : i32 to index
    %c0_136 = arith.constant 0 : index
    %523 = vector.load %arg8[%522, %c0_136] : memref<64x128xf32, #tpu.memory_space<vmem>>, vector<8x128xf32>
    tpu.vector_store %arg8[%522, %c0_136], %521 {strides = array<i32>} : memref<64x128xf32, #tpu.memory_space<vmem>>, vector<8x128xf32>,
    %c6_i32_137 = arith.constant 6 : i32
    %c8_i32_138 = arith.constant 8 : i32
    %524 = arith.muli %c6_i32_137, %c8_i32_138 : i32
    %525 = tpu.assume_multiple %524, 8 : i32
    %526 = arith.index_cast %525 : i32 to index
    %c0_139 = arith.constant 0 : index
    %527 = vector.load %arg9[%526, %c0_139] : memref<64x384xf32, #tpu.memory_space<vmem>>, vector<8x384xf32>
    %528 = arith.truncf %521 : vector<8x128xf32> to vector<8x128xbf16>
    %cst_140 = arith.constant dense<0.000000e+00> : vector<8x384xf32>
    %529 = tpu.matmul %528, %308, %cst_140 {dimension_numbers = #tpu.dot_dimension_numbers<[1], [0], [0], [1], [0, 0, 1, 1], [], []>} : vector<8x128xbf16>, vector<128x384xbf16>, vector<8x384xf32> -> vector<8x384xf32>
    %530 = vector.extract_strided_slice %527 {offsets = [0, 0], sizes = [8, 128], strides = [1, 1]} : vector<8x384xf32> to vector<8x128xf32>
    %531 = vector.extract_strided_slice %529 {offsets = [0, 0], sizes = [8, 128], strides = [1, 1]} : vector<8x384xf32> to vector<8x128xf32>
    %532 = arith.addf %530, %531 : vector<8x128xf32>
    %533 = arith.negf %532 : vector<8x128xf32>
    %534 = math.exp %533 : vector<8x128xf32>
    %cst_141 = arith.constant 1.000000e+00 : f32
    %535 = vector.broadcast %cst_141 : f32 to vector<8x128xf32>
    %536 = arith.addf %535, %534 : vector<8x128xf32>
    %537 = arith.divf %535, %536 : vector<8x128xf32>
    %538 = vector.extract_strided_slice %527 {offsets = [0, 128], sizes = [8, 128], strides = [1, 1]} : vector<8x384xf32> to vector<8x128xf32>
    %539 = vector.extract_strided_slice %529 {offsets = [0, 128], sizes = [8, 128], strides = [1, 1]} : vector<8x384xf32> to vector<8x128xf32>
    %540 = arith.addf %538, %539 : vector<8x128xf32>
    %541 = arith.negf %540 : vector<8x128xf32>
    %542 = math.exp %541 : vector<8x128xf32>
    %cst_142 = arith.constant 1.000000e+00 : f32
    %543 = vector.broadcast %cst_142 : f32 to vector<8x128xf32>
    %544 = arith.addf %543, %542 : vector<8x128xf32>
    %545 = arith.divf %543, %544 : vector<8x128xf32>
    %546 = vector.extract_strided_slice %527 {offsets = [0, 256], sizes = [8, 128], strides = [1, 1]} : vector<8x384xf32> to vector<8x128xf32>
    %547 = vector.extract_strided_slice %529 {offsets = [0, 256], sizes = [8, 128], strides = [1, 1]} : vector<8x384xf32> to vector<8x128xf32>
    %548 = arith.addf %547, %312 : vector<8x128xf32>
    %549 = arith.mulf %537, %548 : vector<8x128xf32>
    %550 = arith.addf %546, %549 : vector<8x128xf32>
    %551 = math.tanh %550 : vector<8x128xf32>
    %cst_143 = arith.constant 1.000000e+00 : f32
    %552 = vector.broadcast %cst_143 : f32 to vector<8x128xf32>
    %553 = arith.subf %552, %545 : vector<8x128xf32>
    %554 = arith.mulf %553, %551 : vector<8x128xf32>
    %555 = arith.mulf %545, %521 : vector<8x128xf32>
    %556 = arith.addf %554, %555 : vector<8x128xf32>
    %557 = arith.index_cast %525 : i32 to index
    %c0_144 = arith.constant 0 : index
    %558 = vector.load %arg8[%557, %c0_144] : memref<64x128xf32, #tpu.memory_space<vmem>>, vector<8x128xf32>
    tpu.vector_store %arg8[%557, %c0_144], %556 {strides = array<i32>} : memref<64x128xf32, #tpu.memory_space<vmem>>, vector<8x128xf32>,
    %c7_i32_145 = arith.constant 7 : i32
    %c8_i32_146 = arith.constant 8 : i32
    %559 = arith.muli %c7_i32_145, %c8_i32_146 : i32
    %560 = tpu.assume_multiple %559, 8 : i32
    %561 = arith.index_cast %560 : i32 to index
    %c0_147 = arith.constant 0 : index
    %562 = vector.load %arg9[%561, %c0_147] : memref<64x384xf32, #tpu.memory_space<vmem>>, vector<8x384xf32>
    %563 = arith.truncf %556 : vector<8x128xf32> to vector<8x128xbf16>
    %cst_148 = arith.constant dense<0.000000e+00> : vector<8x384xf32>
    %564 = tpu.matmul %563, %308, %cst_148 {dimension_numbers = #tpu.dot_dimension_numbers<[1], [0], [0], [1], [0, 0, 1, 1], [], []>} : vector<8x128xbf16>, vector<128x384xbf16>, vector<8x384xf32> -> vector<8x384xf32>
    %565 = vector.extract_strided_slice %562 {offsets = [0, 0], sizes = [8, 128], strides = [1, 1]} : vector<8x384xf32> to vector<8x128xf32>
    %566 = vector.extract_strided_slice %564 {offsets = [0, 0], sizes = [8, 128], strides = [1, 1]} : vector<8x384xf32> to vector<8x128xf32>
    %567 = arith.addf %565, %566 : vector<8x128xf32>
    %568 = arith.negf %567 : vector<8x128xf32>
    %569 = math.exp %568 : vector<8x128xf32>
    %cst_149 = arith.constant 1.000000e+00 : f32
    %570 = vector.broadcast %cst_149 : f32 to vector<8x128xf32>
    %571 = arith.addf %570, %569 : vector<8x128xf32>
    %572 = arith.divf %570, %571 : vector<8x128xf32>
    %573 = vector.extract_strided_slice %562 {offsets = [0, 128], sizes = [8, 128], strides = [1, 1]} : vector<8x384xf32> to vector<8x128xf32>
    %574 = vector.extract_strided_slice %564 {offsets = [0, 128], sizes = [8, 128], strides = [1, 1]} : vector<8x384xf32> to vector<8x128xf32>
    %575 = arith.addf %573, %574 : vector<8x128xf32>
    %576 = arith.negf %575 : vector<8x128xf32>
    %577 = math.exp %576 : vector<8x128xf32>
    %cst_150 = arith.constant 1.000000e+00 : f32
    %578 = vector.broadcast %cst_150 : f32 to vector<8x128xf32>
    %579 = arith.addf %578, %577 : vector<8x128xf32>
    %580 = arith.divf %578, %579 : vector<8x128xf32>
    %581 = vector.extract_strided_slice %562 {offsets = [0, 256], sizes = [8, 128], strides = [1, 1]} : vector<8x384xf32> to vector<8x128xf32>
    %582 = vector.extract_strided_slice %564 {offsets = [0, 256], sizes = [8, 128], strides = [1, 1]} : vector<8x384xf32> to vector<8x128xf32>
    %583 = arith.addf %582, %312 : vector<8x128xf32>
    %584 = arith.mulf %572, %583 : vector<8x128xf32>
    %585 = arith.addf %581, %584 : vector<8x128xf32>
    %586 = math.tanh %585 : vector<8x128xf32>
    %cst_151 = arith.constant 1.000000e+00 : f32
    %587 = vector.broadcast %cst_151 : f32 to vector<8x128xf32>
    %588 = arith.subf %587, %580 : vector<8x128xf32>
    %589 = arith.mulf %588, %586 : vector<8x128xf32>
    %590 = arith.mulf %580, %556 : vector<8x128xf32>
    %591 = arith.addf %589, %590 : vector<8x128xf32>
    %592 = arith.index_cast %560 : i32 to index
    %c0_152 = arith.constant 0 : index
    %593 = vector.load %arg8[%592, %c0_152] : memref<64x128xf32, #tpu.memory_space<vmem>>, vector<8x128xf32>
    tpu.vector_store %arg8[%592, %c0_152], %591 {strides = array<i32>} : memref<64x128xf32, #tpu.memory_space<vmem>>, vector<8x128xf32>,
    %c8_i32_153 = arith.constant 8 : i32
    %c0_154 = arith.constant 0 : index
    %c0_155 = arith.constant 0 : index
    %594 = vector.load %arg8[%c0_154, %c0_155] : memref<64x128xf32, #tpu.memory_space<vmem>>, vector<64x128xf32>
    %595 = arith.truncf %594 : vector<64x128xf32> to vector<64x128xbf16>
    %c0_156 = arith.constant 0 : index
    %c0_157 = arith.constant 0 : index
    %596 = vector.load %arg5[%c0_156, %c0_157] : memref<128x128xbf16, #tpu.memory_space<vmem>>, vector<128x128xbf16>
    %cst_158 = arith.constant dense<0.000000e+00> : vector<64x128xf32>
    %597 = tpu.matmul %595, %596, %cst_158 {dimension_numbers = #tpu.dot_dimension_numbers<[1], [0], [0], [1], [0, 0, 1, 1], [], []>} : vector<64x128xbf16>, vector<128x128xbf16>, vector<64x128xf32> -> vector<64x128xf32>
    %c0_159 = arith.constant 0 : index
    %c0_160 = arith.constant 0 : index
    %598 = vector.load %arg6[%c0_159, %c0_160] : memref<1x128xf32, #tpu.memory_space<vmem>>, vector<1x128xf32>
    %599 = vector.broadcast %598 : vector<1x128xf32> to vector<64x128xf32>
    %600 = arith.addf %597, %599 : vector<64x128xf32>
    %c0_161 = arith.constant 0 : index
    %c0_162 = arith.constant 0 : index
    %601 = vector.load %arg7[%c0_161, %c0_162] : memref<64x128xf32, #tpu.memory_space<vmem>>, vector<64x128xf32>
    tpu.vector_store %arg7[%c0_161, %c0_162], %600 {strides = array<i32>} : memref<64x128xf32, #tpu.memory_space<vmem>>, vector<64x128xf32>,
    return
  }
}

</mosaic_0001>

<bundles_post_ra>
// kernel: tpu_custom_call.1
= control target key start
LH: loop header
LB: loop body
LE: loop exit
PB: predicated region body
PF: predicated region fallthrough
CT: control target
= control target key end

     0   :  { %12 = vsyncpa [#allocation5], 0  ;;  %s5356_s0 = inlined_call_operand.hbm [shape: f32[64,128], index: 0, kind: input, shape index: {}]   ;;  %s5357_s1 = inlined_call_operand.hbm [shape: bf16[2,128,384], index: 1, kind: input, shape index: {}]   ;;  %s5358_s2 = inlined_call_operand.hbm [shape: bf16[2,128,384], index: 2, kind: input, shape index: {}]   ;;  %s5359_s3 = inlined_call_operand.vmem [shape: f32[2,1,384], index: 3, kind: input, shape index: {}]   ;;  %s5360_s4 = inlined_call_operand.vmem [shape: f32[2,1,128], index: 4, kind: input, shape index: {}]   ;;  %s5361_s5 = inlined_call_operand.hbm [shape: bf16[128,128], index: 5, kind: input, shape index: {}]   ;;  %s5362_s6 = inlined_call_operand.vmem [shape: f32[1,128], index: 6, kind: input, shape index: {}]   ;;  %s5363_s7 = inlined_call_operand.hbm [shape: f32[64,128], index: 7, kind: output, shape index: {}]  }
   0x1   :  { %13 = vsyncpa [#allocation8], 0 }
   0x2   :  { %14 = vsyncpa [#allocation11], 0 }
   0x3   :  { %15 = vsyncpa [#allocation6], 0  ;;  %s4243_s24 = smov [#allocation7]   ;;  %s4125_s28 = scalar_lea.hbm %s5357_s1, 6144 }
   0x4   :  { %s33_s25 = sshll.u32 %s4243_s24, 4  ;;  %p4126_p0 = scmp.ne.s32.totalorder %s5357_s1, %s4125_s28  ;;  %s34_s25 = int_to_ptr.vmem [resolvable:$true] %s33_s25 }
   0x5   :  { %p4129_p1 = scmp.lt.u32.totalorder %s4125_s28, %s5357_s1 }
   0x7   :  { %p4131_p2 = pnand %p4129_p1, %p4126_p0 }
   0x9   :  { %4134 = shalt.err (!%p4131_p2)
}
   0xa   :  { %s4135_s10 = scalar_lea.vmem %s34_s25, 6144  ;;  %p4140_p4 = scmp.lt.s32.totalorder %s34_s25, %s34_s25 }
   0xb   :  { %p4136_p3 = scmp.ne.s32.totalorder %s34_s25, %s4135_s10  ;;  %p4141_p5 = scmp.lt.s32.totalorder %s4135_s10, %s4135_s10 }
   0xd   :  { %p4142_p6 = por %p4141_p5, %p4140_p4 }
   0xf   :  { %p4143_p7 = pnand %p4142_p6, %p4136_p3 }
  0x11   :  { %4146 = shalt.err (!%p4143_p7)
}
  0x12   :  { %s4244_s11 = smov 192   ;;  %s4245_s12 = smov 12  }
  0x13   :  { %39 = dma.hbm_to_vmem [thread:$0]  %s5357_s1, 6144, %s34_s25, [#allocation8], %s4244_s11, %s4244_s11, %s4245_s12  }
  0x14   :  { %s4246_s15 = smov [#allocation4]   ;;  %s4147_s19 = scalar_lea.hbm %s5356_s0, 1024 }
  0x15   :  { %s21_s16 = sshll.u32 %s4246_s15, 4  ;;  %p4148_p8 = scmp.ne.s32.totalorder %s5356_s0, %s4147_s19  ;;  %s22_s16 = int_to_ptr.vmem [resolvable:$true] %s21_s16 }
  0x16   :  { %p4151_p9 = scmp.lt.u32.totalorder %s4147_s19, %s5356_s0 }
  0x18   :  { %p4153_p10 = pnand %p4151_p9, %p4148_p8 }
  0x1a   :  { %4156 = shalt.err (!%p4153_p10)
}
  0x1b   :  { %s4157_s24 = scalar_lea.vmem %s22_s16, 1024  ;;  %p4162_p12 = scmp.lt.s32.totalorder %s22_s16, %s22_s16 }
  0x1c   :  { %p4158_p11 = scmp.ne.s32.totalorder %s22_s16, %s4157_s24  ;;  %p4163_p13 = scmp.lt.s32.totalorder %s4157_s24, %s4157_s24 }
  0x1e   :  { %p4164_p0 = por %p4163_p13, %p4162_p12 }
  0x20   :  { %p4165_p1 = pnand %p4164_p0, %p4158_p11 }
  0x22   :  { %4168 = shalt.err (!%p4165_p1)
}
  0x23   :  { %s4247_s1 = smov 128   ;;  %s4248_s25 = smov 8  }
  0x24   :  { %27 = dma.hbm_to_vmem [thread:$0]  %s5356_s0, 1024, %s22_s16, [#allocation5], %s4247_s1, %s4247_s1, %s4248_s25  }
  0x25   :  { %s4249_s28 = smov [#allocation9]   ;;  %s4250_s30 = smov [#allocation10]  }
  0x26   :  { %s45_s29 = sshll.u32 %s4249_s28, 4  ;;  %s61_s8 = sshll.u32 %s4250_s30, 4  ;;  %s46_s29 = int_to_ptr.vmem [resolvable:$true] %s45_s29  ;;  %s4327_s8 = int_to_ptr.vmem [resolvable:$true] %s61_s8 }
  0x27   :  { %s4169_s13 = scalar_lea.hbm %s5358_s2, 6144 }
  0x28   :  { %p4170_p2 = scmp.ne.s32.totalorder %s5358_s2, %s4169_s13  ;;  %p4173_p3 = scmp.lt.u32.totalorder %s4169_s13, %s5358_s2 }
  0x2a   :  { %p4175_p4 = pnand %p4173_p3, %p4170_p2 }
  0x2c   :  { %4178 = shalt.err (!%p4175_p4)
}
  0x2d   :  { %s4179_s0 = scalar_lea.vmem %s46_s29, 6144  ;;  %p4184_p6 = scmp.lt.s32.totalorder %s46_s29, %s46_s29 }
  0x2e   :  { %p4180_p5 = scmp.ne.s32.totalorder %s46_s29, %s4179_s0  ;;  %p4185_p7 = scmp.lt.s32.totalorder %s4179_s0, %s4179_s0 }
  0x30   :  { %p4186_p8 = por %p4185_p7, %p4184_p6 }
  0x32   :  { %p4187_p9 = pnand %p4186_p8, %p4180_p5 }
  0x34   :  { %4190 = shalt.err (!%p4187_p9)
}
  0x35   :  { %51 = dma.hbm_to_vmem [thread:$0]  %s5358_s2, 6144, %s46_s29, [#allocation8], %s4244_s11, %s4244_s11, %s4245_s12  }
  0x36   :  { %s4191_s22 = scalar_lea.hbm %s5361_s5, 1024 }
  0x37   :  { %p4192_p10 = scmp.ne.s32.totalorder %s5361_s5, %s4191_s22  ;;  %p4195_p11 = scmp.lt.u32.totalorder %s4191_s22, %s5361_s5 }
  0x39   :  { %p4197_p12 = pnand %p4195_p11, %p4192_p10 }
  0x3b   :  { %4200 = shalt.err (!%p4197_p12)
}
  0x3c   :  { %s4201_s28 = scalar_lea.vmem %s4327_s8, 1024  ;;  %p4206_p0 = scmp.lt.s32.totalorder %s4327_s8, %s4327_s8 }
  0x3d   :  { %p4202_p13 = scmp.ne.s32.totalorder %s4327_s8, %s4201_s28  ;;  %p4207_p1 = scmp.lt.s32.totalorder %s4201_s28, %s4201_s28 }
  0x3f   :  { %p4208_p2 = por %p4207_p1, %p4206_p0 }
  0x41   :  { %p4209_p3 = pnand %p4208_p2, %p4202_p13 }
  0x43   :  { %4212 = shalt.err (!%p4209_p3)
}
  0x44   :  { %s4251_s2 = smov 64   ;;  %s4252_s11 = smov 4  }
  0x45   :  { %67 = dma.hbm_to_vmem [thread:$0]  %s5361_s5, 1024, %s4327_s8, [#allocation11], %s4251_s2, %s4251_s2, %s4252_s11  }
  0x46   :  { %4235 = dma.done.wait [#allocation5], 1024  }
  0x47   :  { %4236 = vsyncadd [#allocation5], 4294966272 }
  0x48   :  { %4237 = dma.done.wait [#allocation8], 12288  }
  0x49   :  { %4238 = vsyncadd [#allocation8], 4294955008 }
  0x4a   :  { %4239 = dma.done.wait [#allocation11], 1024  }
  0x4b   :  { %4240 = vsyncadd [#allocation11], 4294966272  ;;  %v5367_v0 = vmov 0   ;;  %v3789_v1 = vld [vmem:[#allocation7 + $0x4] ss:$12 sps:$4 sm:$0xff]   ;;  %v84_v33 = vld [vmem:[#allocation4 + $0x8] sm:$0xff]  ;;  %v129_v62 = vlaneseq }
  0x4c   :  { %304 = vmatprep.mubr.bf16.mxu1 %v5367_v0  ;;  %639 = vmatprep.mubr.bf16.mxu0 %v5367_v0  ;;  %v3791_v2 = vld [vmem:[#allocation7] ss:$12 sps:$4 sm:$0xff]   ;;  %v4363_v3 = vld [vmem:[#allocation9 + $0x4] ss:$12 sps:$4 sm:$0xff]   ;;  %v3795_v5 = vld [vmem:[#allocation7 + $0x1c] ss:$12 sps:$4 sm:$0xff]  }
  0x4d   :  { %272 = vmatprep.subr.bf16.mxu1 %v3789_v1  ;;  %v4365_v4 = vld [vmem:[#allocation9] ss:$12 sps:$4 sm:$0xff]   ;;  %v3797_v6 = vld [vmem:[#allocation7 + $0x18] ss:$12 sps:$4 sm:$0xff]   ;;  %607 = vmatprep.subr.bf16.mxu0 %v4363_v3  ;;  %v4368_v7 = vld [vmem:[#allocation9 + $0x1c] ss:$12 sps:$4 sm:$0xff]  }
  0x4e   :  { %273 = vmatpush1.bf16.msra.mxu1 %v3791_v2  ;;  %608 = vmatpush1.bf16.msra.mxu0 %v4365_v4  ;;  %v4371_v8 = vld [vmem:[#allocation9 + $0x18] ss:$12 sps:$4 sm:$0xff]   ;;  %v3801_v9 = vld [vmem:[#allocation7 + $0x34] ss:$12 sps:$4 sm:$0xff]   ;;  %v3803_v10 = vld [vmem:[#allocation7 + $0x30] ss:$12 sps:$4 sm:$0xff]  }
  0x4f   :  { %274 = vmatprep.subr.bf16.mxu1 %v3795_v5  ;;  %609 = vmatprep.subr.bf16.mxu0 %v4368_v7  ;;  %v4374_v11 = vld [vmem:[#allocation9 + $0x34] ss:$12 sps:$4 sm:$0xff]   ;;  %v3807_v12 = vld [vmem:[#allocation7 + $0x4c] ss:$12 sps:$4 sm:$0xff]   ;;  %v4377_v13 = vld [vmem:[#allocation9 + $0x30] ss:$12 sps:$4 sm:$0xff]  }
  0x50   :  { %v4380_v14 = vld [vmem:[#allocation9 + $0x4c] ss:$12 sps:$4 sm:$0xff]   ;;  %v3809_v15 = vld [vmem:[#allocation7 + $0x48] ss:$12 sps:$4 sm:$0xff]   ;;  %v3813_v16 = vld [vmem:[#allocation7 + $0x64] ss:$12 sps:$4 sm:$0xff]  }
  0x51   :  { %v4383_v17 = vld [vmem:[#allocation9 + $0x48] ss:$12 sps:$4 sm:$0xff]   ;;  %v4386_v18 = vld [vmem:[#allocation9 + $0x64] ss:$12 sps:$4 sm:$0xff]   ;;  %v3815_v19 = vld [vmem:[#allocation7 + $0x60] ss:$12 sps:$4 sm:$0xff]  }
  0x52   :  { %275 = vmatpush1.bf16.msra.mxu1 %v3797_v6  ;;  %610 = vmatpush1.bf16.msra.mxu0 %v4371_v8  ;;  %v3819_v20 = vld [vmem:[#allocation7 + $0x7c] ss:$12 sps:$4 sm:$0xff]   ;;  %v4389_v21 = vld [vmem:[#allocation9 + $0x60] ss:$12 sps:$4 sm:$0xff]   ;;  %v3821_v23 = vld [vmem:[#allocation7 + $0x78] ss:$12 sps:$4 sm:$0xff]  }
  0x53   :  { %276 = vmatprep.subr.bf16.mxu1 %v3801_v9  ;;  %611 = vmatprep.subr.bf16.mxu0 %v4374_v11  ;;  %v4392_v22 = vld [vmem:[#allocation9 + $0x7c] ss:$12 sps:$4 sm:$0xff]   ;;  %v3825_v24 = vld [vmem:[#allocation7 + $0x94] ss:$12 sps:$4 sm:$0xff]   ;;  %v4395_v25 = vld [vmem:[#allocation9 + $0x78] ss:$12 sps:$4 sm:$0xff]  }
  0x54   :  { %v4398_v26 = vld [vmem:[#allocation9 + $0x94] ss:$12 sps:$4 sm:$0xff]   ;;  %v3827_v27 = vld [vmem:[#allocation7 + $0x90] ss:$12 sps:$4 sm:$0xff]   ;;  %v3831_v29 = vld [vmem:[#allocation7 + $0xac] ss:$12 sps:$4 sm:$0xff]  }
  0x55   :  { %v4400_v28 = vld [vmem:[#allocation9 + $0x90] ss:$12 sps:$4 sm:$0xff]   ;;  %v3833_v30 = vld [vmem:[#allocation7 + $0xa8] ss:$12 sps:$4 sm:$0xff]   ;;  %v4404_v31 = vld [vmem:[#allocation9 + $0xac] ss:$12 sps:$4 sm:$0xff]  }
  0x56   :  { %277 = vmatpush1.bf16.msra.mxu1 %v3803_v10  ;;  %612 = vmatpush1.bf16.msra.mxu0 %v4377_v13  ;;  %v83_v32 = vld [vmem:[#allocation4] sm:$0xff]  ;;  %v3837_v34 = vld [vmem:[#allocation7 + $0x8] ss:$12 sps:$4 sm:$0xff]   ;;  %v86_v39 = vld [vmem:[#allocation4 + $0x18] sm:$0xff]  ;;  %v5369_v54 = vmov 0.0   ;;  %vm4255_vm0 = vmmov 0  }
  0x57   :  { %278 = vmatprep.subr.bf16.mxu1 %v3807_v12  ;;  %613 = vmatprep.subr.bf16.mxu0 %v4380_v14  ;;  %v4407_v35 = vld [vmem:[#allocation9 + $0xa8] ss:$12 sps:$4 sm:$0xff]   ;;  %v91_v36 = vpack.c.bf16 %v84_v33, %v83_v32  ;;  %v3838_v37 = vld [vmem:[#allocation7 + $0x20] ss:$12 sps:$4 sm:$0xff]   ;;  %v3839_v40 = vld [vmem:[#allocation7 + $0x38] ss:$12 sps:$4 sm:$0xff]  }
  0x58   :  { %v85_v38 = vld [vmem:[#allocation4 + $0x10] sm:$0xff]  ;;  %v87_v43 = vld [vmem:[#allocation4 + $0x20] sm:$0xff]  ;;  %v88_v44 = vld [vmem:[#allocation4 + $0x28] sm:$0xff]  ;;  %v4487_v63 = vshrl.u32 %v129_v62, 7 }
  0x59   :  { %v92_v41 = vpack.c.bf16 %v86_v39, %v85_v38  ;;  %v3840_v42 = vld [vmem:[#allocation7 + $0x50] ss:$12 sps:$4 sm:$0xff]   ;;  %v3841_v45 = vld [vmem:[#allocation7 + $0x68] ss:$12 sps:$4 sm:$0xff]   ;;  %v93_v46 = vpack.c.bf16 %v88_v44, %v87_v43  ;;  %v3842_v47 = vld [vmem:[#allocation7 + $0x80] ss:$12 sps:$4 sm:$0xff]  }
  0x5a   :  { %279 = vmatpush1.bf16.msra.mxu1 %v3809_v15  ;;  %614 = vmatpush1.bf16.msra.mxu0 %v4383_v17  ;;  %v89_v48 = vld [vmem:[#allocation4 + $0x30] sm:$0xff]  ;;  %v90_v49 = vld [vmem:[#allocation4 + $0x38] sm:$0xff]  ;;  %v4437_v55 = vld [vmem:[#allocation9 + $0x20] ss:$12 sps:$4 sm:$0xff]   ;;  %5373 = vst [vmem:[#allocation17_spill] sm:$0xff] %v4487_v63  ;;  %v5366_v1 = vsub.s32 0, %v4487_v63 }
  0x5b   :  { %280 = vmatprep.subr.bf16.mxu1 %v3813_v16  ;;  %615 = vmatprep.subr.bf16.mxu0 %v4386_v18  ;;  %v3843_v50 = vld [vmem:[#allocation7 + $0x98] ss:$12 sps:$4 sm:$0xff]   ;;  %v94_v51 = vpack.c.bf16 %v90_v49, %v89_v48  ;;  %v3844_v52 = vld [vmem:[#allocation7 + $0xb0] ss:$12 sps:$4 sm:$0xff]   ;;  %v4429_v53 = vld [vmem:[#allocation9 + $0x8] ss:$12 sps:$4 sm:$0xff]  }
  0x5c   :  { %v4441_v56 = vld [vmem:[#allocation9 + $0x38] ss:$12 sps:$4 sm:$0xff]   ;;  %v4445_v57 = vld [vmem:[#allocation9 + $0x50] ss:$12 sps:$4 sm:$0xff]   ;;  %v4451_v58 = vld [vmem:[#allocation9 + $0x68] ss:$12 sps:$4 sm:$0xff]  }
  0x5d   :  { %v4455_v59 = vld [vmem:[#allocation9 + $0x80] ss:$12 sps:$4 sm:$0xff]   ;;  %v4459_v60 = vld [vmem:[#allocation9 + $0x98] ss:$12 sps:$4 sm:$0xff]   ;;  %v4463_v61 = vld [vmem:[#allocation9 + $0xb0] ss:$12 sps:$4 sm:$0xff]  }
  0x5e   :  { %281 = vmatpush1.bf16.msra.mxu1 %v3815_v19  ;;  %616 = vmatpush1.bf16.msra.mxu0 %v4389_v21  ;;  %v127_v2 = vld [vmem:[%s5359_s3] sm:$0x7]  ;;  %v5365_v5 = vsub.s32 1, %v4487_v63 }
  0x5f   :  { %282 = vmatprep.subr.bf16.mxu1 %v3819_v20  ;;  %617 = vmatprep.subr.bf16.mxu0 %v4392_v22  ;;  %v132_v6 = vrot.slane %v127_v2, %v5366_v1 }
  0x60   :  { %v136_v9 = vrot.slane %v127_v2, %v5365_v5 }
  0x62   :  { %283 = vmatpush1.bf16.msra.mxu1 %v3821_v23  ;;  %618 = vmatpush1.bf16.msra.mxu0 %v4395_v25 }
  0x63   :  { %284 = vmatprep.subr.bf16.mxu1 %v3825_v24  ;;  %619 = vmatprep.subr.bf16.mxu0 %v4398_v26 }
  0x66   :  { %285 = vmatpush1.bf16.msra.mxu1 %v3827_v27  ;;  %620 = vmatpush1.bf16.msra.mxu0 %v4400_v28 }
  0x67   :  { %286 = vmatprep.subr.bf16.mxu1 %v3831_v29  ;;  %621 = vmatprep.subr.bf16.mxu0 %v4404_v31 }
  0x6a   :  { %287 = vmatpush1.bf16.msra.mxu1 %v3833_v30  ;;  %622 = vmatpush1.bf16.msra.mxu0 %v4407_v35 }
  0x6b   :  { %3383 = vmatprep.subr.bf16.mxu1 %v3837_v34  ;;  %718 = vmatprep.subr.bf16.mxu0 %v4363_v3 }
  0x6d   :  { %305 = vmatmul.mubr.bf16.vlgmr.msra.gmra.mrb[0].mxu1 %v91_v36  ;;  %640 = vmatmul.mubr.bf16.vlgmr.msra.gmra.mrb[0].mxu0 %v5367_v0 }
  0x6e   :  { %3384 = vmatpush3.bf16.msra.mxu1 %v3837_v34  ;;  %314 = vmatprep.mubr.bf16.mxu1 %v5367_v0 }
  0x6f   :  { %3385 = vmatprep.subr.bf16.mxu1 %v3838_v37  ;;  %719 = vmatpush1.bf16.msra.mxu0 %v4365_v4 }
  0x70   :  { %750 = vmatprep.mubr.bf16.mxu0 %v5367_v0  ;;  %720 = vmatprep.subr.bf16.mxu0 %v4368_v7 }
  0x72   :  { %3386 = vmatpush3.bf16.msra.mxu1 %v3838_v37 }
  0x73   :  { %3387 = vmatprep.subr.bf16.mxu1 %v3839_v40  ;;  %721 = vmatpush1.bf16.msra.mxu0 %v4371_v8 }
  0x74   :  { %722 = vmatprep.subr.bf16.mxu0 %v4374_v11 }
  0x75   :  { %315 = vmatmul.mubr.bf16.gmra.mrb[4].mxu1 %v92_v41 }
  0x76   :  { %3388 = vmatpush3.bf16.msra.mxu1 %v3839_v40  ;;  %324 = vmatprep.mubr.bf16.mxu1 %v5367_v0 }
  0x77   :  { %3389 = vmatprep.subr.bf16.mxu1 %v3840_v42  ;;  %723 = vmatpush1.bf16.msra.mxu0 %v4377_v13 }
  0x78   :  { %724 = vmatprep.subr.bf16.mxu0 %v4380_v14 }
  0x7a   :  { %3390 = vmatpush3.bf16.msra.mxu1 %v3840_v42 }
  0x7b   :  { %3391 = vmatprep.subr.bf16.mxu1 %v3841_v45  ;;  %725 = vmatpush1.bf16.msra.mxu0 %v4383_v17 }
  0x7c   :  { %726 = vmatprep.subr.bf16.mxu0 %v4386_v18 }
  0x7d   :  { %325 = vmatmul.mubr.bf16.gmra.mrb[8].mxu1 %v93_v46 }
  0x7e   :  { %3392 = vmatpush3.bf16.msra.mxu1 %v3841_v45  ;;  %334 = vmatprep.mubr.bf16.mxu1 %v5367_v0 }
  0x7f   :  { %3393 = vmatprep.subr.bf16.mxu1 %v3842_v47  ;;  %727 = vmatpush1.bf16.msra.mxu0 %v4389_v21 }
  0x80   :  { %728 = vmatprep.subr.bf16.mxu0 %v4392_v22 }
  0x82   :  { %3394 = vmatpush3.bf16.msra.mxu1 %v3842_v47 }
  0x83   :  { %3395 = vmatprep.subr.bf16.mxu1 %v3843_v50  ;;  %729 = vmatpush1.bf16.msra.mxu0 %v4395_v25 }
  0x84   :  { %730 = vmatprep.subr.bf16.mxu0 %v4398_v26 }
  0x85   :  { %335 = vmatmul.mubr.bf16.gmra.mrb[12].mxu1 %v94_v51 }
  0x86   :  { %3396 = vmatpush3.bf16.msra.mxu1 %v3843_v50  ;;  %3399 = vmatprep.mubr.bf16.mxu1 %v91_v36 }
  0x87   :  { %3397 = vmatprep.subr.bf16.mxu1 %v3844_v52  ;;  %731 = vmatpush1.bf16.msra.mxu0 %v4400_v28 }
  0x88   :  { %732 = vmatprep.subr.bf16.mxu0 %v4404_v31 }
  0x8a   :  { %3398 = vmatpush3.bf16.msra.mxu1 %v3844_v52 }
  0x8b   :  { %3407 = vmatprep.subr.bf16.mxu1 %v5369_v54  ;;  %733 = vmatpush1.bf16.msra.mxu0 %v4407_v35 }
  0x8c   :  { %830 = vmatprep.subr.bf16.mxu0 %v4363_v3 }
  0x8d   :  { %3400 = vmatmul.mubr.bf16.vlgmr.msra.gmra.mrb[16].mxu1 %v92_v41 }
  0x8e   :  { %3408 = vmatpush3.bf16.msra.mxu1 %v4429_v53  ;;  %3403 = vmatprep.mubr.bf16.mxu1 %v93_v46 }
  0x8f   :  { %3409 = vmatprep.subr.bf16.mxu1 %v5369_v54 }
  0x92   :  { %3410 = vmatpush3.bf16.msra.mxu1 %v4437_v55 }
  0x93   :  { %3411 = vmatprep.subr.bf16.mxu1 %v5369_v54 }
  0x95   :  { %3404 = vmatmul.mubr.bf16.gmra.mrb[20].mxu1 %v94_v51 }
  0x96   :  { %3412 = vmatpush3.bf16.msra.mxu1 %v4441_v56  ;;  %3423 = vmatprep.mubr.msk.bf16.mxu1 %vm4255_vm0, %v5369_v54 }
  0x97   :  { %3413 = vmatprep.subr.bf16.mxu1 %v5369_v54 }
  0x9a   :  { %3414 = vmatpush3.bf16.msra.mxu1 %v4445_v57 }
  0x9b   :  { %3415 = vmatprep.subr.bf16.mxu1 %v5369_v54 }
  0x9e   :  { %3416 = vmatpush3.bf16.msra.mxu1 %v4451_v58 }
  0x9f   :  { %3417 = vmatprep.subr.bf16.mxu1 %v5369_v54 }
  0xa2   :  { %3418 = vmatpush3.bf16.msra.mxu1 %v4455_v59 }
  0xa3   :  { %3419 = vmatprep.subr.bf16.mxu1 %v5369_v54 }
  0xa6   :  { %3420 = vmatpush3.bf16.msra.mxu1 %v4459_v60 }
  0xa7   :  { %3421 = vmatprep.subr.bf16.mxu1 %v5369_v54 }
  0xaa   :  { %3422 = vmatpush3.bf16.msra.mxu1 %v4463_v61 }
  0xab   :  { %3427 = vmatprep.subr.bf16.mxu1 %v5369_v54 }
  0xad   :  { %3424 = vmatmul.mubr.bf16.vlgmr.msra.gmra.mrb[24].mxu1 %v5367_v0 }
  0xae   :  { %3428 = vmatpush3.bf16.msra.mxu1 %v4429_v53  ;;  %3443 = vmatprep.mubr.msk.bf16.mxu1 %vm4255_vm0, %v5369_v54 }
  0xaf   :  { %3429 = vmatprep.subr.bf16.mxu1 %v5369_v54 }
  0xb2   :  { %3430 = vmatpush3.bf16.msra.mxu1 %v4437_v55 }
  0xb3   :  { %3431 = vmatprep.subr.bf16.mxu1 %v5369_v54 }
  0xb6   :  { %3432 = vmatpush3.bf16.msra.mxu1 %v4441_v56 }
  0xb7   :  { %3433 = vmatprep.subr.bf16.mxu1 %v5369_v54 }
  0xba   :  { %3434 = vmatpush3.bf16.msra.mxu1 %v4445_v57 }
  0xbb   :  { %3435 = vmatprep.subr.bf16.mxu1 %v5369_v54 }
  0xbe   :  { %3436 = vmatpush3.bf16.msra.mxu1 %v4451_v58 }
  0xbf   :  { %3437 = vmatprep.subr.bf16.mxu1 %v5369_v54 }
  0xc2   :  { %3438 = vmatpush3.bf16.msra.mxu1 %v4455_v59 }
  0xc3   :  { %3439 = vmatprep.subr.bf16.mxu1 %v5369_v54 }
  0xc6   :  { %3440 = vmatpush3.bf16.msra.mxu1 %v4459_v60 }
  0xc7   :  { %3441 = vmatprep.subr.bf16.mxu1 %v5369_v54 }
  0xca   :  { %3442 = vmatpush3.bf16.msra.mxu1 %v4463_v61 }
  0xcb   :  { %3447 = vmatprep.subr.bf16.mxu1 %v5369_v54 }
 0x140   :  { %v306_v10 = vpop.f32.mrb[0].mxu1  ;;  %v641_v20 = vpop.f32.mrb[0].mxu0 }
 0x141   :  { %v307_v12 = vadd.f32 %v306_v10, %v132_v6  ;;  %v308_v15 = vpop.f32.mrb[1].mxu1  ;;  %v643_v29 = vpop.f32.mrb[1].mxu0 }
 0x142   :  { %v309_v16 = vadd.f32 %v308_v15, %v136_v9  ;;  %v310_v19 = vpop.f32.mrb[2].mxu1  ;;  %v645_v33 = vpop.f32.mrb[2].mxu0 }
 0x143   :  { %v4498_v23 = vadd.f32 %v310_v19, %v132_v6  ;;  %v688_v24 = vadd.f32 %v641_v20, %v307_v12  ;;  %v312_v27 = vpop.f32.mrb[3].mxu1  ;;  %v646_v34 = vpop.f32.mrb[3].mxu0  ;;  %v5364_v12 = vsub.s32 2, %v4487_v63 }
 0x144   :  { %v4500_v30 = vadd.f32 %v312_v27, %v136_v9  ;;  %v695_v32 = vadd.f32 %v643_v29, %v309_v16 }
 0x145   :  { %v140_v29 = vrot.slane %v127_v2, %v5364_v12 }
 0x148   :  { %v316_v36 = vpop.f32.mrb[4].mxu1 }
 0x149   :  { %v4502_v37 = vadd.f32 %v316_v36, %v132_v6  ;;  %v318_v38 = vpop.f32.mrb[5].mxu1 }
 0x14a   :  { %v4504_v39 = vadd.f32 %v318_v38, %v136_v9  ;;  %v320_v40 = vpop.f32.mrb[6].mxu1 }
 0x14b   :  { %v4506_v41 = vadd.f32 %v320_v40, %v132_v6  ;;  %v322_v42 = vpop.f32.mrb[7].mxu1  ;;  %v3111_v40 = vmul.f32 -1.442695, %v688_v24 }
 0x14c   :  { %v4508_v43 = vadd.f32 %v322_v42, %v136_v9 }
 0x14d   :  { %3925 = vpow2.f32 %v3111_v40  ;;  %v4546_v40 = vld [vmem:[%s5360_s4] ss:$0 sm:$0xff] }
 0x150   :  { %v326_v44 = vpop.f32.mrb[8].mxu1 }
 0x151   :  { %v4510_v45 = vadd.f32 %v326_v44, %v132_v6  ;;  %v328_v46 = vpop.f32.mrb[9].mxu1 }
 0x152   :  { %v4512_v47 = vadd.f32 %v328_v46, %v136_v9  ;;  %v330_v48 = vpop.f32.mrb[10].mxu1 }
 0x153   :  { %v4514_v49 = vadd.f32 %v330_v48, %v132_v6  ;;  %v332_v50 = vpop.f32.mrb[11].mxu1 }
 0x154   :  { %v4516_v51 = vadd.f32 %v332_v50, %v136_v9 }
 0x157   :  { %v3926_v24 = vpop.eup %3925 }
 0x158   :  { %v336_v52 = vpop.f32.mrb[12].mxu1 }
 0x159   :  { %v4518_v62 = vadd.f32 %v336_v52, %v132_v6  ;;  %v338_v10 = vpop.f32.mrb[13].mxu1 }
 0x15a   :  { %v4521_v15 = vadd.f32 %v338_v10, %v136_v9  ;;  %v340_v16 = vpop.f32.mrb[14].mxu1 }
 0x15b   :  { %v4523_v19 = vadd.f32 %v340_v16, %v132_v6  ;;  %v342_v20 = vpop.f32.mrb[15].mxu1 }
 0x15c   :  { %v4525_v27 = vadd.f32 %v342_v20, %v136_v9  ;;  %v3112_v20 = vmul.f32 -1.442695, %v695_v32 }
 0x15e   :  { %5374 = vst [vmem:[#allocation18_spill] sm:$0xff] %v4525_v27  ;;  %3927 = vpow2.f32 %v3112_v20 }
 0x160   :  { %v3401_v33 = vpop.f32.mrb[16].mxu1 }
 0x161   :  { %v4529_v34 = vadd.f32 %v3401_v33, %v140_v29  ;;  %v379_v36 = vpop.f32.mrb[17].mxu1  ;;  %v692_v33 = vadd.f32 1.0, %v3926_v24 }
 0x162   :  { %v3402_v38 = vpop.f32.mrb[18].mxu1 }
 0x163   :  { %v4531_v42 = vadd.f32 %v3402_v38, %v140_v29  ;;  %v382_v44 = vpop.f32.mrb[19].mxu1  ;;  %3929 = vrcp.f32 %v692_v33 }
 0x164   :  { %v4533_v46 = vadd.f32 %v382_v44, %v140_v29 }
 0x168   :  { %v3405_v6 = vpop.f32.mrb[20].mxu1  ;;  %v3928_v38 = vpop.eup %3927 }
 0x169   :  { %v4535_v48 = vadd.f32 %v3405_v6, %v140_v29  ;;  %v395_v9 = vpop.f32.mrb[21].mxu1  ;;  %v699_v44 = vadd.f32 1.0, %v3928_v38 }
 0x16a   :  { %v4537_v50 = vadd.f32 %v395_v9, %v140_v29  ;;  %v3406_v52 = vpop.f32.mrb[22].mxu1 }
 0x16b   :  { %v4539_v2 = vadd.f32 %v3406_v52, %v140_v29  ;;  %v398_v10 = vpop.f32.mrb[23].mxu1  ;;  %3931 = vrcp.f32 %v699_v44 }
 0x16c   :  { %v4541_v16 = vadd.f32 %v398_v10, %v140_v29  ;;  %v380_v10 = vadd.f32 %v379_v36, %v140_v29 }
 0x16d   :  { %5375 = vst [vmem:[#allocation19_spill] sm:$0xff] %v4539_v2  ;;  %v3930_v12 = vpop.eup %3929 }
 0x175   :  { %v3932_v24 = vpop.eup %3931 }
 0x176   :  { %v706_v33 = vsub.f32 1.0, %v3932_v24  ;;  %v708_v63 = vmul.f32 0.0, %v3932_v24 }
 0x180   :  { %v682_v6 = vpop.f32.mrb[24].mxu1 }
 0x181   :  { %v702_v9 = vadd.f32 %v4546_v40, %v682_v6  ;;  %v3425_v52 = vpop.f32.mrb[25].mxu1 }
 0x182   :  { %v685_v5 = vpop.f32.mrb[26].mxu1 }
 0x183   :  { %v703_v32 = vmul.f32 %v3930_v12, %v702_v9  ;;  %v3426_v1 = vpop.f32.mrb[27].mxu1  ;;  %v5377_v5 = vmov 0  }
 0x184   :  { %v5376_v1 = vmov 0.0  }
 0x185   :  { %v704_v20 = vadd.f32 %v703_v32, %v380_v10 }
 0x187   :  { %3933 = vtanh.f32 %v704_v20 }
 0x191   :  { %v3934_v0 = vpop.eup %3933 }
 0x192   :  { %v707_v54 = vmul.f32 %v3934_v0, %v706_v33 }
 0x194   :  { %v4549_v2 = vadd.f32 %v708_v63, %v707_v54 }
 0x196   :  { %v717_v38 = vpack.c.bf16 %v4549_v2, %v4549_v2 }
 0x198   :  { %751 = vmatmul.mubr.bf16.vlgmr.msra.gmra.mrb[4].mxu0 %v717_v38  ;;  %3444 = vmatmul.mubr.bf16.vlgmr.msra.gmra.mrb[28].mxu1 %v717_v38 }
 0x199   :  { %831 = vmatpush1.bf16.msra.mxu0 %v4365_v4  ;;  %3448 = vmatpush3.bf16.msra.mxu1 %v4429_v53 }
 0x19a   :  { %832 = vmatprep.subr.bf16.mxu0 %v4368_v7  ;;  %3449 = vmatprep.subr.bf16.mxu1 %v5376_v1 }
 0x19b   :  { %862 = vmatprep.mubr.bf16.mxu0 %v5377_v5  ;;  %3463 = vmatprep.mubr.msk.bf16.mxu1 %vm4255_vm0, %v5376_v1 }
 0x19d   :  { %833 = vmatpush1.bf16.msra.mxu0 %v4371_v8  ;;  %3450 = vmatpush3.bf16.msra.mxu1 %v4437_v55 }
 0x19e   :  { %834 = vmatprep.subr.bf16.mxu0 %v4374_v11  ;;  %3451 = vmatprep.subr.bf16.mxu1 %v5376_v1 }
 0x1a1   :  { %835 = vmatpush1.bf16.msra.mxu0 %v4377_v13  ;;  %3452 = vmatpush3.bf16.msra.mxu1 %v4441_v56 }
 0x1a2   :  { %836 = vmatprep.subr.bf16.mxu0 %v4380_v14  ;;  %3453 = vmatprep.subr.bf16.mxu1 %v5376_v1 }
 0x1a5   :  { %837 = vmatpush1.bf16.msra.mxu0 %v4383_v17  ;;  %3454 = vmatpush3.bf16.msra.mxu1 %v4445_v57 }
 0x1a6   :  { %838 = vmatprep.subr.bf16.mxu0 %v4386_v18  ;;  %3455 = vmatprep.subr.bf16.mxu1 %v5376_v1 }
 0x1a9   :  { %839 = vmatpush1.bf16.msra.mxu0 %v4389_v21  ;;  %3456 = vmatpush3.bf16.msra.mxu1 %v4451_v58 }
 0x1aa   :  { %840 = vmatprep.subr.bf16.mxu0 %v4392_v22  ;;  %3457 = vmatprep.subr.bf16.mxu1 %v5376_v1 }
 0x1ad   :  { %841 = vmatpush1.bf16.msra.mxu0 %v4395_v25  ;;  %3458 = vmatpush3.bf16.msra.mxu1 %v4455_v59 }
 0x1ae   :  { %842 = vmatprep.subr.bf16.mxu0 %v4398_v26  ;;  %3459 = vmatprep.subr.bf16.mxu1 %v5376_v1 }
 0x1b1   :  { %843 = vmatpush1.bf16.msra.mxu0 %v4400_v28  ;;  %3460 = vmatpush3.bf16.msra.mxu1 %v4459_v60 }
 0x1b2   :  { %844 = vmatprep.subr.bf16.mxu0 %v4404_v31  ;;  %3461 = vmatprep.subr.bf16.mxu1 %v5376_v1 }
 0x1b5   :  { %845 = vmatpush1.bf16.msra.mxu0 %v4407_v35  ;;  %3462 = vmatpush3.bf16.msra.mxu1 %v4463_v61 }
 0x1b6   :  { %942 = vmatprep.subr.bf16.mxu0 %v4363_v3  ;;  %3467 = vmatprep.subr.bf16.mxu1 %v5376_v1 }
 0x26b   :  { %v752_v0 = vpop.f32.mrb[4].mxu0  ;;  %v793_v54 = vpop.f32.mrb[28].mxu1 }
 0x26c   :  { %v799_v63 = vadd.f32 %v752_v0, %v4498_v23  ;;  %v754_v12 = vpop.f32.mrb[5].mxu0  ;;  %v3445_v29 = vpop.f32.mrb[29].mxu1  ;;  %v813_v27 = vadd.f32 %v4546_v40, %v793_v54 }
 0x26d   :  { %v806_v36 = vadd.f32 %v754_v12, %v4500_v30  ;;  %v756_v44 = vpop.f32.mrb[6].mxu0  ;;  %v796_v6 = vpop.f32.mrb[30].mxu1 }
 0x26e   :  { %v3113_v9 = vmul.f32 -1.442695, %v799_v63  ;;  %v757_v52 = vpop.f32.mrb[7].mxu0  ;;  %v3446_v10 = vpop.f32.mrb[31].mxu1 }
 0x26f   :  { %v3114_v32 = vmul.f32 -1.442695, %v806_v36 }
 0x270   :  { %3935 = vpow2.f32 %v3113_v9 }
 0x271   :  { %3937 = vpow2.f32 %v3114_v32 }
 0x27a   :  { %v3936_v20 = vpop.eup %3935 }
 0x27b   :  { %v803_v24 = vadd.f32 1.0, %v3936_v20  ;;  %v3938_v33 = vpop.eup %3937 }
 0x27c   :  { %v810_v38 = vadd.f32 1.0, %v3938_v33 }
 0x27d   :  { %3939 = vrcp.f32 %v803_v24 }
 0x27e   :  { %3941 = vrcp.f32 %v810_v38 }
 0x287   :  { %v3940_v23 = vpop.eup %3939 }
 0x288   :  { %v814_v0 = vmul.f32 %v3940_v23, %v813_v27  ;;  %v3942_v12 = vpop.eup %3941 }
 0x289   :  { %v817_v63 = vsub.f32 1.0, %v3942_v12  ;;  %v819_v36 = vmul.f32 %v3942_v12, %v4549_v2 }
 0x28a   :  { %v815_v30 = vadd.f32 %v814_v0, %v4533_v46 }
 0x28c   :  { %3943 = vtanh.f32 %v815_v30 }
 0x296   :  { %v3944_v29 = vpop.eup %3943 }
 0x297   :  { %v818_v44 = vmul.f32 %v3944_v29, %v817_v63 }
 0x299   :  { %v4593_v6 = vadd.f32 %v819_v36, %v818_v44  ;;  %v4641_v36 = vld [vmem:[#allocation9] ss:$12 sps:$4 sm:$0xff]  }
 0x29b   :  { %v829_v9 = vpack.c.bf16 %v4593_v6, %v4593_v6 }
 0x29d   :  { %863 = vmatmul.mubr.bf16.vlgmr.msra.gmra.mrb[8].mxu0 %v829_v9  ;;  %3464 = vmatmul.mubr.bf16.vlgmr.msra.gmra.mrb[32].mxu1 %v829_v9  ;;  %v4652_v9 = vld [vmem:[#allocation9 + $0x18] ss:$12 sps:$4 sm:$0xff]  }
 0x29e   :  { %943 = vmatpush1.bf16.msra.mxu0 %v4365_v4  ;;  %3468 = vmatpush3.bf16.msra.mxu1 %v4429_v53 }
 0x29f   :  { %944 = vmatprep.subr.bf16.mxu0 %v4368_v7  ;;  %3469 = vmatprep.subr.bf16.mxu1 %v5376_v1 }
 0x2a0   :  { %974 = vmatprep.mubr.bf16.mxu0 %v5377_v5  ;;  %3483 = vmatprep.mubr.msk.bf16.mxu1 %vm4255_vm0, %v5376_v1 }
 0x2a2   :  { %945 = vmatpush1.bf16.msra.mxu0 %v4371_v8  ;;  %3470 = vmatpush3.bf16.msra.mxu1 %v4437_v55 }
 0x2a3   :  { %946 = vmatprep.subr.bf16.mxu0 %v4374_v11  ;;  %3471 = vmatprep.subr.bf16.mxu1 %v5376_v1 }
 0x2a6   :  { %947 = vmatpush1.bf16.msra.mxu0 %v4377_v13  ;;  %3472 = vmatpush3.bf16.msra.mxu1 %v4441_v56 }
 0x2a7   :  { %948 = vmatprep.subr.bf16.mxu0 %v4380_v14  ;;  %3473 = vmatprep.subr.bf16.mxu1 %v5376_v1 }
 0x2aa   :  { %949 = vmatpush1.bf16.msra.mxu0 %v4383_v17  ;;  %3474 = vmatpush3.bf16.msra.mxu1 %v4445_v57 }
 0x2ab   :  { %950 = vmatprep.subr.bf16.mxu0 %v4386_v18  ;;  %3475 = vmatprep.subr.bf16.mxu1 %v5376_v1 }
 0x2ae   :  { %951 = vmatpush1.bf16.msra.mxu0 %v4389_v21  ;;  %3476 = vmatpush3.bf16.msra.mxu1 %v4451_v58 }
 0x2af   :  { %952 = vmatprep.subr.bf16.mxu0 %v4392_v22  ;;  %3477 = vmatprep.subr.bf16.mxu1 %v5376_v1 }
 0x2b2   :  { %953 = vmatpush1.bf16.msra.mxu0 %v4395_v25  ;;  %3478 = vmatpush3.bf16.msra.mxu1 %v4455_v59 }
 0x2b3   :  { %954 = vmatprep.subr.bf16.mxu0 %v4398_v26  ;;  %3479 = vmatprep.subr.bf16.mxu1 %v5376_v1 }
 0x2b6   :  { %955 = vmatpush1.bf16.msra.mxu0 %v4400_v28  ;;  %3480 = vmatpush3.bf16.msra.mxu1 %v4459_v60 }
 0x2b7   :  { %956 = vmatprep.subr.bf16.mxu0 %v4404_v31  ;;  %3481 = vmatprep.subr.bf16.mxu1 %v5376_v1 }
 0x2ba   :  { %957 = vmatpush1.bf16.msra.mxu0 %v4407_v35  ;;  %3482 = vmatpush3.bf16.msra.mxu1 %v4463_v61 }
 0x2bb   :  { %1054 = vmatprep.subr.bf16.mxu0 %v4363_v3  ;;  %3487 = vmatprep.subr.bf16.mxu1 %v5376_v1 }
 0x370   :  { %v864_v4 = vpop.f32.mrb[8].mxu0  ;;  %v905_v7 = vpop.f32.mrb[32].mxu1 }
 0x371   :  { %v911_v8 = vadd.f32 %v864_v4, %v4502_v37  ;;  %v866_v11 = vpop.f32.mrb[9].mxu0  ;;  %v3465_v13 = vpop.f32.mrb[33].mxu1  ;;  %v925_v33 = vadd.f32 %v4546_v40, %v905_v7  ;;  %v4656_v4 = vld [vmem:[#allocation9 + $0x34] ss:$12 sps:$4 sm:$0xff]   ;;  %v4660_v7 = vld [vmem:[#allocation9 + $0x30] ss:$12 sps:$4 sm:$0xff]  }
 0x372   :  { %v918_v14 = vadd.f32 %v866_v11, %v4504_v39  ;;  %v868_v17 = vpop.f32.mrb[10].mxu0  ;;  %v908_v27 = vpop.f32.mrb[34].mxu1  ;;  %v4668_v11 = vld [vmem:[#allocation9 + $0x48] ss:$12 sps:$4 sm:$0xff]  }
 0x373   :  { %v3115_v46 = vmul.f32 -1.442695, %v911_v8  ;;  %v869_v54 = vpop.f32.mrb[11].mxu0  ;;  %v3466_v52 = vpop.f32.mrb[35].mxu1  ;;  %v4664_v8 = vld [vmem:[#allocation9 + $0x4c] ss:$12 sps:$4 sm:$0xff]  }
 0x374   :  { %v3116_v10 = vmul.f32 -1.442695, %v918_v14 }
 0x375   :  { %3945 = vpow2.f32 %v3115_v46 }
 0x376   :  { %3947 = vpow2.f32 %v3116_v10 }
 0x37f   :  { %v3946_v32 = vpop.eup %3945 }
 0x380   :  { %v915_v3 = vadd.f32 1.0, %v3946_v32  ;;  %v3948_v20 = vpop.eup %3947 }
 0x381   :  { %v922_v24 = vadd.f32 1.0, %v3948_v20 }
 0x382   :  { %3949 = vrcp.f32 %v915_v3 }
 0x383   :  { %3951 = vrcp.f32 %v922_v24 }
 0x38c   :  { %v3950_v37 = vpop.eup %3949 }
 0x38d   :  { %v926_v38 = vmul.f32 %v3950_v37, %v925_v33  ;;  %v3952_v23 = vpop.eup %3951 }
 0x38e   :  { %v929_v0 = vsub.f32 1.0, %v3952_v23  ;;  %v931_v63 = vmul.f32 %v3952_v23, %v4593_v6 }
 0x38f   :  { %v927_v39 = vadd.f32 %v926_v38, %v4529_v34  ;;  %v4645_v34 = vld [vmem:[#allocation9 + $0x1c] ss:$12 sps:$4 sm:$0xff]  }
 0x391   :  { %3953 = vtanh.f32 %v927_v39 }
 0x39b   :  { %v3954_v30 = vpop.eup %3953 }
 0x39c   :  { %v930_v12 = vmul.f32 %v3954_v30, %v929_v0  ;;  %v4722_v30 = vld [vmem:[#allocation9 + $0x60] ss:$12 sps:$4 sm:$0xff]  }
 0x39e   :  { %v4637_v29 = vadd.f32 %v931_v63, %v930_v12  ;;  %v4726_v12 = vld [vmem:[#allocation9 + $0x7c] ss:$12 sps:$4 sm:$0xff]   ;;  %v4730_v63 = vld [vmem:[#allocation9 + $0x78] ss:$12 sps:$4 sm:$0xff]  }
 0x3a0   :  { %v941_v44 = vpack.c.bf16 %v4637_v29, %v4637_v29 }
 0x3a2   :  { %975 = vmatmul.mubr.bf16.vlgmr.msra.gmra.mrb[12].mxu0 %v941_v44  ;;  %3484 = vmatmul.mubr.bf16.vlgmr.msra.gmra.mrb[36].mxu1 %v941_v44  ;;  %v4734_v44 = vld [vmem:[#allocation9 + $0x94] ss:$12 sps:$4 sm:$0xff]  }
 0x3a3   :  { %1055 = vmatpush1.bf16.msra.mxu0 %v4641_v36  ;;  %3488 = vmatpush3.bf16.msra.mxu1 %v4429_v53 }
 0x3a4   :  { %1056 = vmatprep.subr.bf16.mxu0 %v4645_v34  ;;  %3489 = vmatprep.subr.bf16.mxu1 %v5376_v1 }
 0x3a5   :  { %1086 = vmatprep.mubr.bf16.mxu0 %v5377_v5  ;;  %3503 = vmatprep.mubr.msk.bf16.mxu1 %vm4255_vm0, %v5376_v1 }
 0x3a7   :  { %1057 = vmatpush1.bf16.msra.mxu0 %v4652_v9  ;;  %3490 = vmatpush3.bf16.msra.mxu1 %v4437_v55 }
 0x3a8   :  { %1058 = vmatprep.subr.bf16.mxu0 %v4656_v4  ;;  %3491 = vmatprep.subr.bf16.mxu1 %v5376_v1 }
 0x3ab   :  { %1059 = vmatpush1.bf16.msra.mxu0 %v4660_v7  ;;  %3492 = vmatpush3.bf16.msra.mxu1 %v4441_v56 }
 0x3ac   :  { %1060 = vmatprep.subr.bf16.mxu0 %v4664_v8  ;;  %3493 = vmatprep.subr.bf16.mxu1 %v5376_v1 }
 0x3af   :  { %1061 = vmatpush1.bf16.msra.mxu0 %v4668_v11  ;;  %3494 = vmatpush3.bf16.msra.mxu1 %v4445_v57 }
 0x3b0   :  { %1062 = vmatprep.subr.bf16.mxu0 %v4386_v18  ;;  %3495 = vmatprep.subr.bf16.mxu1 %v5376_v1  ;;  %v4688_v18 = vld [vmem:[#allocation9 + $0x4] ss:$12 sps:$4 sm:$0xff]  }
 0x3b3   :  { %1063 = vmatpush1.bf16.msra.mxu0 %v4389_v21  ;;  %3496 = vmatpush3.bf16.msra.mxu1 %v4451_v58 }
 0x3b4   :  { %1064 = vmatprep.subr.bf16.mxu0 %v4392_v22  ;;  %3497 = vmatprep.subr.bf16.mxu1 %v5376_v1 }
 0x3b7   :  { %1065 = vmatpush1.bf16.msra.mxu0 %v4395_v25  ;;  %3498 = vmatpush3.bf16.msra.mxu1 %v4455_v59 }
 0x3b8   :  { %1066 = vmatprep.subr.bf16.mxu0 %v4398_v26  ;;  %3499 = vmatprep.subr.bf16.mxu1 %v5376_v1 }
 0x3bb   :  { %1067 = vmatpush1.bf16.msra.mxu0 %v4400_v28  ;;  %3500 = vmatpush3.bf16.msra.mxu1 %v4459_v60 }
 0x3bc   :  { %1068 = vmatprep.subr.bf16.mxu0 %v4404_v31  ;;  %3501 = vmatprep.subr.bf16.mxu1 %v5376_v1 }
 0x3bf   :  { %1069 = vmatpush1.bf16.msra.mxu0 %v4407_v35  ;;  %3502 = vmatpush3.bf16.msra.mxu1 %v4463_v61 }
 0x3c0   :  { %1166 = vmatprep.subr.bf16.mxu0 %v4688_v18  ;;  %3507 = vmatprep.subr.bf16.mxu1 %v5376_v1 }
 0x475   :  { %v976_v21 = vpop.f32.mrb[12].mxu0  ;;  %v1017_v22 = vpop.f32.mrb[36].mxu1 }
 0x476   :  { %v1023_v25 = vadd.f32 %v976_v21, %v4506_v41  ;;  %v978_v26 = vpop.f32.mrb[13].mxu0  ;;  %v3485_v28 = vpop.f32.mrb[37].mxu1  ;;  %v1037_v3 = vadd.f32 %v4546_v40, %v1017_v22  ;;  %v4738_v21 = vld [vmem:[#allocation9 + $0x90] ss:$12 sps:$4 sm:$0xff]   ;;  %v4742_v22 = vld [vmem:[#allocation9 + $0xac] ss:$12 sps:$4 sm:$0xff]  }
 0x477   :  { %v1030_v31 = vadd.f32 %v978_v26, %v4508_v43  ;;  %v980_v13 = vpop.f32.mrb[14].mxu0  ;;  %v1020_v14 = vpop.f32.mrb[38].mxu1 }
 0x478   :  { %v3117_v17 = vmul.f32 -1.442695, %v1023_v25  ;;  %v981_v35 = vpop.f32.mrb[15].mxu0  ;;  %v3486_v27 = vpop.f32.mrb[39].mxu1  ;;  %v4746_v25 = vld [vmem:[#allocation9 + $0xa8] ss:$12 sps:$4 sm:$0xff]  }
 0x479   :  { %v3118_v46 = vmul.f32 -1.442695, %v1030_v31 }
 0x47a   :  { %3955 = vpow2.f32 %v3117_v17 }
 0x47b   :  { %3957 = vpow2.f32 %v3118_v46 }
 0x484   :  { %v3956_v54 = vpop.eup %3955 }
 0x485   :  { %v1027_v52 = vadd.f32 1.0, %v3956_v54  ;;  %v3958_v10 = vpop.eup %3957 }
 0x486   :  { %v1034_v32 = vadd.f32 1.0, %v3958_v10 }
 0x487   :  { %3959 = vrcp.f32 %v1027_v52 }
 0x488   :  { %3961 = vrcp.f32 %v1034_v32 }
 0x491   :  { %v3960_v41 = vpop.eup %3959 }
 0x492   :  { %v1038_v20 = vmul.f32 %v3960_v41, %v1037_v3  ;;  %v3962_v24 = vpop.eup %3961 }
 0x493   :  { %v1041_v33 = vsub.f32 1.0, %v3962_v24  ;;  %v1043_v39 = vmul.f32 %v3962_v24, %v4637_v29 }
 0x494   :  { %v1039_v43 = vadd.f32 %v1038_v20, %v4531_v42  ;;  %v4718_v42 = vld [vmem:[#allocation9 + $0x64] ss:$12 sps:$4 sm:$0xff]  }
 0x496   :  { %3963 = vtanh.f32 %v1039_v43 }
 0x4a0   :  { %v3964_v37 = vpop.eup %3963 }
 0x4a1   :  { %v1042_v38 = vmul.f32 %v3964_v37, %v1041_v33 }
 0x4a3   :  { %v4697_v23 = vadd.f32 %v1043_v39, %v1042_v38 }
 0x4a5   :  { %v1053_v0 = vpack.c.bf16 %v4697_v23, %v4697_v23 }
 0x4a7   :  { %1087 = vmatmul.mubr.bf16.vlgmr.msra.gmra.mrb[16].mxu0 %v1053_v0  ;;  %3504 = vmatmul.mubr.bf16.vlgmr.msra.gmra.mrb[40].mxu1 %v1053_v0 }
 0x4a8   :  { %1167 = vmatpush1.bf16.msra.mxu0 %v4641_v36  ;;  %3508 = vmatpush3.bf16.msra.mxu1 %v4429_v53 }
 0x4a9   :  { %1168 = vmatprep.subr.bf16.mxu0 %v4645_v34  ;;  %3509 = vmatprep.subr.bf16.mxu1 %v5376_v1 }
 0x4aa   :  { %1198 = vmatprep.mubr.bf16.mxu0 %v5377_v5  ;;  %3523 = vmatprep.mubr.msk.bf16.mxu1 %vm4255_vm0, %v5376_v1 }
 0x4ac   :  { %1169 = vmatpush1.bf16.msra.mxu0 %v4652_v9  ;;  %3510 = vmatpush3.bf16.msra.mxu1 %v4437_v55 }
 0x4ad   :  { %1170 = vmatprep.subr.bf16.mxu0 %v4656_v4  ;;  %3511 = vmatprep.subr.bf16.mxu1 %v5376_v1 }
 0x4b0   :  { %1171 = vmatpush1.bf16.msra.mxu0 %v4660_v7  ;;  %3512 = vmatpush3.bf16.msra.mxu1 %v4441_v56 }
 0x4b1   :  { %1172 = vmatprep.subr.bf16.mxu0 %v4664_v8  ;;  %3513 = vmatprep.subr.bf16.mxu1 %v5376_v1 }
 0x4b4   :  { %1173 = vmatpush1.bf16.msra.mxu0 %v4668_v11  ;;  %3514 = vmatpush3.bf16.msra.mxu1 %v4445_v57 }
 0x4b5   :  { %1174 = vmatprep.subr.bf16.mxu0 %v4718_v42  ;;  %3515 = vmatprep.subr.bf16.mxu1 %v5376_v1 }
 0x4b8   :  { %1175 = vmatpush1.bf16.msra.mxu0 %v4722_v30  ;;  %3516 = vmatpush3.bf16.msra.mxu1 %v4451_v58 }
 0x4b9   :  { %1176 = vmatprep.subr.bf16.mxu0 %v4726_v12  ;;  %3517 = vmatprep.subr.bf16.mxu1 %v5376_v1 }
 0x4bc   :  { %1177 = vmatpush1.bf16.msra.mxu0 %v4730_v63  ;;  %3518 = vmatpush3.bf16.msra.mxu1 %v4455_v59 }
 0x4bd   :  { %1178 = vmatprep.subr.bf16.mxu0 %v4734_v44  ;;  %3519 = vmatprep.subr.bf16.mxu1 %v5376_v1 }
 0x4c0   :  { %1179 = vmatpush1.bf16.msra.mxu0 %v4738_v21  ;;  %3520 = vmatpush3.bf16.msra.mxu1 %v4459_v60 }
 0x4c1   :  { %1180 = vmatprep.subr.bf16.mxu0 %v4742_v22  ;;  %3521 = vmatprep.subr.bf16.mxu1 %v5376_v1 }
 0x4c4   :  { %1181 = vmatpush1.bf16.msra.mxu0 %v4746_v25  ;;  %3522 = vmatpush3.bf16.msra.mxu1 %v4463_v61 }
 0x4c5   :  { %1278 = vmatprep.subr.bf16.mxu0 %v4688_v18  ;;  %3527 = vmatprep.subr.bf16.mxu1 %v5376_v1 }
 0x57a   :  { %v1088_v26 = vpop.f32.mrb[16].mxu0  ;;  %v1129_v28 = vpop.f32.mrb[40].mxu1 }
 0x57b   :  { %v1135_v31 = vadd.f32 %v1088_v26, %v4510_v45  ;;  %v1090_v13 = vpop.f32.mrb[17].mxu0  ;;  %v3505_v14 = vpop.f32.mrb[41].mxu1  ;;  %v1149_v43 = vadd.f32 %v4546_v40, %v1129_v28 }
 0x57c   :  { %v1142_v17 = vadd.f32 %v1090_v13, %v4512_v47  ;;  %v1092_v35 = vpop.f32.mrb[18].mxu0  ;;  %v1132_v27 = vpop.f32.mrb[42].mxu1 }
 0x57d   :  { %v3119_v46 = vmul.f32 -1.442695, %v1135_v31  ;;  %v1093_v54 = vpop.f32.mrb[19].mxu0  ;;  %v3506_v52 = vpop.f32.mrb[43].mxu1 }
 0x57e   :  { %v3120_v10 = vmul.f32 -1.442695, %v1142_v17 }
 0x57f   :  { %3965 = vpow2.f32 %v3119_v46 }
 0x580   :  { %3967 = vpow2.f32 %v3120_v10 }
 0x589   :  { %v3966_v32 = vpop.eup %3965 }
 0x58a   :  { %v1139_v3 = vadd.f32 1.0, %v3966_v32  ;;  %v3968_v41 = vpop.eup %3967 }
 0x58b   :  { %v1146_v20 = vadd.f32 1.0, %v3968_v41 }
 0x58c   :  { %3969 = vrcp.f32 %v1139_v3 }
 0x58d   :  { %3971 = vrcp.f32 %v1146_v20 }
 0x596   :  { %v3970_v45 = vpop.eup %3969 }
 0x597   :  { %v1150_v24 = vmul.f32 %v3970_v45, %v1149_v43  ;;  %v3972_v33 = vpop.eup %3971 }
 0x598   :  { %v1153_v37 = vsub.f32 1.0, %v3972_v33  ;;  %v1155_v0 = vmul.f32 %v3972_v33, %v4697_v23 }
 0x599   :  { %v1151_v47 = vadd.f32 %v1150_v24, %v4537_v50 }
 0x59b   :  { %3973 = vtanh.f32 %v1151_v47 }
 0x5a5   :  { %v3974_v38 = vpop.eup %3973 }
 0x5a6   :  { %v1154_v39 = vmul.f32 %v3974_v38, %v1153_v37 }
 0x5a8   :  { %v4757_v26 = vadd.f32 %v1155_v0, %v1154_v39 }
 0x5aa   :  { %v1165_v31 = vpack.c.bf16 %v4757_v26, %v4757_v26 }
 0x5ac   :  { %1199 = vmatmul.mubr.bf16.vlgmr.msra.gmra.mrb[20].mxu0 %v1165_v31  ;;  %3524 = vmatmul.mubr.bf16.vlgmr.msra.gmra.mrb[44].mxu1 %v1165_v31 }
 0x5ad   :  { %1279 = vmatpush1.bf16.msra.mxu0 %v4641_v36  ;;  %3528 = vmatpush3.bf16.msra.mxu1 %v4429_v53 }
 0x5ae   :  { %1280 = vmatprep.subr.bf16.mxu0 %v4645_v34  ;;  %3529 = vmatprep.subr.bf16.mxu1 %v5376_v1 }
 0x5af   :  { %1310 = vmatprep.mubr.bf16.mxu0 %v5377_v5  ;;  %3543 = vmatprep.mubr.msk.bf16.mxu1 %vm4255_vm0, %v5376_v1 }
 0x5b1   :  { %1281 = vmatpush1.bf16.msra.mxu0 %v4652_v9  ;;  %3530 = vmatpush3.bf16.msra.mxu1 %v4437_v55 }
 0x5b2   :  { %1282 = vmatprep.subr.bf16.mxu0 %v4656_v4  ;;  %3531 = vmatprep.subr.bf16.mxu1 %v5376_v1 }
 0x5b5   :  { %1283 = vmatpush1.bf16.msra.mxu0 %v4660_v7  ;;  %3532 = vmatpush3.bf16.msra.mxu1 %v4441_v56 }
 0x5b6   :  { %1284 = vmatprep.subr.bf16.mxu0 %v4664_v8  ;;  %3533 = vmatprep.subr.bf16.mxu1 %v5376_v1 }
 0x5b9   :  { %1285 = vmatpush1.bf16.msra.mxu0 %v4668_v11  ;;  %3534 = vmatpush3.bf16.msra.mxu1 %v4445_v57 }
 0x5ba   :  { %1286 = vmatprep.subr.bf16.mxu0 %v4718_v42  ;;  %3535 = vmatprep.subr.bf16.mxu1 %v5376_v1 }
 0x5bd   :  { %1287 = vmatpush1.bf16.msra.mxu0 %v4722_v30  ;;  %3536 = vmatpush3.bf16.msra.mxu1 %v4451_v58 }
 0x5be   :  { %1288 = vmatprep.subr.bf16.mxu0 %v4726_v12  ;;  %3537 = vmatprep.subr.bf16.mxu1 %v5376_v1 }
 0x5c1   :  { %1289 = vmatpush1.bf16.msra.mxu0 %v4730_v63  ;;  %3538 = vmatpush3.bf16.msra.mxu1 %v4455_v59 }
 0x5c2   :  { %1290 = vmatprep.subr.bf16.mxu0 %v4734_v44  ;;  %3539 = vmatprep.subr.bf16.mxu1 %v5376_v1 }
 0x5c5   :  { %1291 = vmatpush1.bf16.msra.mxu0 %v4738_v21  ;;  %3540 = vmatpush3.bf16.msra.mxu1 %v4459_v60 }
 0x5c6   :  { %1292 = vmatprep.subr.bf16.mxu0 %v4742_v22  ;;  %3541 = vmatprep.subr.bf16.mxu1 %v5376_v1 }
 0x5c9   :  { %1293 = vmatpush1.bf16.msra.mxu0 %v4746_v25  ;;  %3542 = vmatpush3.bf16.msra.mxu1 %v4463_v61 }
 0x5ca   :  { %1390 = vmatprep.subr.bf16.mxu0 %v4688_v18  ;;  %3547 = vmatprep.subr.bf16.mxu1 %v5376_v1 }
 0x67f   :  { %v1200_v50 = vpop.f32.mrb[20].mxu0  ;;  %v1241_v28 = vpop.f32.mrb[44].mxu1 }
 0x680   :  { %v1247_v13 = vadd.f32 %v1200_v50, %v4514_v49  ;;  %v1202_v14 = vpop.f32.mrb[21].mxu0  ;;  %v3525_v17 = vpop.f32.mrb[45].mxu1  ;;  %v1261_v43 = vadd.f32 %v4546_v40, %v1241_v28  ;;  %v3853_v28 = vld [vmem:[#allocation7 + $0xc0] ss:$12 sps:$4 sm:$0xff]  }
 0x681   :  { %v1254_v35 = vadd.f32 %v1202_v14, %v4516_v51  ;;  %v1204_v27 = vpop.f32.mrb[22].mxu0  ;;  %v1244_v46 = vpop.f32.mrb[46].mxu1  ;;  %v3859_v14 = vld [vmem:[#allocation7 + $0xdc] ss:$12 sps:$4 sm:$0xff]   ;;  %v3857_v17 = vld [vmem:[#allocation7 + $0xd8] ss:$12 sps:$4 sm:$0xff]  }
 0x682   :  { %v3121_v54 = vmul.f32 -1.442695, %v1247_v13  ;;  %v1205_v52 = vpop.f32.mrb[23].mxu0  ;;  %v3526_v10 = vpop.f32.mrb[47].mxu1  ;;  %v3864_v27 = vld [vmem:[#allocation7 + $0xf8] ss:$12 sps:$4 sm:$0xff]  }
 0x683   :  { %v3122_v32 = vmul.f32 -1.442695, %v1254_v35  ;;  %v3863_v35 = vld [vmem:[#allocation7 + $0xf4] ss:$12 sps:$4 sm:$0xff]   ;;  %v3861_v46 = vld [vmem:[#allocation7 + $0xf0] ss:$12 sps:$4 sm:$0xff]  }
 0x684   :  { %3975 = vpow2.f32 %v3121_v54  ;;  %v3867_v54 = vld [vmem:[#allocation7 + $0x10c] ss:$12 sps:$4 sm:$0xff]   ;;  %v3868_v52 = vld [vmem:[#allocation7 + $0x110] ss:$12 sps:$4 sm:$0xff]   ;;  %v3872_v10 = vld [vmem:[#allocation7 + $0x128] ss:$12 sps:$4 sm:$0xff]  }
 0x685   :  { %3977 = vpow2.f32 %v3122_v32  ;;  %v3869_v32 = vld [vmem:[#allocation7 + $0x120] ss:$12 sps:$4 sm:$0xff]  }
 0x68e   :  { %v3976_v3 = vpop.eup %3975 }
 0x68f   :  { %v1251_v18 = vadd.f32 1.0, %v3976_v3  ;;  %v3978_v41 = vpop.eup %3977  ;;  %v3875_v3 = vld [vmem:[#allocation7 + $0x13c] ss:$12 sps:$4 sm:$0xff]  }
 0x690   :  { %v1258_v20 = vadd.f32 1.0, %v3978_v41  ;;  %v3873_v41 = vld [vmem:[#allocation7 + $0x138] ss:$12 sps:$4 sm:$0xff]  }
 0x691   :  { %3979 = vrcp.f32 %v1251_v18  ;;  %v3876_v18 = vld [vmem:[#allocation7 + $0x140] ss:$12 sps:$4 sm:$0xff]  }
 0x692   :  { %3981 = vrcp.f32 %v1258_v20  ;;  %v3879_v20 = vld [vmem:[#allocation7 + $0x154] ss:$12 sps:$4 sm:$0xff]  }
 0x69b   :  { %v3980_v49 = vpop.eup %3979 }
 0x69c   :  { %v1262_v45 = vmul.f32 %v3980_v49, %v1261_v43  ;;  %v3982_v24 = vpop.eup %3981  ;;  %v3880_v43 = vld [vmem:[#allocation7 + $0x158] ss:$12 sps:$4 sm:$0xff]   ;;  %v3877_v49 = vld [vmem:[#allocation7 + $0x150] ss:$12 sps:$4 sm:$0xff]  }
 0x69d   :  { %v1265_v47 = vsub.f32 1.0, %v3982_v24  ;;  %v1267_v38 = vmul.f32 %v3982_v24, %v4757_v26  ;;  %v3881_v24 = vld [vmem:[#allocation7 + $0x168] ss:$12 sps:$4 sm:$0xff]  }
 0x69e   :  { %v1263_v51 = vadd.f32 %v1262_v45, %v4541_v16  ;;  %v3883_v45 = vld [vmem:[#allocation7 + $0x16c] ss:$12 sps:$4 sm:$0xff]  }
 0x6a0   :  { %3983 = vtanh.f32 %v1263_v51  ;;  %v3884_v51 = vld [vmem:[#allocation7 + $0x170] ss:$12 sps:$4 sm:$0xff]  }
 0x6aa   :  { %v3984_v33 = vpop.eup %3983 }
 0x6ab   :  { %v1266_v37 = vmul.f32 %v3984_v33, %v1265_v47  ;;  %v1504_v47 = vpack.c.bf16 %v4697_v23, %v4637_v29  ;;  %v4864_v29 = vld [vmem:[#allocation9 + $0xdc] ss:$12 sps:$4 sm:$0xff]   ;;  %v4866_v23 = vld [vmem:[#allocation9 + $0xd8] ss:$12 sps:$4 sm:$0xff]  }
 0x6ad   :  { %v4801_v39 = vadd.f32 %v1267_v38, %v1266_v37  ;;  %v4858_v37 = vld [vmem:[#allocation9 + $0xc4] ss:$12 sps:$4 sm:$0xff]   ;;  %v4860_v38 = vld [vmem:[#allocation9 + $0xc0] ss:$12 sps:$4 sm:$0xff]  }
 0x6af   :  { %v1277_v0 = vpack.c.bf16 %v4801_v39, %v4801_v39  ;;  %v1505_v33 = vpack.c.bf16 %v4801_v39, %v4757_v26  ;;  %v4870_v26 = vld [vmem:[#allocation9 + $0xf4] ss:$12 sps:$4 sm:$0xff]  }
 0x6b1   :  { %1311 = vmatmul.mubr.bf16.vlgmr.msra.gmra.mrb[24].mxu0 %v1277_v0  ;;  %3544 = vmatmul.mubr.bf16.vlgmr.msra.gmra.mrb[48].mxu1 %v1277_v0  ;;  %v4876_v0 = vld [vmem:[#allocation9 + $0x10c] ss:$12 sps:$4 sm:$0xff]  }
 0x6b2   :  { %1391 = vmatpush1.bf16.msra.mxu0 %v4641_v36  ;;  %3548 = vmatpush3.bf16.msra.mxu1 %v4429_v53  ;;  %v3855_v53 = vld [vmem:[#allocation7 + $0xc4] ss:$12 sps:$4 sm:$0xff]  }
 0x6b3   :  { %1392 = vmatprep.subr.bf16.mxu0 %v4645_v34  ;;  %3549 = vmatprep.subr.bf16.mxu1 %v5376_v1 }
 0x6b4   :  { %1422 = vmatprep.mubr.bf16.mxu0 %v5377_v5  ;;  %3563 = vmatprep.mubr.msk.bf16.mxu1 %vm4255_vm0, %v5376_v1 }
 0x6b6   :  { %1393 = vmatpush1.bf16.msra.mxu0 %v4652_v9  ;;  %3550 = vmatpush3.bf16.msra.mxu1 %v4437_v55  ;;  %v3856_v55 = vld [vmem:[#allocation7 + $0xc8] ss:$12 sps:$4 sm:$0xff]  }
 0x6b7   :  { %1394 = vmatprep.subr.bf16.mxu0 %v4656_v4  ;;  %3551 = vmatprep.subr.bf16.mxu1 %v5376_v1 }
 0x6ba   :  { %1395 = vmatpush1.bf16.msra.mxu0 %v4660_v7  ;;  %3552 = vmatpush3.bf16.msra.mxu1 %v4441_v56 }
 0x6bb   :  { %1396 = vmatprep.subr.bf16.mxu0 %v4664_v8  ;;  %3553 = vmatprep.subr.bf16.mxu1 %v5376_v1 }
 0x6be   :  { %1397 = vmatpush1.bf16.msra.mxu0 %v4668_v11  ;;  %3554 = vmatpush3.bf16.msra.mxu1 %v4445_v57 }
 0x6bf   :  { %1398 = vmatprep.subr.bf16.mxu0 %v4718_v42  ;;  %3555 = vmatprep.subr.bf16.mxu1 %v5376_v1 }
 0x6c2   :  { %1399 = vmatpush1.bf16.msra.mxu0 %v4722_v30  ;;  %3556 = vmatpush3.bf16.msra.mxu1 %v4451_v58 }
 0x6c3   :  { %1400 = vmatprep.subr.bf16.mxu0 %v4726_v12  ;;  %3557 = vmatprep.subr.bf16.mxu1 %v5376_v1 }
 0x6c6   :  { %1401 = vmatpush1.bf16.msra.mxu0 %v4730_v63  ;;  %3558 = vmatpush3.bf16.msra.mxu1 %v4455_v59 }
 0x6c7   :  { %1402 = vmatprep.subr.bf16.mxu0 %v4734_v44  ;;  %3559 = vmatprep.subr.bf16.mxu1 %v5376_v1 }
 0x6ca   :  { %1403 = vmatpush1.bf16.msra.mxu0 %v4738_v21  ;;  %3560 = vmatpush3.bf16.msra.mxu1 %v4459_v60 }
 0x6cb   :  { %1404 = vmatprep.subr.bf16.mxu0 %v4742_v22  ;;  %3561 = vmatprep.subr.bf16.mxu1 %v5376_v1 }
 0x6ce   :  { %1405 = vmatpush1.bf16.msra.mxu0 %v4746_v25  ;;  %3562 = vmatpush3.bf16.msra.mxu1 %v4463_v61 }
 0x6cf   :  { %1686 = vmatprep.subr.bf16.mxu0 %v3855_v53  ;;  %3567 = vmatprep.subr.bf16.mxu1 %v3856_v55  ;;  %v4878_v53 = vld [vmem:[#allocation9 + $0x108] ss:$12 sps:$4 sm:$0xff]  }
 0x784   :  { %v1312_v56 = vpop.f32.mrb[24].mxu0  ;;  %v1353_v57 = vpop.f32.mrb[48].mxu1 }
 0x785   :  { %v1359_v58 = vadd.f32 %v1312_v56, %v4518_v62  ;;  %v1314_v59 = vpop.f32.mrb[25].mxu0  ;;  %v3545_v16 = vpop.f32.mrb[49].mxu1  ;;  %v1373_v12 = vadd.f32 %v4546_v40, %v1353_v57  ;;  %v3860_v40 = vld [vmem:[#allocation7 + $0xe0] ss:$12 sps:$4 sm:$0xff]   ;;  %v4888_v57 = vld [vmem:[#allocation9 + $0x13c] ss:$12 sps:$4 sm:$0xff]  }
 0x786   :  { %v1366_v60 = vadd.f32 %v1314_v59, %v4521_v15  ;;  %v1316_v36 = vpop.f32.mrb[26].mxu0  ;;  %v1356_v34 = vpop.f32.mrb[50].mxu1  ;;  %v4884_v56 = vld [vmem:[#allocation9 + $0x120] ss:$12 sps:$4 sm:$0xff]   ;;  %v4896_v16 = vld [vmem:[#allocation9 + $0xc8] ss:$12 sps:$4 sm:$0xff]  }
 0x787   :  { %v3123_v9 = vmul.f32 -1.442695, %v1359_v58  ;;  %v1317_v4 = vpop.f32.mrb[27].mxu0  ;;  %v3546_v7 = vpop.f32.mrb[51].mxu1  ;;  %v4890_v58 = vld [vmem:[#allocation9 + $0x138] ss:$12 sps:$4 sm:$0xff]  }
 0x788   :  { %v3124_v8 = vmul.f32 -1.442695, %v1366_v60  ;;  %v4894_v59 = vld [vmem:[#allocation9 + $0x154] ss:$12 sps:$4 sm:$0xff]   ;;  %v4898_v60 = vld [vmem:[#allocation9 + $0x150] ss:$12 sps:$4 sm:$0xff]  }
 0x789   :  { %3985 = vpow2.f32 %v3123_v9  ;;  %v4903_v36 = vld [vmem:[#allocation9 + $0x16c] ss:$12 sps:$4 sm:$0xff]   ;;  %v4906_v34 = vld [vmem:[#allocation9 + $0x168] ss:$12 sps:$4 sm:$0xff]   ;;  %v4918_v7 = vld [vmem:[#allocation9 + $0x110] ss:$12 sps:$4 sm:$0xff]  }
 0x78a   :  { %3987 = vpow2.f32 %v3124_v8  ;;  %v4908_v9 = vld [vmem:[#allocation9 + $0xe0] ss:$12 sps:$4 sm:$0xff]   ;;  %v4914_v4 = vld [vmem:[#allocation9 + $0xf8] ss:$12 sps:$4 sm:$0xff]   ;;  %v4922_v8 = vld [vmem:[#allocation9 + $0x128] ss:$12 sps:$4 sm:$0xff]  }
 0x793   :  { %v3986_v61 = vpop.eup %3985 }
 0x794   :  { %v1363_v11 = vadd.f32 1.0, %v3986_v61  ;;  %v3988_v42 = vpop.eup %3987  ;;  %v4926_v61 = vld [vmem:[#allocation9 + $0x140] ss:$12 sps:$4 sm:$0xff]  }
 0x795   :  { %v1370_v30 = vadd.f32 1.0, %v3988_v42  ;;  %v4934_v42 = vld [vmem:[#allocation9 + $0x170] ss:$12 sps:$4 sm:$0xff]  }
 0x796   :  { %3989 = vrcp.f32 %v1363_v11  ;;  %v4930_v11 = vld [vmem:[#allocation9 + $0x158] ss:$12 sps:$4 sm:$0xff]  }
 0x797   :  { %3991 = vrcp.f32 %v1370_v30 }
 0x7a0   :  { %v3990_v62 = vpop.eup %3989 }
 0x7a1   :  { %v1374_v63 = vmul.f32 %v3990_v62, %v1373_v12  ;;  %v3992_v44 = vpop.eup %3991 }
 0x7a2   :  { %v1377_v21 = vsub.f32 1.0, %v3992_v44  ;;  %v1379_v31 = vmul.f32 %v3992_v44, %v4801_v39  ;;  %v4872_v39 = vld [vmem:[#allocation9 + $0xf0] ss:$12 sps:$4 sm:$0xff]   ;;  %v5378_v44 = vld [vmem:[#allocation18_spill] sm:$0xff] }
 0x7a3   :  { %v1375_v15 = vadd.f32 %v1374_v63, %v4535_v48  ;;  %v1503_v48 = vpack.c.bf16 %v4593_v6, %v4549_v2  ;;  %v3865_v2 = vld [vmem:[#allocation7 + $0x108] ss:$12 sps:$4 sm:$0xff]   ;;  %v3871_v6 = vld [vmem:[#allocation7 + $0x124] ss:$12 sps:$4 sm:$0xff]  }
 0x7a5   :  { %3993 = vtanh.f32 %v1375_v15 }
 0x7af   :  { %v3994_v22 = vpop.eup %3993 }
 0x7b0   :  { %v1378_v25 = vmul.f32 %v3994_v22, %v1377_v21 }
 0x7b2   :  { %v4843_v50 = vadd.f32 %v1379_v31, %v1378_v25 }
 0x7b4   :  { %v1389_v13 = vpack.c.bf16 %v4843_v50, %v4843_v50 }
 0x7b6   :  { %1423 = vmatmul.mubr.bf16.vlgmr.msra.gmra.mrb[28].mxu0 %v1389_v13  ;;  %3564 = vmatmul.mubr.bf16.vlgmr.msra.gmra.mrb[52].mxu1 %v1389_v13 }
 0x7b7   :  { %1687 = vmatpush1.bf16.msra.mxu0 %v3853_v28  ;;  %3568 = vmatpush3.bf16.msra.mxu1 %v3856_v55  ;;  %v4882_v55 = vld [vmem:[#allocation9 + $0x124] ss:$12 sps:$4 sm:$0xff]  }
 0x7b8   :  { %3583 = vmatprep.mubr.bf16.mxu1 %v1503_v48  ;;  %1688 = vmatprep.subr.bf16.mxu0 %v3859_v14 }
 0x7b9   :  { %3569 = vmatprep.subr.bf16.mxu1 %v3860_v40  ;;  %1718 = vmatprep.mubr.bf16.mxu0 %v5377_v5 }
 0x7bb   :  { %1689 = vmatpush1.bf16.msra.mxu0 %v3857_v17  ;;  %3570 = vmatpush3.bf16.msra.mxu1 %v3860_v40 }
 0x7bc   :  { %1690 = vmatprep.subr.bf16.mxu0 %v3863_v35  ;;  %3571 = vmatprep.subr.bf16.mxu1 %v3864_v27 }
 0x7bf   :  { %1691 = vmatpush1.bf16.msra.mxu0 %v3861_v46  ;;  %3572 = vmatpush3.bf16.msra.mxu1 %v3864_v27 }
 0x7c0   :  { %1692 = vmatprep.subr.bf16.mxu0 %v3867_v54  ;;  %3573 = vmatprep.subr.bf16.mxu1 %v3868_v52 }
 0x7c3   :  { %1693 = vmatpush1.bf16.msra.mxu0 %v3865_v2  ;;  %3574 = vmatpush3.bf16.msra.mxu1 %v3868_v52  ;;  %v5379_v52 = vld [vmem:[#allocation19_spill] sm:$0xff] }
 0x7c4   :  { %1694 = vmatprep.subr.bf16.mxu0 %v3871_v6  ;;  %3575 = vmatprep.subr.bf16.mxu1 %v3872_v10 }
 0x7c7   :  { %1695 = vmatpush1.bf16.msra.mxu0 %v3869_v32  ;;  %3576 = vmatpush3.bf16.msra.mxu1 %v3872_v10 }
 0x7c8   :  { %1696 = vmatprep.subr.bf16.mxu0 %v3875_v3  ;;  %3577 = vmatprep.subr.bf16.mxu1 %v3876_v18 }
 0x7cb   :  { %1697 = vmatpush1.bf16.msra.mxu0 %v3873_v41  ;;  %3578 = vmatpush3.bf16.msra.mxu1 %v3876_v18 }
 0x7cc   :  { %1698 = vmatprep.subr.bf16.mxu0 %v3879_v20  ;;  %3579 = vmatprep.subr.bf16.mxu1 %v3880_v43 }
 0x7cf   :  { %1699 = vmatpush1.bf16.msra.mxu0 %v3877_v49  ;;  %3580 = vmatpush3.bf16.msra.mxu1 %v3880_v43 }
 0x7d0   :  { %1700 = vmatprep.subr.bf16.mxu0 %v3883_v45  ;;  %3581 = vmatprep.subr.bf16.mxu1 %v3884_v51 }
 0x7d3   :  { %1701 = vmatpush1.bf16.msra.mxu0 %v3881_v24  ;;  %3582 = vmatpush3.bf16.msra.mxu1 %v3884_v51 }
 0x7d4   :  { %3591 = vmatprep.subr.bf16.mxu1 %v5376_v1  ;;  %2020 = vmatprep.subr.bf16.mxu0 %v4858_v37 }
 0x7d6   :  { %1719 = vmatmul.mubr.bf16.vlgmr.msra.gmra.mrb[32].mxu0 %v1503_v48  ;;  %3584 = vmatmul.mubr.bf16.vlgmr.msra.gmra.mrb[56].mxu1 %v1504_v47 }
 0x7d7   :  { %3587 = vmatprep.mubr.bf16.mxu1 %v1505_v33  ;;  %1728 = vmatprep.mubr.bf16.mxu0 %v5377_v5 }
 0x7d8   :  { %2021 = vmatpush1.bf16.msra.mxu0 %v4860_v38  ;;  %3592 = vmatpush3.bf16.msra.mxu1 %v4896_v16 }
 0x7d9   :  { %2022 = vmatprep.subr.bf16.mxu0 %v4864_v29  ;;  %3593 = vmatprep.subr.bf16.mxu1 %v5376_v1 }
 0x7dc   :  { %2023 = vmatpush1.bf16.msra.mxu0 %v4866_v23  ;;  %3594 = vmatpush3.bf16.msra.mxu1 %v4908_v9 }
 0x7dd   :  { %2024 = vmatprep.subr.bf16.mxu0 %v4870_v26  ;;  %3595 = vmatprep.subr.bf16.mxu1 %v5376_v1 }
 0x7de   :  { %1729 = vmatmul.mubr.bf16.gmra.mrb[36].mxu0 %v1504_v47 }
 0x7df   :  { %1738 = vmatprep.mubr.bf16.mxu0 %v5377_v5 }
 0x7e0   :  { %2025 = vmatpush1.bf16.msra.mxu0 %v4872_v39  ;;  %3596 = vmatpush3.bf16.msra.mxu1 %v4914_v4 }
 0x7e1   :  { %2026 = vmatprep.subr.bf16.mxu0 %v4876_v0  ;;  %3597 = vmatprep.subr.bf16.mxu1 %v5376_v1 }
 0x7e4   :  { %2027 = vmatpush1.bf16.msra.mxu0 %v4878_v53  ;;  %3598 = vmatpush3.bf16.msra.mxu1 %v4918_v7 }
 0x7e5   :  { %2028 = vmatprep.subr.bf16.mxu0 %v4882_v55  ;;  %3599 = vmatprep.subr.bf16.mxu1 %v5376_v1 }
 0x7e6   :  { %1739 = vmatmul.mubr.bf16.gmra.mrb[40].mxu0 %v1505_v33 }
 0x7e7   :  { %1748 = vmatprep.mubr.bf16.mxu0 %v5377_v5 }
 0x7e8   :  { %2029 = vmatpush1.bf16.msra.mxu0 %v4884_v56  ;;  %3600 = vmatpush3.bf16.msra.mxu1 %v4922_v8 }
 0x7e9   :  { %2030 = vmatprep.subr.bf16.mxu0 %v4888_v57  ;;  %3601 = vmatprep.subr.bf16.mxu1 %v5376_v1 }
 0x7ec   :  { %2031 = vmatpush1.bf16.msra.mxu0 %v4890_v58  ;;  %3602 = vmatpush3.bf16.msra.mxu1 %v4926_v61 }
 0x7ed   :  { %2032 = vmatprep.subr.bf16.mxu0 %v4894_v59  ;;  %3603 = vmatprep.subr.bf16.mxu1 %v5376_v1 }
 0x7f0   :  { %2033 = vmatpush1.bf16.msra.mxu0 %v4898_v60  ;;  %3604 = vmatpush3.bf16.msra.mxu1 %v4930_v11 }
 0x7f1   :  { %2034 = vmatprep.subr.bf16.mxu0 %v4903_v36  ;;  %3605 = vmatprep.subr.bf16.mxu1 %v5376_v1 }
 0x7f4   :  { %2035 = vmatpush1.bf16.msra.mxu0 %v4906_v34  ;;  %3606 = vmatpush3.bf16.msra.mxu1 %v4934_v42 }
 0x7f5   :  { %2128 = vmatprep.subr.bf16.mxu0 %v4858_v37  ;;  %3611 = vmatprep.subr.bf16.mxu1 %v5376_v1 }
 0x889   :  { %v1424_v30 = vpop.f32.mrb[28].mxu0  ;;  %v1465_v12 = vpop.f32.mrb[52].mxu1 }
 0x88a   :  { %v1471_v62 = vadd.f32 %v1424_v30, %v4523_v19  ;;  %v1426_v63 = vpop.f32.mrb[29].mxu0  ;;  %v3565_v15 = vpop.f32.mrb[53].mxu1  ;;  %v4101_v19 = vld [vmem:[%s5360_s4] ss:$0 sm:$0xff] }
 0x88b   :  { %v1478_v21 = vadd.f32 %v1426_v63, %v5378_v44  ;;  %v1428_v22 = vpop.f32.mrb[30].mxu0  ;;  %v1468_v25 = vpop.f32.mrb[54].mxu1  ;;  %v1485_v27 = vadd.f32 %v4101_v19, %v1465_v12 }
 0x88c   :  { %v3125_v31 = vmul.f32 -1.442695, %v1471_v62  ;;  %v1429_v28 = vpop.f32.mrb[31].mxu0  ;;  %v3566_v13 = vpop.f32.mrb[55].mxu1 }
 0x88d   :  { %v3126_v14 = vmul.f32 -1.442695, %v1478_v21 }
 0x88e   :  { %3995 = vpow2.f32 %v3125_v31 }
 0x88f   :  { %3997 = vpow2.f32 %v3126_v14 }
 0x898   :  { %v3996_v40 = vpop.eup %3995 }
 0x899   :  { %v1475_v48 = vadd.f32 1.0, %v3996_v40  ;;  %v3998_v17 = vpop.eup %3997 }
 0x89a   :  { %v1482_v35 = vadd.f32 1.0, %v3998_v17  ;;  %v5385_v17 = vld [vmem:[#allocation17_spill] sm:$0xff] }
 0x89b   :  { %3999 = vrcp.f32 %v1475_v48 }
 0x89c   :  { %4001 = vrcp.f32 %v1482_v35  ;;  %v5386_v35 = vsub.s32 0, %v5385_v17 }
 0x8a5   :  { %v4000_v46 = vpop.eup %3999 }
 0x8a6   :  { %v1486_v54 = vmul.f32 %v4000_v46, %v1485_v27  ;;  %v4002_v49 = vpop.eup %4001 }
 0x8a7   :  { %v1489_v47 = vsub.f32 1.0, %v4002_v49  ;;  %v1491_v62 = vmul.f32 %v4002_v49, %v4843_v50 }
 0x8a8   :  { %v1487_v2 = vadd.f32 %v1486_v54, %v5379_v52  ;;  %v5388_v54 = vsub.s32 1, %v5385_v17 }
 0x8a9   :  { %v4945_v6 = vpop.f32.mrb[32].mxu0  ;;  %v4947_v10 = vpop.f32.mrb[56].mxu1 }
 0x8aa   :  { %4003 = vtanh.f32 %v1487_v2  ;;  %v4949_v32 = vpop.f32.mrb[33].mxu0  ;;  %v4951_v3 = vpop.f32.mrb[57].mxu1 }
 0x8ab   :  { %v4953_v18 = vpop.f32.mrb[34].mxu0  ;;  %v4955_v41 = vpop.f32.mrb[58].mxu1 }
 0x8ac   :  { %v4957_v20 = vpop.f32.mrb[35].mxu0  ;;  %v4959_v43 = vpop.f32.mrb[59].mxu1 }
 0x8b1   :  { %v4961_v45 = vpop.f32.mrb[36].mxu0 }
 0x8b2   :  { %v4963_v51 = vpop.f32.mrb[37].mxu0 }
 0x8b3   :  { %v4965_v24 = vpop.f32.mrb[38].mxu0 }
 0x8b4   :  { %v4004_v33 = vpop.eup %4003  ;;  %v4967_v30 = vpop.f32.mrb[39].mxu0 }
 0x8b5   :  { %v1490_v12 = vmul.f32 %v4004_v33, %v1489_v47 }
 0x8b7   :  { %v1492_v63 = vadd.f32 %v1491_v62, %v1490_v12 }
 0x8b9   :  { %v4970_v15 = vpop.f32.mrb[40].mxu0  ;;  %v1506_v44 = vpack.c.bf16 %v1492_v63, %v4843_v50  ;;  %v3127_v50 = vld [vmem:[%s5359_s3 + $0x3] sm:$0x7] }
 0x8ba   :  { %v4973_v21 = vpop.f32.mrb[41].mxu0  ;;  %v5036_v19 = vrot.slane %v3127_v50, %v5386_v35  ;;  %v5044_v52 = vrot.slane %v3127_v50, %v5388_v54 }
 0x8bb   :  { %v4975_v22 = vpop.f32.mrb[42].mxu0  ;;  %1749 = vmatmul.mubr.bf16.gmra.mrb[44].mxu0 %v1506_v44  ;;  %3588 = vmatmul.mubr.bf16.gmra.mrb[60].mxu1 %v1506_v44 }
 0x8bc   :  { %v4977_v25 = vpop.f32.mrb[43].mxu0  ;;  %2052 = vmatprep.mubr.bf16.mxu0 %v5377_v5  ;;  %3607 = vmatprep.mubr.msk.bf16.mxu1 %vm4255_vm0, %v5376_v1  ;;  %v1721_v2 = vadd.f32 %v4945_v6, %v5036_v19  ;;  %v1723_v49 = vadd.f32 %v4949_v32, %v5044_v52  ;;  %v5053_v32 = vld [vmem:[%s5360_s4 + $0x1] ss:$0 sm:$0xff] }
 0x8c3   :  { %2053 = vmatmul.mubr.bf16.vlgmr.msra.gmra.mrb[48].mxu0 %v5377_v5  ;;  %3608 = vmatmul.mubr.bf16.vlgmr.msra.gmra.mrb[64].mxu1 %v5377_v5 }
 0x8c4   :  { %2129 = vmatpush1.bf16.msra.mxu0 %v4860_v38  ;;  %3612 = vmatpush3.bf16.msra.mxu1 %v4896_v16 }
 0x8c5   :  { %2130 = vmatprep.subr.bf16.mxu0 %v4864_v29  ;;  %3613 = vmatprep.subr.bf16.mxu1 %v5376_v1 }
 0x8c6   :  { %2160 = vmatprep.mubr.bf16.mxu0 %v5377_v5  ;;  %3627 = vmatprep.mubr.msk.bf16.mxu1 %vm4255_vm0, %v5376_v1 }
 0x8c8   :  { %2131 = vmatpush1.bf16.msra.mxu0 %v4866_v23  ;;  %3614 = vmatpush3.bf16.msra.mxu1 %v4908_v9 }
 0x8c9   :  { %2132 = vmatprep.subr.bf16.mxu0 %v4870_v26  ;;  %3615 = vmatprep.subr.bf16.mxu1 %v5376_v1 }
 0x8cc   :  { %2133 = vmatpush1.bf16.msra.mxu0 %v4872_v39  ;;  %3616 = vmatpush3.bf16.msra.mxu1 %v4914_v4 }
 0x8cd   :  { %2134 = vmatprep.subr.bf16.mxu0 %v4876_v0  ;;  %3617 = vmatprep.subr.bf16.mxu1 %v5376_v1 }
 0x8d0   :  { %2135 = vmatpush1.bf16.msra.mxu0 %v4878_v53  ;;  %3618 = vmatpush3.bf16.msra.mxu1 %v4918_v7 }
 0x8d1   :  { %2136 = vmatprep.subr.bf16.mxu0 %v4882_v55  ;;  %3619 = vmatprep.subr.bf16.mxu1 %v5376_v1 }
 0x8d4   :  { %2137 = vmatpush1.bf16.msra.mxu0 %v4884_v56  ;;  %3620 = vmatpush3.bf16.msra.mxu1 %v4922_v8 }
 0x8d5   :  { %2138 = vmatprep.subr.bf16.mxu0 %v4888_v57  ;;  %3621 = vmatprep.subr.bf16.mxu1 %v5376_v1 }
 0x8d8   :  { %2139 = vmatpush1.bf16.msra.mxu0 %v4890_v58  ;;  %3622 = vmatpush3.bf16.msra.mxu1 %v4926_v61 }
 0x8d9   :  { %2140 = vmatprep.subr.bf16.mxu0 %v4894_v59  ;;  %3623 = vmatprep.subr.bf16.mxu1 %v5376_v1 }
 0x8dc   :  { %2141 = vmatpush1.bf16.msra.mxu0 %v4898_v60  ;;  %3624 = vmatpush3.bf16.msra.mxu1 %v4930_v11 }
 0x8dd   :  { %2142 = vmatprep.subr.bf16.mxu0 %v4903_v36  ;;  %3625 = vmatprep.subr.bf16.mxu1 %v5376_v1 }
 0x8e0   :  { %2143 = vmatpush1.bf16.msra.mxu0 %v4906_v34  ;;  %3626 = vmatpush3.bf16.msra.mxu1 %v4934_v42 }
 0x8e1   :  { %2236 = vmatprep.subr.bf16.mxu0 %v4858_v37  ;;  %3631 = vmatprep.subr.bf16.mxu1 %v5376_v1 }
 0x98e   :  { %v5022_v31 = vpop.f32.mrb[44].mxu0  ;;  %v5024_v28 = vpop.f32.mrb[60].mxu1 }
 0x98f   :  { %5380 = vst [vmem:[#allocation18_spill] sm:$0xff] %v5022_v31  ;;  %5381 = vst [vmem:[#allocation19_spill] sm:$0xff] %v5024_v28  ;;  %v5026_v13 = vpop.f32.mrb[45].mxu0  ;;  %v5028_v14 = vpop.f32.mrb[61].mxu1 }
 0x990   :  { %5382 = vst [vmem:[#allocation20_spill] sm:$0xff] %v5026_v13  ;;  %v5030_v40 = vpop.f32.mrb[46].mxu0  ;;  %v5032_v48 = vpop.f32.mrb[62].mxu1 }
 0x991   :  { %5383 = vst [vmem:[#allocation21_spill] sm:$0xff] %v5030_v40  ;;  %5384 = vst [vmem:[#allocation22_spill] sm:$0xff] %v5032_v48  ;;  %v5038_v27 = vpop.f32.mrb[47].mxu0  ;;  %v5040_v46 = vpop.f32.mrb[63].mxu1 }
 0x992   :  { %5387 = vst [vmem:[#allocation17_spill] sm:$0xff] %v5038_v27 }
 0x996   :  { %v2054_v47 = vpop.f32.mrb[48].mxu0  ;;  %v2095_v33 = vpop.f32.mrb[64].mxu1 }
 0x997   :  { %v2101_v12 = vadd.f32 %v2054_v47, %v1721_v2  ;;  %v2056_v62 = vpop.f32.mrb[49].mxu0  ;;  %v3609_v63 = vpop.f32.mrb[65].mxu1  ;;  %v5389_v2 = vsub.s32 2, %v5385_v17  ;;  %v1727_v17 = vadd.f32 %v4957_v20, %v5044_v52 }
 0x998   :  { %v2108_v44 = vadd.f32 %v2056_v62, %v1723_v49  ;;  %v2058_v35 = vpop.f32.mrb[50].mxu0  ;;  %v2098_v48 = vpop.f32.mrb[66].mxu1 }
 0x999   :  { %v3178_v27 = vmul.f32 -1.442695, %v2101_v12  ;;  %v2059_v40 = vpop.f32.mrb[51].mxu0  ;;  %v3610_v28 = vpop.f32.mrb[67].mxu1  ;;  %v5057_v49 = vrot.slane %v3127_v50, %v5389_v2 }
 0x99a   :  { %v3179_v54 = vmul.f32 -1.442695, %v2108_v44  ;;  %v2115_v40 = vadd.f32 %v5053_v32, %v2095_v33 }
 0x99b   :  { %4005 = vpow2.f32 %v3178_v27  ;;  %v1794_v27 = vadd.f32 %v4951_v3, %v5057_v49  ;;  %v1725_v3 = vadd.f32 %v4953_v18, %v5036_v19 }
 0x99c   :  { %4007 = vpow2.f32 %v3179_v54 }
 0x9a5   :  { %v4006_v13 = vpop.eup %4005 }
 0x9a6   :  { %v2105_v31 = vadd.f32 1.0, %v4006_v13  ;;  %v4008_v6 = vpop.eup %4007 }
 0x9a7   :  { %v2112_v48 = vadd.f32 1.0, %v4008_v6 }
 0x9a8   :  { %4009 = vrcp.f32 %v2105_v31 }
 0x9a9   :  { %4011 = vrcp.f32 %v2112_v48 }
 0x9b2   :  { %v4010_v28 = vpop.eup %4009 }
 0x9b3   :  { %v2116_v13 = vmul.f32 %v4010_v28, %v2115_v40  ;;  %v4012_v47 = vpop.eup %4011 }
 0x9b4   :  { %v2119_v12 = vsub.f32 1.0, %v4012_v47  ;;  %v2121_v44 = vmul.f32 0.0, %v4012_v47 }
 0x9b5   :  { %v2117_v31 = vadd.f32 %v2116_v13, %v1794_v27 }
 0x9b7   :  { %4013 = vtanh.f32 %v2117_v31 }
 0x9c1   :  { %v4014_v62 = vpop.eup %4013 }
 0x9c2   :  { %v2120_v63 = vmul.f32 %v4014_v62, %v2119_v12 }
 0x9c4   :  { %v5062_v35 = vadd.f32 %v2121_v44, %v2120_v63 }
 0x9c6   :  { %v2127_v50 = vpack.c.bf16 %v5062_v35, %v5062_v35 }
 0x9c8   :  { %2161 = vmatmul.mubr.bf16.vlgmr.msra.gmra.mrb[52].mxu0 %v2127_v50  ;;  %3628 = vmatmul.mubr.bf16.vlgmr.msra.gmra.mrb[68].mxu1 %v2127_v50 }
 0x9c9   :  { %2237 = vmatpush1.bf16.msra.mxu0 %v4860_v38  ;;  %3632 = vmatpush3.bf16.msra.mxu1 %v4896_v16 }
 0x9ca   :  { %2238 = vmatprep.subr.bf16.mxu0 %v4864_v29  ;;  %3633 = vmatprep.subr.bf16.mxu1 %v5376_v1 }
 0x9cb   :  { %2268 = vmatprep.mubr.bf16.mxu0 %v5377_v5  ;;  %3647 = vmatprep.mubr.msk.bf16.mxu1 %vm4255_vm0, %v5376_v1 }
 0x9cd   :  { %2239 = vmatpush1.bf16.msra.mxu0 %v4866_v23  ;;  %3634 = vmatpush3.bf16.msra.mxu1 %v4908_v9 }
 0x9ce   :  { %2240 = vmatprep.subr.bf16.mxu0 %v4870_v26  ;;  %3635 = vmatprep.subr.bf16.mxu1 %v5376_v1 }
 0x9d1   :  { %2241 = vmatpush1.bf16.msra.mxu0 %v4872_v39  ;;  %3636 = vmatpush3.bf16.msra.mxu1 %v4914_v4 }
 0x9d2   :  { %2242 = vmatprep.subr.bf16.mxu0 %v4876_v0  ;;  %3637 = vmatprep.subr.bf16.mxu1 %v5376_v1 }
 0x9d5   :  { %2243 = vmatpush1.bf16.msra.mxu0 %v4878_v53  ;;  %3638 = vmatpush3.bf16.msra.mxu1 %v4918_v7 }
 0x9d6   :  { %2244 = vmatprep.subr.bf16.mxu0 %v4882_v55  ;;  %3639 = vmatprep.subr.bf16.mxu1 %v5376_v1 }
 0x9d9   :  { %2245 = vmatpush1.bf16.msra.mxu0 %v4884_v56  ;;  %3640 = vmatpush3.bf16.msra.mxu1 %v4922_v8 }
 0x9da   :  { %2246 = vmatprep.subr.bf16.mxu0 %v4888_v57  ;;  %3641 = vmatprep.subr.bf16.mxu1 %v5376_v1 }
 0x9dd   :  { %2247 = vmatpush1.bf16.msra.mxu0 %v4890_v58  ;;  %3642 = vmatpush3.bf16.msra.mxu1 %v4926_v61 }
 0x9de   :  { %2248 = vmatprep.subr.bf16.mxu0 %v4894_v59  ;;  %3643 = vmatprep.subr.bf16.mxu1 %v5376_v1 }
 0x9e1   :  { %2249 = vmatpush1.bf16.msra.mxu0 %v4898_v60  ;;  %3644 = vmatpush3.bf16.msra.mxu1 %v4930_v11 }
 0x9e2   :  { %2250 = vmatprep.subr.bf16.mxu0 %v4903_v36  ;;  %3645 = vmatprep.subr.bf16.mxu1 %v5376_v1 }
 0x9e5   :  { %2251 = vmatpush1.bf16.msra.mxu0 %v4906_v34  ;;  %3646 = vmatpush3.bf16.msra.mxu1 %v4934_v42 }
 0x9e6   :  { %2344 = vmatprep.subr.bf16.mxu0 %v4858_v37  ;;  %3651 = vmatprep.subr.bf16.mxu1 %v5376_v1 }
 0xa9b   :  { %v2162_v33 = vpop.f32.mrb[52].mxu0  ;;  %v2203_v54 = vpop.f32.mrb[68].mxu1 }
 0xa9c   :  { %v2209_v6 = vadd.f32 %v2162_v33, %v1725_v3  ;;  %v2164_v2 = vpop.f32.mrb[53].mxu0  ;;  %v3629_v48 = vpop.f32.mrb[69].mxu1  ;;  %v2223_v20 = vadd.f32 %v5053_v32, %v2203_v54  ;;  %v1797_v3 = vadd.f32 %v4959_v43, %v5057_v49  ;;  %v1731_v43 = vadd.f32 %v4961_v45, %v5036_v19 }
 0xa9d   :  { %v2216_v40 = vadd.f32 %v2164_v2, %v1727_v17  ;;  %v2166_v28 = vpop.f32.mrb[54].mxu0  ;;  %v2206_v27 = vpop.f32.mrb[70].mxu1  ;;  %v1733_v54 = vadd.f32 %v4963_v51, %v5044_v52 }
 0xa9e   :  { %v3180_v13 = vmul.f32 -1.442695, %v2209_v6  ;;  %v2167_v31 = vpop.f32.mrb[55].mxu0  ;;  %v3630_v47 = vpop.f32.mrb[71].mxu1 }
 0xa9f   :  { %v3181_v12 = vmul.f32 -1.442695, %v2216_v40 }
 0xaa0   :  { %4015 = vpow2.f32 %v3180_v13 }
 0xaa1   :  { %4017 = vpow2.f32 %v3181_v12 }
 0xaaa   :  { %v4016_v62 = vpop.eup %4015 }
 0xaab   :  { %v2213_v63 = vadd.f32 1.0, %v4016_v62  ;;  %v4018_v18 = vpop.eup %4017 }
 0xaac   :  { %v2220_v44 = vadd.f32 1.0, %v4018_v18 }
 0xaad   :  { %4019 = vrcp.f32 %v2213_v63 }
 0xaae   :  { %4021 = vrcp.f32 %v2220_v44 }
 0xab7   :  { %v4020_v50 = vpop.eup %4019 }
 0xab8   :  { %v2224_v17 = vmul.f32 %v4020_v50, %v2223_v20  ;;  %v4022_v6 = vpop.eup %4021 }
 0xab9   :  { %v2227_v2 = vsub.f32 1.0, %v4022_v6  ;;  %v2229_v28 = vmul.f32 %v4022_v6, %v5062_v35 }
 0xaba   :  { %v2225_v33 = vadd.f32 %v2224_v17, %v1797_v3 }
 0xabc   :  { %4023 = vtanh.f32 %v2225_v33 }
 0xac6   :  { %v4024_v48 = vpop.eup %4023 }
 0xac7   :  { %v2228_v40 = vmul.f32 %v4024_v48, %v2227_v2 }
 0xac9   :  { %v5109_v27 = vadd.f32 %v2229_v28, %v2228_v40  ;;  %v1802_v28 = vadd.f32 %v4947_v10, %v5057_v49  ;;  %v1735_v10 = vadd.f32 %v4965_v24, %v5036_v19 }
 0xacb   :  { %v2235_v13 = vpack.c.bf16 %v5109_v27, %v5109_v27 }
 0xacd   :  { %2269 = vmatmul.mubr.bf16.vlgmr.msra.gmra.mrb[56].mxu0 %v2235_v13  ;;  %3648 = vmatmul.mubr.bf16.vlgmr.msra.gmra.mrb[72].mxu1 %v2235_v13 }
 0xace   :  { %2345 = vmatpush1.bf16.msra.mxu0 %v4860_v38  ;;  %3652 = vmatpush3.bf16.msra.mxu1 %v4896_v16 }
 0xacf   :  { %2346 = vmatprep.subr.bf16.mxu0 %v4864_v29  ;;  %3653 = vmatprep.subr.bf16.mxu1 %v5376_v1 }
 0xad0   :  { %2376 = vmatprep.mubr.bf16.mxu0 %v5377_v5  ;;  %3667 = vmatprep.mubr.msk.bf16.mxu1 %vm4255_vm0, %v5376_v1 }
 0xad2   :  { %2347 = vmatpush1.bf16.msra.mxu0 %v4866_v23  ;;  %3654 = vmatpush3.bf16.msra.mxu1 %v4908_v9 }
 0xad3   :  { %2348 = vmatprep.subr.bf16.mxu0 %v4870_v26  ;;  %3655 = vmatprep.subr.bf16.mxu1 %v5376_v1 }
 0xad6   :  { %2349 = vmatpush1.bf16.msra.mxu0 %v4872_v39  ;;  %3656 = vmatpush3.bf16.msra.mxu1 %v4914_v4 }
 0xad7   :  { %2350 = vmatprep.subr.bf16.mxu0 %v4876_v0  ;;  %3657 = vmatprep.subr.bf16.mxu1 %v5376_v1 }
 0xada   :  { %2351 = vmatpush1.bf16.msra.mxu0 %v4878_v53  ;;  %3658 = vmatpush3.bf16.msra.mxu1 %v4918_v7 }
 0xadb   :  { %2352 = vmatprep.subr.bf16.mxu0 %v4882_v55  ;;  %3659 = vmatprep.subr.bf16.mxu1 %v5376_v1 }
 0xade   :  { %2353 = vmatpush1.bf16.msra.mxu0 %v4884_v56  ;;  %3660 = vmatpush3.bf16.msra.mxu1 %v4922_v8 }
 0xadf   :  { %2354 = vmatprep.subr.bf16.mxu0 %v4888_v57  ;;  %3661 = vmatprep.subr.bf16.mxu1 %v5376_v1 }
 0xae2   :  { %2355 = vmatpush1.bf16.msra.mxu0 %v4890_v58  ;;  %3662 = vmatpush3.bf16.msra.mxu1 %v4926_v61 }
 0xae3   :  { %2356 = vmatprep.subr.bf16.mxu0 %v4894_v59  ;;  %3663 = vmatprep.subr.bf16.mxu1 %v5376_v1 }
 0xae6   :  { %2357 = vmatpush1.bf16.msra.mxu0 %v4898_v60  ;;  %3664 = vmatpush3.bf16.msra.mxu1 %v4930_v11 }
 0xae7   :  { %2358 = vmatprep.subr.bf16.mxu0 %v4903_v36  ;;  %3665 = vmatprep.subr.bf16.mxu1 %v5376_v1 }
 0xaea   :  { %2359 = vmatpush1.bf16.msra.mxu0 %v4906_v34  ;;  %3666 = vmatpush3.bf16.msra.mxu1 %v4934_v42 }
 0xaeb   :  { %2452 = vmatprep.subr.bf16.mxu0 %v4858_v37  ;;  %3671 = vmatprep.subr.bf16.mxu1 %v5376_v1 }
 0xba0   :  { %v2270_v31 = vpop.f32.mrb[56].mxu0  ;;  %v2311_v47 = vpop.f32.mrb[72].mxu1 }
 0xba1   :  { %v2317_v12 = vadd.f32 %v2270_v31, %v1731_v43  ;;  %v2272_v62 = vpop.f32.mrb[57].mxu0  ;;  %v3649_v63 = vpop.f32.mrb[73].mxu1  ;;  %v2331_v51 = vadd.f32 %v5053_v32, %v2311_v47  ;;  %v1737_v47 = vadd.f32 %v4967_v30, %v5044_v52 }
 0xba2   :  { %v2324_v18 = vadd.f32 %v2272_v62, %v1733_v54  ;;  %v2274_v44 = vpop.f32.mrb[58].mxu0  ;;  %v2314_v20 = vpop.f32.mrb[74].mxu1 }
 0xba3   :  { %v3182_v50 = vmul.f32 -1.442695, %v2317_v12  ;;  %v2275_v3 = vpop.f32.mrb[59].mxu0  ;;  %v3650_v17 = vpop.f32.mrb[75].mxu1 }
 0xba4   :  { %v3183_v33 = vmul.f32 -1.442695, %v2324_v18 }
 0xba5   :  { %4025 = vpow2.f32 %v3182_v50 }
 0xba6   :  { %4027 = vpow2.f32 %v3183_v33 }
 0xbaf   :  { %v4026_v6 = vpop.eup %4025 }
 0xbb0   :  { %v2321_v2 = vadd.f32 1.0, %v4026_v6  ;;  %v4028_v45 = vpop.eup %4027 }
 0xbb1   :  { %v2328_v48 = vadd.f32 1.0, %v4028_v45 }
 0xbb2   :  { %4029 = vrcp.f32 %v2321_v2 }
 0xbb3   :  { %4031 = vrcp.f32 %v2328_v48 }
 0xbbc   :  { %v4030_v40 = vpop.eup %4029 }
 0xbbd   :  { %v2332_v13 = vmul.f32 %v4030_v40, %v2331_v51  ;;  %v4032_v54 = vpop.eup %4031 }
 0xbbe   :  { %v2335_v31 = vsub.f32 1.0, %v4032_v54  ;;  %v2337_v63 = vmul.f32 %v4032_v54, %v5109_v27 }
 0xbbf   :  { %v2333_v43 = vadd.f32 %v2332_v13, %v1802_v28 }
 0xbc1   :  { %4033 = vtanh.f32 %v2333_v43 }
 0xbcb   :  { %v4034_v12 = vpop.eup %4033 }
 0xbcc   :  { %v2336_v62 = vmul.f32 %v4034_v12, %v2335_v31  ;;  %v1805_v12 = vadd.f32 %v4955_v41, %v5057_v49  ;;  %v1741_v41 = vadd.f32 %v4970_v15, %v5036_v19 }
 0xbce   :  { %v5156_v18 = vadd.f32 %v2337_v63, %v2336_v62 }
 0xbd0   :  { %v2343_v44 = vpack.c.bf16 %v5156_v18, %v5156_v18 }
 0xbd2   :  { %2377 = vmatmul.mubr.bf16.vlgmr.msra.gmra.mrb[60].mxu0 %v2343_v44  ;;  %3668 = vmatmul.mubr.bf16.vlgmr.msra.gmra.mrb[76].mxu1 %v2343_v44 }
 0xbd3   :  { %2453 = vmatpush1.bf16.msra.mxu0 %v4860_v38  ;;  %3672 = vmatpush3.bf16.msra.mxu1 %v4896_v16 }
 0xbd4   :  { %2454 = vmatprep.subr.bf16.mxu0 %v4864_v29  ;;  %3673 = vmatprep.subr.bf16.mxu1 %v5376_v1 }
 0xbd5   :  { %2484 = vmatprep.mubr.bf16.mxu0 %v5377_v5  ;;  %3687 = vmatprep.mubr.msk.bf16.mxu1 %vm4255_vm0, %v5376_v1 }
 0xbd7   :  { %2455 = vmatpush1.bf16.msra.mxu0 %v4866_v23  ;;  %3674 = vmatpush3.bf16.msra.mxu1 %v4908_v9 }
 0xbd8   :  { %2456 = vmatprep.subr.bf16.mxu0 %v4870_v26  ;;  %3675 = vmatprep.subr.bf16.mxu1 %v5376_v1 }
 0xbdb   :  { %2457 = vmatpush1.bf16.msra.mxu0 %v4872_v39  ;;  %3676 = vmatpush3.bf16.msra.mxu1 %v4914_v4 }
 0xbdc   :  { %2458 = vmatprep.subr.bf16.mxu0 %v4876_v0  ;;  %3677 = vmatprep.subr.bf16.mxu1 %v5376_v1 }
 0xbdf   :  { %2459 = vmatpush1.bf16.msra.mxu0 %v4878_v53  ;;  %3678 = vmatpush3.bf16.msra.mxu1 %v4918_v7 }
 0xbe0   :  { %2460 = vmatprep.subr.bf16.mxu0 %v4882_v55  ;;  %3679 = vmatprep.subr.bf16.mxu1 %v5376_v1 }
 0xbe3   :  { %2461 = vmatpush1.bf16.msra.mxu0 %v4884_v56  ;;  %3680 = vmatpush3.bf16.msra.mxu1 %v4922_v8 }
 0xbe4   :  { %2462 = vmatprep.subr.bf16.mxu0 %v4888_v57  ;;  %3681 = vmatprep.subr.bf16.mxu1 %v5376_v1 }
 0xbe7   :  { %2463 = vmatpush1.bf16.msra.mxu0 %v4890_v58  ;;  %3682 = vmatpush3.bf16.msra.mxu1 %v4926_v61 }
 0xbe8   :  { %2464 = vmatprep.subr.bf16.mxu0 %v4894_v59  ;;  %3683 = vmatprep.subr.bf16.mxu1 %v5376_v1 }
 0xbeb   :  { %2465 = vmatpush1.bf16.msra.mxu0 %v4898_v60  ;;  %3684 = vmatpush3.bf16.msra.mxu1 %v4930_v11 }
 0xbec   :  { %2466 = vmatprep.subr.bf16.mxu0 %v4903_v36  ;;  %3685 = vmatprep.subr.bf16.mxu1 %v5376_v1 }
 0xbef   :  { %2467 = vmatpush1.bf16.msra.mxu0 %v4906_v34  ;;  %3686 = vmatpush3.bf16.msra.mxu1 %v4934_v42 }
 0xbf0   :  { %2560 = vmatprep.subr.bf16.mxu0 %v4858_v37  ;;  %3691 = vmatprep.subr.bf16.mxu1 %v5376_v1 }
 0xca5   :  { %v2378_v20 = vpop.f32.mrb[60].mxu0  ;;  %v2419_v50 = vpop.f32.mrb[76].mxu1 }
 0xca6   :  { %v2425_v3 = vadd.f32 %v2378_v20, %v1735_v10  ;;  %v2380_v17 = vpop.f32.mrb[61].mxu0  ;;  %v3669_v33 = vpop.f32.mrb[77].mxu1  ;;  %v2439_v30 = vadd.f32 %v5053_v32, %v2419_v50  ;;  %v1743_v50 = vadd.f32 %v4973_v21, %v5044_v52 }
 0xca7   :  { %v2432_v6 = vadd.f32 %v2380_v17, %v1737_v47  ;;  %v2382_v2 = vpop.f32.mrb[62].mxu0  ;;  %v2422_v45 = vpop.f32.mrb[78].mxu1 }
 0xca8   :  { %v3184_v48 = vmul.f32 -1.442695, %v2425_v3  ;;  %v2383_v51 = vpop.f32.mrb[63].mxu0  ;;  %v3670_v40 = vpop.f32.mrb[79].mxu1 }
 0xca9   :  { %v3185_v28 = vmul.f32 -1.442695, %v2432_v6 }
 0xcaa   :  { %4035 = vpow2.f32 %v3184_v48 }
 0xcab   :  { %4037 = vpow2.f32 %v3185_v28 }
 0xcb4   :  { %v4036_v13 = vpop.eup %4035 }
 0xcb5   :  { %v2429_v43 = vadd.f32 1.0, %v4036_v13  ;;  %v4038_v24 = vpop.eup %4037 }
 0xcb6   :  { %v2436_v54 = vadd.f32 1.0, %v4038_v24 }
 0xcb7   :  { %4039 = vrcp.f32 %v2429_v43 }
 0xcb8   :  { %4041 = vrcp.f32 %v2436_v54 }
 0xcc1   :  { %v4040_v31 = vpop.eup %4039 }
 0xcc2   :  { %v2440_v62 = vmul.f32 %v4040_v31, %v2439_v30  ;;  %v4042_v44 = vpop.eup %4041 }
 0xcc3   :  { %v2443_v10 = vsub.f32 1.0, %v4042_v44  ;;  %v2445_v3 = vmul.f32 %v4042_v44, %v5156_v18  ;;  %v1810_v44 = vadd.f32 %v5028_v14, %v5057_v49 }
 0xcc4   :  { %v2441_v63 = vadd.f32 %v2440_v62, %v1805_v12 }
 0xcc6   :  { %4043 = vtanh.f32 %v2441_v63 }
 0xcd0   :  { %v4044_v47 = vpop.eup %4043 }
 0xcd1   :  { %v2444_v20 = vmul.f32 %v4044_v47, %v2443_v10 }
 0xcd3   :  { %v5203_v17 = vadd.f32 %v2445_v3, %v2444_v20 }
 0xcd5   :  { %v2451_v33 = vpack.c.bf16 %v5203_v17, %v5203_v17 }
 0xcd7   :  { %2485 = vmatmul.mubr.bf16.vlgmr.msra.gmra.mrb[64].mxu0 %v2451_v33  ;;  %3688 = vmatmul.mubr.bf16.vlgmr.msra.gmra.mrb[80].mxu1 %v2451_v33 }
 0xcd8   :  { %2561 = vmatpush1.bf16.msra.mxu0 %v4860_v38  ;;  %3692 = vmatpush3.bf16.msra.mxu1 %v4896_v16 }
 0xcd9   :  { %2562 = vmatprep.subr.bf16.mxu0 %v4864_v29  ;;  %3693 = vmatprep.subr.bf16.mxu1 %v5376_v1 }
 0xcda   :  { %2592 = vmatprep.mubr.bf16.mxu0 %v5377_v5  ;;  %3707 = vmatprep.mubr.msk.bf16.mxu1 %vm4255_vm0, %v5376_v1 }
 0xcdc   :  { %2563 = vmatpush1.bf16.msra.mxu0 %v4866_v23  ;;  %3694 = vmatpush3.bf16.msra.mxu1 %v4908_v9 }
 0xcdd   :  { %2564 = vmatprep.subr.bf16.mxu0 %v4870_v26  ;;  %3695 = vmatprep.subr.bf16.mxu1 %v5376_v1 }
 0xce0   :  { %2565 = vmatpush1.bf16.msra.mxu0 %v4872_v39  ;;  %3696 = vmatpush3.bf16.msra.mxu1 %v4914_v4 }
 0xce1   :  { %2566 = vmatprep.subr.bf16.mxu0 %v4876_v0  ;;  %3697 = vmatprep.subr.bf16.mxu1 %v5376_v1 }
 0xce4   :  { %2567 = vmatpush1.bf16.msra.mxu0 %v4878_v53  ;;  %3698 = vmatpush3.bf16.msra.mxu1 %v4918_v7 }
 0xce5   :  { %2568 = vmatprep.subr.bf16.mxu0 %v4882_v55  ;;  %3699 = vmatprep.subr.bf16.mxu1 %v5376_v1 }
 0xce8   :  { %2569 = vmatpush1.bf16.msra.mxu0 %v4884_v56  ;;  %3700 = vmatpush3.bf16.msra.mxu1 %v4922_v8 }
 0xce9   :  { %2570 = vmatprep.subr.bf16.mxu0 %v4888_v57  ;;  %3701 = vmatprep.subr.bf16.mxu1 %v5376_v1 }
 0xcec   :  { %2571 = vmatpush1.bf16.msra.mxu0 %v4890_v58  ;;  %3702 = vmatpush3.bf16.msra.mxu1 %v4926_v61 }
 0xced   :  { %2572 = vmatprep.subr.bf16.mxu0 %v4894_v59  ;;  %3703 = vmatprep.subr.bf16.mxu1 %v5376_v1 }
 0xcf0   :  { %2573 = vmatpush1.bf16.msra.mxu0 %v4898_v60  ;;  %3704 = vmatpush3.bf16.msra.mxu1 %v4930_v11 }
 0xcf1   :  { %2574 = vmatprep.subr.bf16.mxu0 %v4903_v36  ;;  %3705 = vmatprep.subr.bf16.mxu1 %v5376_v1 }
 0xcf4   :  { %2575 = vmatpush1.bf16.msra.mxu0 %v4906_v34  ;;  %3706 = vmatpush3.bf16.msra.mxu1 %v4934_v42 }
 0xcf5   :  { %2668 = vmatprep.subr.bf16.mxu0 %v4858_v37  ;;  %3711 = vmatprep.subr.bf16.mxu1 %v5376_v1 }
 0xdaa   :  { %v2486_v6 = vpop.f32.mrb[64].mxu0  ;;  %v2527_v2 = vpop.f32.mrb[80].mxu1 }
 0xdab   :  { %v2533_v45 = vadd.f32 %v2486_v6, %v1741_v41  ;;  %v2488_v48 = vpop.f32.mrb[65].mxu0  ;;  %v3689_v51 = vpop.f32.mrb[81].mxu1  ;;  %v2547_v21 = vadd.f32 %v5053_v32, %v2527_v2 }
 0xdac   :  { %v2540_v40 = vadd.f32 %v2488_v48, %v1743_v50  ;;  %v2490_v28 = vpop.f32.mrb[66].mxu0  ;;  %v2530_v13 = vpop.f32.mrb[82].mxu1 }
 0xdad   :  { %v3186_v43 = vmul.f32 -1.442695, %v2533_v45  ;;  %v2491_v24 = vpop.f32.mrb[67].mxu0  ;;  %v3690_v54 = vpop.f32.mrb[83].mxu1  ;;  %v4104_v28 = vld [vmem:[#allocation9 + $0xdc] ss:$12 sps:$4 sm:$0xff]  }
 0xdae   :  { %v3187_v30 = vmul.f32 -1.442695, %v2540_v40  ;;  %v4102_v40 = vld [vmem:[#allocation9 + $0xc0] ss:$12 sps:$4 sm:$0xff]   ;;  %v4105_v13 = vld [vmem:[#allocation9 + $0xd8] ss:$12 sps:$4 sm:$0xff]  }
 0xdaf   :  { %4045 = vpow2.f32 %v3186_v43  ;;  %v4106_v43 = vld [vmem:[#allocation9 + $0xe0] ss:$12 sps:$4 sm:$0xff]   ;;  %v4108_v54 = vld [vmem:[#allocation9 + $0xf0] ss:$12 sps:$4 sm:$0xff]  }
 0xdb0   :  { %4047 = vpow2.f32 %v3187_v30  ;;  %v4107_v24 = vld [vmem:[#allocation9 + $0xf4] ss:$12 sps:$4 sm:$0xff]   ;;  %v4109_v30 = vld [vmem:[#allocation9 + $0xf8] ss:$12 sps:$4 sm:$0xff]  }
 0xdb9   :  { %v4046_v31 = vpop.eup %4045 }
 0xdba   :  { %v2537_v12 = vadd.f32 1.0, %v4046_v31  ;;  %v4048_v15 = vpop.eup %4047  ;;  %v4110_v31 = vld [vmem:[#allocation9 + $0x10c] ss:$12 sps:$4 sm:$0xff]  }
 0xdbb   :  { %v2544_v62 = vadd.f32 1.0, %v4048_v15  ;;  %v4113_v15 = vld [vmem:[#allocation9 + $0x124] ss:$12 sps:$4 sm:$0xff]  }
 0xdbc   :  { %4049 = vrcp.f32 %v2537_v12  ;;  %v4112_v12 = vld [vmem:[#allocation9 + $0x110] ss:$12 sps:$4 sm:$0xff]  }
 0xdbd   :  { %4051 = vrcp.f32 %v2544_v62  ;;  %v4114_v62 = vld [vmem:[#allocation9 + $0x120] ss:$12 sps:$4 sm:$0xff]  }
 0xdc6   :  { %v4050_v63 = vpop.eup %4049 }
 0xdc7   :  { %v2548_v10 = vmul.f32 %v4050_v63, %v2547_v21  ;;  %v4052_v20 = vpop.eup %4051  ;;  %v4115_v21 = vld [vmem:[#allocation9 + $0x128] ss:$12 sps:$4 sm:$0xff]  }
 0xdc8   :  { %v2551_v3 = vsub.f32 1.0, %v4052_v20  ;;  %v2553_v50 = vmul.f32 %v4052_v20, %v5203_v17  ;;  %v4116_v63 = vld [vmem:[#allocation9 + $0x13c] ss:$12 sps:$4 sm:$0xff]  }
 0xdc9   :  { %v2549_v47 = vadd.f32 %v2548_v10, %v1810_v44  ;;  %v4117_v44 = vld [vmem:[#allocation9 + $0x138] ss:$12 sps:$4 sm:$0xff]   ;;  %v4118_v10 = vld [vmem:[#allocation9 + $0x140] ss:$12 sps:$4 sm:$0xff]   ;;  %v4120_v20 = vld [vmem:[#allocation9 + $0x150] ss:$12 sps:$4 sm:$0xff]  }
 0xdcb   :  { %4053 = vtanh.f32 %v2549_v47  ;;  %v4119_v47 = vld [vmem:[#allocation9 + $0x154] ss:$12 sps:$4 sm:$0xff]  }
 0xdd5   :  { %v4054_v33 = vpop.eup %4053 }
 0xdd6   :  { %v2552_v41 = vmul.f32 %v4054_v33, %v2551_v3  ;;  %v4121_v3 = vld [vmem:[#allocation9 + $0x158] ss:$12 sps:$4 sm:$0xff]  }
 0xdd7   :  { %v4122_v33 = vld [vmem:[#allocation9 + $0x16c] ss:$12 sps:$4 sm:$0xff]  }
 0xdd8   :  { %v5250_v6 = vadd.f32 %v2553_v50, %v2552_v41  ;;  %v4123_v41 = vld [vmem:[#allocation9 + $0x168] ss:$12 sps:$4 sm:$0xff]   ;;  %v4124_v50 = vld [vmem:[#allocation9 + $0x170] ss:$12 sps:$4 sm:$0xff]  }
 0xdda   :  { %v2559_v45 = vpack.c.bf16 %v5250_v6, %v5250_v6 }
 0xddc   :  { %2593 = vmatmul.mubr.bf16.vlgmr.msra.gmra.mrb[68].mxu0 %v2559_v45  ;;  %3708 = vmatmul.mubr.bf16.vlgmr.msra.gmra.mrb[84].mxu1 %v2559_v45  ;;  %v3917_v45 = vld [vmem:[#allocation10] sm:$0xff]  }
 0xddd   :  { %2669 = vmatpush1.bf16.msra.mxu0 %v4860_v38  ;;  %3712 = vmatpush3.bf16.msra.mxu1 %v4896_v16  ;;  %v1745_v38 = vadd.f32 %v4975_v22, %v5036_v19 }
 0xdde   :  { %2670 = vmatprep.subr.bf16.mxu0 %v4864_v29  ;;  %3713 = vmatprep.subr.bf16.mxu1 %v5376_v1  ;;  %v1747_v29 = vadd.f32 %v4977_v25, %v5044_v52 }
 0xddf   :  { %2700 = vmatprep.mubr.bf16.mxu0 %v5377_v5  ;;  %3727 = vmatprep.mubr.msk.bf16.mxu1 %vm4255_vm0, %v5376_v1 }
 0xde1   :  { %2671 = vmatpush1.bf16.msra.mxu0 %v4866_v23  ;;  %3714 = vmatpush3.bf16.msra.mxu1 %v4908_v9 }
 0xde2   :  { %2672 = vmatprep.subr.bf16.mxu0 %v4870_v26  ;;  %3715 = vmatprep.subr.bf16.mxu1 %v5376_v1 }
 0xde5   :  { %2673 = vmatpush1.bf16.msra.mxu0 %v4872_v39  ;;  %3716 = vmatpush3.bf16.msra.mxu1 %v4914_v4 }
 0xde6   :  { %2674 = vmatprep.subr.bf16.mxu0 %v4876_v0  ;;  %3717 = vmatprep.subr.bf16.mxu1 %v5376_v1 }
 0xde9   :  { %2675 = vmatpush1.bf16.msra.mxu0 %v4878_v53  ;;  %3718 = vmatpush3.bf16.msra.mxu1 %v4918_v7 }
 0xdea   :  { %2676 = vmatprep.subr.bf16.mxu0 %v4882_v55  ;;  %3719 = vmatprep.subr.bf16.mxu1 %v5376_v1 }
 0xded   :  { %2677 = vmatpush1.bf16.msra.mxu0 %v4884_v56  ;;  %3720 = vmatpush3.bf16.msra.mxu1 %v4922_v8  ;;  %v1813_v8 = vadd.f32 %v5040_v46, %v5057_v49  ;;  %v4103_v46 = vld [vmem:[#allocation9 + $0xc8] ss:$12 sps:$4 sm:$0xff]  }
 0xdee   :  { %2678 = vmatprep.subr.bf16.mxu0 %v4888_v57  ;;  %3721 = vmatprep.subr.bf16.mxu1 %v5376_v1 }
 0xdf1   :  { %2679 = vmatpush1.bf16.msra.mxu0 %v4890_v58  ;;  %3722 = vmatpush3.bf16.msra.mxu1 %v4926_v61 }
 0xdf2   :  { %2680 = vmatprep.subr.bf16.mxu0 %v4894_v59  ;;  %3723 = vmatprep.subr.bf16.mxu1 %v5376_v1 }
 0xdf5   :  { %2681 = vmatpush1.bf16.msra.mxu0 %v4898_v60  ;;  %3724 = vmatpush3.bf16.msra.mxu1 %v4930_v11 }
 0xdf6   :  { %2682 = vmatprep.subr.bf16.mxu0 %v4903_v36  ;;  %3725 = vmatprep.subr.bf16.mxu1 %v5376_v1 }
 0xdf9   :  { %2683 = vmatpush1.bf16.msra.mxu0 %v4906_v34  ;;  %3726 = vmatpush3.bf16.msra.mxu1 %v4934_v42 }
 0xdfa   :  { %2776 = vmatprep.subr.bf16.mxu0 %v4858_v37  ;;  %3731 = vmatprep.subr.bf16.mxu1 %v5376_v1 }
 0xeaf   :  { %v2594_v23 = vpop.f32.mrb[68].mxu0  ;;  %v2635_v26 = vpop.f32.mrb[84].mxu1 }
 0xeb0   :  { %v2641_v39 = vadd.f32 %v2594_v23, %v1745_v38  ;;  %v2596_v0 = vpop.f32.mrb[69].mxu0  ;;  %v3709_v53 = vpop.f32.mrb[85].mxu1  ;;  %v2655_v4 = vadd.f32 %v5053_v32, %v2635_v26  ;;  %v5390_v38 = vld [vmem:[#allocation18_spill] sm:$0xff]  ;;  %v5391_v23 = vld [vmem:[#allocation20_spill] sm:$0xff] }
 0xeb1   :  { %v2648_v55 = vadd.f32 %v2596_v0, %v1747_v29  ;;  %v2598_v56 = vpop.f32.mrb[70].mxu0  ;;  %v2638_v57 = vpop.f32.mrb[86].mxu1  ;;  %v1751_v29 = vadd.f32 %v5390_v38, %v5036_v19  ;;  %v1753_v26 = vadd.f32 %v5391_v23, %v5044_v52 }
 0xeb2   :  { %v3188_v58 = vmul.f32 -1.442695, %v2641_v39  ;;  %v2599_v59 = vpop.f32.mrb[71].mxu0  ;;  %v3710_v16 = vpop.f32.mrb[87].mxu1 }
 0xeb3   :  { %v3189_v37 = vmul.f32 -1.442695, %v2648_v55 }
 0xeb4   :  { %4055 = vpow2.f32 %v3188_v58 }
 0xeb5   :  { %4057 = vpow2.f32 %v3189_v37 }
 0xebe   :  { %v4056_v60 = vpop.eup %4055 }
 0xebf   :  { %v2645_v36 = vadd.f32 1.0, %v4056_v60  ;;  %v4058_v34 = vpop.eup %4057 }
 0xec0   :  { %v2652_v9 = vadd.f32 1.0, %v4058_v34 }
 0xec1   :  { %4059 = vrcp.f32 %v2645_v36 }
 0xec2   :  { %4061 = vrcp.f32 %v2652_v9 }
 0xecb   :  { %v4060_v7 = vpop.eup %4059 }
 0xecc   :  { %v2656_v61 = vmul.f32 %v4060_v7, %v2655_v4  ;;  %v4062_v42 = vpop.eup %4061 }
 0xecd   :  { %v2659_v22 = vsub.f32 1.0, %v4062_v42  ;;  %v2661_v2 = vmul.f32 %v4062_v42, %v5250_v6 }
 0xece   :  { %v2657_v11 = vadd.f32 %v2656_v61, %v1813_v8  ;;  %v5392_v61 = vld [vmem:[#allocation19_spill] sm:$0xff] }
 0xed0   :  { %4063 = vtanh.f32 %v2657_v11  ;;  %v1818_v11 = vadd.f32 %v5392_v61, %v5057_v49 }
 0xeda   :  { %v4064_v25 = vpop.eup %4063 }
 0xedb   :  { %v2660_v14 = vmul.f32 %v4064_v25, %v2659_v22 }
 0xedd   :  { %v5297_v48 = vadd.f32 %v2661_v2, %v2660_v14 }
 0xedf   :  { %v2667_v51 = vpack.c.bf16 %v5297_v48, %v5297_v48 }
 0xee1   :  { %2701 = vmatmul.mubr.bf16.vlgmr.msra.gmra.mrb[72].mxu0 %v2667_v51  ;;  %3728 = vmatmul.mubr.bf16.vlgmr.msra.gmra.mrb[88].mxu1 %v2667_v51 }
 0xee2   :  { %2777 = vmatpush1.bf16.msra.mxu0 %v4102_v40  ;;  %3732 = vmatpush3.bf16.msra.mxu1 %v4103_v46 }
 0xee3   :  { %2778 = vmatprep.subr.bf16.mxu0 %v4104_v28  ;;  %3733 = vmatprep.subr.bf16.mxu1 %v5376_v1 }
 0xee4   :  { %2808 = vmatprep.mubr.bf16.mxu0 %v5377_v5  ;;  %3747 = vmatprep.mubr.msk.bf16.mxu1 %vm4255_vm0, %v5376_v1  ;;  %v4111_v5 = vld [vmem:[#allocation9 + $0x108] ss:$12 sps:$4 sm:$0xff]  }
 0xee6   :  { %2779 = vmatpush1.bf16.msra.mxu0 %v4105_v13  ;;  %3734 = vmatpush3.bf16.msra.mxu1 %v4106_v43  ;;  %v3918_v13 = vld [vmem:[#allocation10 + $0x8] sm:$0xff]   ;;  %v2888_v43 = vpack.c.bf16 %v5109_v27, %v5062_v35  ;;  %v3924_v35 = vld [vmem:[#allocation10 + $0x38] sm:$0xff]   ;;  %v2889_v27 = vpack.c.bf16 %v5203_v17, %v5156_v18 }
 0xee7   :  { %2780 = vmatprep.subr.bf16.mxu0 %v4107_v24  ;;  %3735 = vmatprep.subr.bf16.mxu1 %v5376_v1  ;;  %v3919_v24 = vld [vmem:[#allocation10 + $0x10] sm:$0xff]  }
 0xeea   :  { %2781 = vmatpush1.bf16.msra.mxu0 %v4108_v54  ;;  %3736 = vmatpush3.bf16.msra.mxu1 %v4109_v30  ;;  %v3920_v54 = vld [vmem:[#allocation10 + $0x18] sm:$0xff]   ;;  %v3921_v30 = vld [vmem:[#allocation10 + $0x20] sm:$0xff]  }
 0xeeb   :  { %2782 = vmatprep.subr.bf16.mxu0 %v4110_v31  ;;  %3737 = vmatprep.subr.bf16.mxu1 %v5376_v1  ;;  %v3922_v31 = vld [vmem:[#allocation10 + $0x28] sm:$0xff]  }
 0xeee   :  { %2783 = vmatpush1.bf16.msra.mxu0 %v4111_v5  ;;  %3738 = vmatpush3.bf16.msra.mxu1 %v4112_v12  ;;  %v3923_v5 = vld [vmem:[#allocation10 + $0x30] sm:$0xff]   ;;  %v2890_v12 = vpack.c.bf16 %v5297_v48, %v5250_v6 }
 0xeef   :  { %2784 = vmatprep.subr.bf16.mxu0 %v4113_v15  ;;  %3739 = vmatprep.subr.bf16.mxu1 %v5376_v1  ;;  %v5393_v15 = vld [vmem:[#allocation21_spill] sm:$0xff] }
 0xef2   :  { %2785 = vmatpush1.bf16.msra.mxu0 %v4114_v62  ;;  %3740 = vmatpush3.bf16.msra.mxu1 %v4115_v21  ;;  %v1755_v62 = vadd.f32 %v5393_v15, %v5036_v19  ;;  %v5394_v21 = vld [vmem:[#allocation17_spill] sm:$0xff] }
 0xef3   :  { %2786 = vmatprep.subr.bf16.mxu0 %v4116_v63  ;;  %3741 = vmatprep.subr.bf16.mxu1 %v5376_v1  ;;  %v1757_v63 = vadd.f32 %v5394_v21, %v5044_v52 }
 0xef6   :  { %2787 = vmatpush1.bf16.msra.mxu0 %v4117_v44  ;;  %3742 = vmatpush3.bf16.msra.mxu1 %v4118_v10 }
 0xef7   :  { %2788 = vmatprep.subr.bf16.mxu0 %v4119_v47  ;;  %3743 = vmatprep.subr.bf16.mxu1 %v5376_v1 }
 0xefa   :  { %2789 = vmatpush1.bf16.msra.mxu0 %v4120_v20  ;;  %3744 = vmatpush3.bf16.msra.mxu1 %v4121_v3 }
 0xefb   :  { %2790 = vmatprep.subr.bf16.mxu0 %v4122_v33  ;;  %3745 = vmatprep.subr.bf16.mxu1 %v5376_v1 }
 0xefe   :  { %2791 = vmatpush1.bf16.msra.mxu0 %v4123_v41  ;;  %3746 = vmatpush3.bf16.msra.mxu1 %v4124_v50 }
 0xeff   :  { %3751 = vmatprep.subr.bf16.mxu0 %v3917_v45 }
 0xfb4   :  { %v2702_v39 = vpop.f32.mrb[72].mxu0  ;;  %v2743_v0 = vpop.f32.mrb[88].mxu1 }
 0xfb5   :  { %v2749_v53 = vadd.f32 %v2702_v39, %v1751_v29  ;;  %v2704_v55 = vpop.f32.mrb[73].mxu0  ;;  %v3729_v56 = vpop.f32.mrb[89].mxu1  ;;  %v2763_v7 = vadd.f32 %v5053_v32, %v2743_v0 }
 0xfb6   :  { %v2756_v57 = vadd.f32 %v2704_v55, %v1753_v26  ;;  %v2706_v58 = vpop.f32.mrb[74].mxu0  ;;  %v2746_v1 = vpop.f32.mrb[90].mxu1  ;;  %v5395_v26 = vld [vmem:[#allocation22_spill] sm:$0xff] }
 0xfb7   :  { %v3190_v59 = vmul.f32 -1.442695, %v2749_v53  ;;  %v2707_v16 = vpop.f32.mrb[75].mxu0  ;;  %v3730_v37 = vpop.f32.mrb[91].mxu1  ;;  %v1821_v39 = vadd.f32 %v5395_v26, %v5057_v49  ;;  %v3194_v53 = vld [vmem:[%s5362_s6] ss:$0 sm:$0xff] }
 0xfb8   :  { %v3191_v60 = vmul.f32 -1.442695, %v2756_v57  ;;  %s4256_s6 = smov [#allocation12]  }
 0xfb9   :  { %4065 = vpow2.f32 %v3190_v59  ;;  %s3041_s0 = sshll.u32 %s4256_s6, 4  ;;  %s3042_s0 = int_to_ptr.vmem [resolvable:$true] %s3041_s0 }
 0xfba   :  { %4067 = vpow2.f32 %v3191_v60  ;;  %s4213_s16 = scalar_lea.vmem %s3042_s0, 1024  ;;  %p4218_p5 = scmp.lt.s32.totalorder %s3042_s0, %s3042_s0 }
 0xfbb   :  { %p4214_p4 = scmp.ne.s32.totalorder %s3042_s0, %s4213_s16  ;;  %p4219_p6 = scmp.lt.s32.totalorder %s4213_s16, %s4213_s16 }
 0xfbd   :  { %p4220_p7 = por %p4219_p6, %p4218_p5 }
 0xfbf   :  { %p4221_p8 = pnand %p4220_p7, %p4214_p4 }
 0xfc3   :  { %v4066_v36 = vpop.eup %4065 }
 0xfc4   :  { %v2753_v34 = vadd.f32 1.0, %v4066_v36  ;;  %v4068_v9 = vpop.eup %4067 }
 0xfc5   :  { %v2760_v4 = vadd.f32 1.0, %v4068_v9 }
 0xfc6   :  { %4069 = vrcp.f32 %v2753_v34 }
 0xfc7   :  { %4071 = vrcp.f32 %v2760_v4 }
 0xfd0   :  { %v4070_v8 = vpop.eup %4069 }
 0xfd1   :  { %v2764_v42 = vmul.f32 %v4070_v8, %v2763_v7  ;;  %v4072_v25 = vpop.eup %4071 }
 0xfd2   :  { %v2767_v14 = vsub.f32 1.0, %v4072_v25  ;;  %v2769_v40 = vmul.f32 %v4072_v25, %v5297_v48 }
 0xfd3   :  { %v2765_v22 = vadd.f32 %v2764_v42, %v1818_v11 }
 0xfd5   :  { %4073 = vtanh.f32 %v2765_v22 }
 0xfdf   :  { %v4074_v2 = vpop.eup %4073 }
 0xfe0   :  { %v2768_v51 = vmul.f32 %v4074_v2, %v2767_v14 }
 0xfe2   :  { %v5319_v46 = vadd.f32 %v2769_v40, %v2768_v51 }
 0xfe4   :  { %v2775_v28 = vpack.c.bf16 %v5319_v46, %v5319_v46 }
 0xfe6   :  { %2809 = vmatmul.mubr.bf16.vlgmr.msra.gmra.mrb[76].mxu0 %v2775_v28  ;;  %3748 = vmatmul.mubr.bf16.vlgmr.msra.gmra.mrb[92].mxu1 %v2775_v28 }
 0xfe7   :  { %3752 = vmatpush3.bf16.msra.mxu0 %v3917_v45  ;;  %3767 = vmatprep.mubr.bf16.mxu0 %v2888_v43 }
 0xfe8   :  { %3753 = vmatprep.subr.bf16.mxu0 %v3918_v13 }
 0xfeb   :  { %3754 = vmatpush3.bf16.msra.mxu0 %v3918_v13 }
 0xfec   :  { %3755 = vmatprep.subr.bf16.mxu0 %v3919_v24 }
 0xfef   :  { %3756 = vmatpush3.bf16.msra.mxu0 %v3919_v24 }
 0xff0   :  { %3757 = vmatprep.subr.bf16.mxu0 %v3920_v54 }
 0xff3   :  { %3758 = vmatpush3.bf16.msra.mxu0 %v3920_v54 }
 0xff4   :  { %3759 = vmatprep.subr.bf16.mxu0 %v3921_v30 }
 0xff7   :  { %3760 = vmatpush3.bf16.msra.mxu0 %v3921_v30 }
 0xff8   :  { %3761 = vmatprep.subr.bf16.mxu0 %v3922_v31 }
 0xffb   :  { %3762 = vmatpush3.bf16.msra.mxu0 %v3922_v31 }
 0xffc   :  { %3763 = vmatprep.subr.bf16.mxu0 %v3923_v5 }
 0xfff   :  { %3764 = vmatpush3.bf16.msra.mxu0 %v3923_v5 }
0x1000   :  { %3765 = vmatprep.subr.bf16.mxu0 %v3924_v35 }
0x1003   :  { %3766 = vmatpush3.bf16.msra.mxu0 %v3924_v35 }
0x1006   :  { %3768 = vmatmul.mubr.bf16.vlgmr.msra.gmra.mrb[80].mxu0 %v2889_v27 }
0x1007   :  { %3771 = vmatprep.mubr.bf16.mxu0 %v2890_v12 }
0x10b9   :  { %v2810_v44 = vpop.f32.mrb[76].mxu0  ;;  %v2851_v10 = vpop.f32.mrb[92].mxu1 }
0x10ba   :  { %v2857_v47 = vadd.f32 %v2810_v44, %v1755_v62  ;;  %v2812_v20 = vpop.f32.mrb[77].mxu0  ;;  %v3749_v3 = vpop.f32.mrb[93].mxu1  ;;  %v2871_v52 = vadd.f32 %v5053_v32, %v2851_v10 }
0x10bb   :  { %v2864_v33 = vadd.f32 %v2812_v20, %v1757_v63  ;;  %v2814_v41 = vpop.f32.mrb[78].mxu0  ;;  %v2854_v50 = vpop.f32.mrb[94].mxu1 }
0x10bc   :  { %v3192_v18 = vmul.f32 -1.442695, %v2857_v47  ;;  %v2815_v17 = vpop.f32.mrb[79].mxu0  ;;  %v3750_v45 = vpop.f32.mrb[95].mxu1 }
0x10bd   :  { %v3193_v6 = vmul.f32 -1.442695, %v2864_v33 }
0x10be   :  { %4075 = vpow2.f32 %v3192_v18 }
0x10bf   :  { %4077 = vpow2.f32 %v3193_v6 }
0x10c8   :  { %v4076_v48 = vpop.eup %4075 }
0x10c9   :  { %v2861_v38 = vadd.f32 1.0, %v4076_v48  ;;  %v4078_v19 = vpop.eup %4077 }
0x10ca   :  { %v2868_v29 = vadd.f32 1.0, %v4078_v19 }
0x10cb   :  { %4079 = vrcp.f32 %v2861_v38 }
0x10cc   :  { %4081 = vrcp.f32 %v2868_v29 }
0x10d5   :  { %v4080_v23 = vpop.eup %4079 }
0x10d6   :  { %v2872_v0 = vmul.f32 %v4080_v23, %v2871_v52  ;;  %v4082_v49 = vpop.eup %4081 }
0x10d7   :  { %v2875_v60 = vsub.f32 1.0, %v4082_v49  ;;  %v2877_v9 = vmul.f32 %v4082_v49, %v5319_v46 }
0x10d8   :  { %v2873_v55 = vadd.f32 %v2872_v0, %v1821_v39 }
0x10d9   :  { %v3769_v56 = vpop.f32.mrb[80].mxu0 }
0x10da   :  { %4083 = vtanh.f32 %v2873_v55  ;;  %v3006_v57 = vadd.f32 %v3769_v56, %v3194_v53  ;;  %v2997_v58 = vpop.f32.mrb[81].mxu0 }
0x10db   :  { %v2998_v1 = vadd.f32 %v3194_v53, %v2997_v58  ;;  %v3770_v59 = vpop.f32.mrb[82].mxu0 }
0x10dc   :  { %3030 = vst [vmem:[#allocation12 + $0x10] sm:$0xff] %v3006_v57  ;;  %v3009_v16 = vadd.f32 %v3770_v59, %v3194_v53  ;;  %v3000_v32 = vpop.f32.mrb[83].mxu0 }
0x10dd   :  { %3028 = vst [vmem:[#allocation12] sm:$0xff] %v2998_v1  ;;  %v3001_v37 = vadd.f32 %v3194_v53, %v3000_v32 }
0x10de   :  { %3031 = vst [vmem:[#allocation12 + $0x18] sm:$0xff] %v3009_v16 }
0x10df   :  { %3029 = vst [vmem:[#allocation12 + $0x8] sm:$0xff] %v3001_v37 }
0x10e4   :  { %v4084_v36 = vpop.eup %4083 }
0x10e5   :  { %v2876_v34 = vmul.f32 %v4084_v36, %v2875_v60 }
0x10e7   :  { %v2878_v4 = vadd.f32 %v2877_v9, %v2876_v34 }
0x10e9   :  { %v2891_v7 = vpack.c.bf16 %v2878_v4, %v5319_v46 }
0x10eb   :  { %3772 = vmatmul.mubr.bf16.gmra.mrb[84].mxu0 %v2891_v7 }
0x11be   :  { %v3773_v8 = vpop.f32.mrb[84].mxu0 }
0x11bf   :  { %v3022_v61 = vadd.f32 %v3773_v8, %v3194_v53  ;;  %v3013_v11 = vpop.f32.mrb[85].mxu0 }
0x11c0   :  { %v3014_v42 = vadd.f32 %v3194_v53, %v3013_v11  ;;  %v3774_v22 = vpop.f32.mrb[86].mxu0 }
0x11c1   :  { %3034 = vst [vmem:[#allocation12 + $0x30] sm:$0xff] %v3022_v61  ;;  %v3025_v25 = vadd.f32 %v3774_v22, %v3194_v53  ;;  %v3016_v14 = vpop.f32.mrb[87].mxu0 }
0x11c2   :  { %3032 = vst [vmem:[#allocation12 + $0x20] sm:$0xff] %v3014_v42  ;;  %v3017_v2 = vadd.f32 %v3194_v53, %v3016_v14 }
0x11c3   :  { %3035 = vst [vmem:[#allocation12 + $0x38] sm:$0xff] %v3025_v25 }
0x11c4   :  { %3033 = vst [vmem:[#allocation12 + $0x28] sm:$0xff] %v3017_v2 }
0x11c5   :  { %4224 = shalt.err (!%p4221_p8)
}
0x11c6   :  { %s4225_s21 = scalar_lea.hbm %s5363_s7, 1024 }
0x11c7   :  { %p4226_p9 = scmp.ne.s32.totalorder %s5363_s7, %s4225_s21  ;;  %p4229_p10 = scmp.lt.u32.totalorder %s4225_s21, %s5363_s7 }
0x11c9   :  { %p4231_p11 = pnand %p4229_p10, %p4226_p9 }
0x11cb   :  { %4234 = shalt.err (!%p4231_p11)
}
0x11cc   :  { %3047 = dma.vmem_to_hbm [thread:$0]  %s3042_s0, 1024, %s5363_s7, [#allocation6], %s4247_s1, %s4247_s1, %s4248_s25  }
0x11cd   :  { %4241 = dma.done.wait [#allocation6], 1024  }
0x11ce   :  { %4242 = vsyncadd [#allocation6], 4294966272 }
0x11cf   :  { %3051 = vsyncpa [#allocation5], 1 }
0x11d0   :  { %3052 = vsyncpa [#allocation8], 1 }
0x11d1   :  { %3053 = vsyncpa [#allocation11], 1 }
0x11d2   :  { %3054 = vsyncpa [#allocation6], 1 }

</bundles_post_ra>
